<compile_context>
chip_gen: v7x
topology: tpu7x:2x2x1
jax: 0.10.0
libtpu: 0.0.40
codegen_flags: <defaults>
</compile_context>

<pallas_src>
import functools

import jax
import jax.numpy as jnp
import numpy as np
from jax.experimental import pallas as pl
from jax.experimental.pallas import tpu as pltpu

LN_EPS = 1e-5  # PyTorch nn.LayerNorm default.


def _layernorm(x, gamma, beta):
    """Two-pass LayerNorm (matches torch: biased variance). x/gamma/beta f32."""
    mu = jnp.mean(x, axis=-1, keepdims=True)
    xc = x - mu
    var = jnp.mean(xc * xc, axis=-1, keepdims=True)
    inv = jax.lax.rsqrt(var + LN_EPS)          # EUP slot
    return xc * inv * gamma + beta


def smiles_embed_kernel(x_ref, w1_ref, p1_ref, w2_ref, p2_ref, o_ref):
    # Packed per-layer params: row 0 = bias, row 1 = LN gamma, row 2 = LN beta.
    p1 = p1_ref[...]                                   # (3, hidden)   f32
    p2 = p2_ref[...]                                   # (3, embedding) f32

    # ---- Linear 1: bf16 MXU operands (cast adjacent to the dot), f32 accumulate ----
    x_bf16 = x_ref[...].astype(jnp.bfloat16)
    h = jnp.dot(x_bf16, w1_ref[...], preferred_element_type=jnp.float32)
    h = h + p1[0:1, :]

    # ---- LayerNorm(hidden) + SiLU in f32 (required on v5e: no bf16 VPU/EUP) ----
    h = _layernorm(h, p1[1:2, :], p1[2:3, :])
    h = h * jax.nn.sigmoid(h)                          # SiLU
    # Dropout(p=0.1): identity in eval mode.

    # ---- Linear 2: bf16 MXU operands, f32 accumulate ----
    y = jnp.dot(h.astype(jnp.bfloat16), w2_ref[...],
                preferred_element_type=jnp.float32)
    y = y + p2[0:1, :]

    # ---- LayerNorm(embedding) ----
    y = _layernorm(y, p2[1:2, :], p2[2:3, :])

    o_ref[...] = y.astype(o_ref.dtype)


def prepare_params(w1, b1, g1, be1, w2, b2, g2, be2):
    """One-time param packing (call OUTSIDE the per-step jit):
       weights -> bf16 (MXU operands), bias/LN params -> one (3, dim) f32 slab/layer."""
    w1 = jnp.asarray(w1, jnp.bfloat16)
    w2 = jnp.asarray(w2, jnp.bfloat16)
    p1 = jnp.concatenate(
        [jnp.reshape(jnp.asarray(a, jnp.float32), (1, -1)) for a in (b1, g1, be1)], axis=0)
    p2 = jnp.concatenate(
        [jnp.reshape(jnp.asarray(a, jnp.float32), (1, -1)) for a in (b2, g2, be2)], axis=0)
    return w1, p1, w2, p2


@functools.partial(jax.jit, static_argnames=("batch_tile", "out_dtype"))
def smiles_embed(x, w1, p1, w2, p2, *, batch_tile=256, out_dtype=None):
    """Fused forward pass.

    x: [B, input_dim]; w1: [input_dim, hidden] bf16; p1: [3, hidden] f32;
    w2: [hidden, embedding] bf16; p2: [3, embedding] f32.
    Returns [B, embedding_dim] in out_dtype (default: x.dtype).
    """
    B, input_dim = x.shape
    hidden_dim = w1.shape[1]
    embedding_dim = w2.shape[1]
    out_dtype = x.dtype if out_dtype is None else out_dtype

    tile = batch_tile
    grid = (pl.cdiv(B, tile),)        # ragged final block handled by Pallas masking
    const = lambda i: (0, 0)          # grid-invariant operands: fetched once

    out_itemsize = jnp.dtype(out_dtype).itemsize
    cost = pl.CostEstimate(
        flops=2 * B * (input_dim * hidden_dim + hidden_dim * embedding_dim),
        transcendentals=B * hidden_dim,            # sigmoid in SiLU
        bytes_accessed=(B * input_dim * x.dtype.itemsize
                        + input_dim * hidden_dim * 2        # W1 bf16
                        + hidden_dim * embedding_dim * 2    # W2 bf16
                        + 3 * hidden_dim * 4 + 3 * embedding_dim * 4
                        + B * embedding_dim * out_itemsize),
    )

    return pl.pallas_call(
        smiles_embed_kernel,
        out_shape=jax.ShapeDtypeStruct((B, embedding_dim), out_dtype),
        grid=grid,
        in_specs=[
            pl.BlockSpec((tile, input_dim), lambda i: (i, 0)),      # x tile
            pl.BlockSpec((input_dim, hidden_dim), const),           # W1 (bf16)
            pl.BlockSpec((3, hidden_dim), const),                   # [b1; g1; be1]
            pl.BlockSpec((hidden_dim, embedding_dim), const),       # W2 (bf16)
            pl.BlockSpec((3, embedding_dim), const),                # [b2; g2; be2]
        ],
        out_specs=pl.BlockSpec((tile, embedding_dim), lambda i: (i, 0)),
        compiler_params=pltpu.CompilerParams(
            dimension_semantics=("parallel",)),                     # shards batch across v7x TCs
        cost_estimate=cost,
    )(x, w1, p1, w2, p2)


def reference(x, raw_params):
    """Pure-JAX f32 reference matching the PyTorch module (eval mode)."""
    w1, b1, g1, be1, w2, b2, g2, be2 = raw_params
    h = x.astype(jnp.float32) @ w1 + b1
    mu = jnp.mean(h, axis=-1, keepdims=True)
    var = jnp.mean((h - mu) ** 2, axis=-1, keepdims=True)
    h = (h - mu) * jax.lax.rsqrt(var + LN_EPS) * g1 + be1
    h = h * jax.nn.sigmoid(h)
    y = h @ w2 + b2
    mu = jnp.mean(y, axis=-1, keepdims=True)
    var = jnp.mean((y - mu) ** 2, axis=-1, keepdims=True)
    y = (y - mu) * jax.lax.rsqrt(var + LN_EPS) * g2 + be2
    return y.astype(x.dtype)


def init_params(key, input_dim, hidden_dim, embedding_dim, dtype=jnp.float32):
    k1, k2, k3, k4 = jax.random.split(key, 4)
    lim1 = 1.0 / np.sqrt(input_dim)
    lim2 = 1.0 / np.sqrt(hidden_dim)
    w1 = jax.random.uniform(k1, (input_dim, hidden_dim), dtype, -lim1, lim1)
    b1 = jax.random.uniform(k2, (1, hidden_dim), dtype, -lim1, lim1)
    w2 = jax.random.uniform(k3, (hidden_dim, embedding_dim), dtype, -lim2, lim2)
    b2 = jax.random.uniform(k4, (1, embedding_dim), dtype, -lim2, lim2)
    g1 = jnp.ones((1, hidden_dim), dtype)
    be1 = jnp.zeros((1, hidden_dim), dtype)
    g2 = jnp.ones((1, embedding_dim), dtype)
    be2 = jnp.zeros((1, embedding_dim), dtype)
    return (w1, b1, g1, be1, w2, b2, g2, be2)


if __name__ == "__main__":
    # Module defaults: hidden_dim=512, embedding_dim=256; x = [batch, input_dim]
    # Morgan-fingerprint vectors. batch=200 with tile=128 gives a 2-step grid
    # (pipelined / both v7x cores busy) and exercises the ragged final block
    # (no wrapper-side pad copy).
    batch, input_dim, hidden_dim, embedding_dim = 200, 256, 512, 256
    batch_tile = 128

    key = jax.random.PRNGKey(0)
    kx, kp = jax.random.split(key)
    x = jax.random.uniform(kx, (batch, input_dim), jnp.float32)
    raw = init_params(kp, input_dim, hidden_dim, embedding_dim)

    # One-time packing / bf16 weight cast (outside the per-call jit).
    w1, p1, w2, p2 = prepare_params(*raw)

    out = smiles_embed(x, w1, p1, w2, p2, batch_tile=batch_tile)
    out = jax.block_until_ready(out)

    ref = reference(x, raw)
    # bf16 MXU operands (f32 accumulate) => compare at relaxed tolerance vs f32 ref.
    np.testing.assert_allclose(np.asarray(out), np.asarray(ref), rtol=3e-2, atol=3e-2)

    print("KERNEL_OK")
</pallas_src>

<mosaic_0001>
module attributes {stable_mosaic.version = 11 : i64} {
  func.func @smiles_embed_kernel(%arg0: i32, %arg1: memref<128x256xf32, #tpu.memory_space<vmem>>, %arg2: memref<256x512xbf16, #tpu.memory_space<vmem>>, %arg3: memref<3x512xf32, #tpu.memory_space<vmem>>, %arg4: memref<512x256xbf16, #tpu.memory_space<vmem>>, %arg5: memref<3x256xf32, #tpu.memory_space<vmem>>, %arg6: memref<128x256xf32, #tpu.memory_space<vmem>>) attributes {dimension_semantics = [#tpu.dimension_semantics<parallel>], iteration_bounds = array<i64: 2>, scalar_prefetch = 0 : i64, scratch_operands = 0 : i64, tpu.core_type = #tpu.core_type<tc>, window_params = [{transform_indices = @transform_0, window_bounds = array<i64: 128, 256>}, {pipeline_mode = #tpu.pipeline_mode<synchronous>, transform_indices = @transform_1, window_bounds = array<i64: 256, 512>}, {pipeline_mode = #tpu.pipeline_mode<synchronous>, transform_indices = @transform_2, window_bounds = array<i64: 3, 512>}, {pipeline_mode = #tpu.pipeline_mode<synchronous>, transform_indices = @transform_3, window_bounds = array<i64: 512, 256>}, {pipeline_mode = #tpu.pipeline_mode<synchronous>, transform_indices = @transform_4, window_bounds = array<i64: 3, 256>}, {transform_indices = @transform_5, window_bounds = array<i64: 128, 256>}]} {
    %c0 = arith.constant 0 : index
    %c0_0 = arith.constant 0 : index
    %0 = vector.load %arg3[%c0, %c0_0] : memref<3x512xf32, #tpu.memory_space<vmem>>, vector<3x512xf32>
    %c0_1 = arith.constant 0 : index
    %c0_2 = arith.constant 0 : index
    %1 = vector.load %arg5[%c0_1, %c0_2] : memref<3x256xf32, #tpu.memory_space<vmem>>, vector<3x256xf32>
    %c0_3 = arith.constant 0 : index
    %c0_4 = arith.constant 0 : index
    %2 = vector.load %arg1[%c0_3, %c0_4] : memref<128x256xf32, #tpu.memory_space<vmem>>, vector<128x256xf32>
    %3 = arith.truncf %2 : vector<128x256xf32> to vector<128x256xbf16>
    %c0_5 = arith.constant 0 : index
    %c0_6 = arith.constant 0 : index
    %4 = vector.load %arg2[%c0_5, %c0_6] : memref<256x512xbf16, #tpu.memory_space<vmem>>, vector<256x512xbf16>
    %cst = arith.constant dense<0.000000e+00> : vector<128x512xf32>
    %5 = tpu.matmul %3, %4, %cst {dimension_numbers = #tpu.dot_dimension_numbers<[1], [0], [0], [1], [0, 0, 1, 1], [], []>} : vector<128x256xbf16>, vector<256x512xbf16>, vector<128x512xf32> -> vector<128x512xf32>
    %6 = vector.extract_strided_slice %0 {offsets = [0, 0], sizes = [1, 512], strides = [1, 1]} : vector<3x512xf32> to vector<1x512xf32>
    %7 = vector.broadcast %6 : vector<1x512xf32> to vector<128x512xf32>
    %8 = arith.addf %5, %7 : vector<128x512xf32>
    %9 = vector.extract_strided_slice %0 {offsets = [1, 0], sizes = [1, 512], strides = [1, 1]} : vector<3x512xf32> to vector<1x512xf32>
    %10 = vector.extract_strided_slice %0 {offsets = [2, 0], sizes = [1, 512], strides = [1, 1]} : vector<3x512xf32> to vector<1x512xf32>
    %cst_7 = arith.constant dense<0.000000e+00> : vector<128xf32>
    %11 = vector.multi_reduction <add>, %8, %cst_7 [1] : vector<128x512xf32> to vector<128xf32>
    %12 = vector.shape_cast %11 : vector<128xf32> to vector<128x1xf32>
    %cst_8 = arith.constant 5.120000e+02 : f32
    %13 = vector.broadcast %cst_8 : f32 to vector<128x1xf32>
    %14 = arith.divf %12, %13 : vector<128x1xf32>
    %15 = vector.broadcast %14 : vector<128x1xf32> to vector<128x512xf32>
    %16 = arith.subf %8, %15 : vector<128x512xf32>
    %17 = arith.mulf %16, %16 : vector<128x512xf32>
    %cst_9 = arith.constant dense<0.000000e+00> : vector<128xf32>
    %18 = vector.multi_reduction <add>, %17, %cst_9 [1] : vector<128x512xf32> to vector<128xf32>
    %19 = vector.shape_cast %18 : vector<128xf32> to vector<128x1xf32>
    %cst_10 = arith.constant 5.120000e+02 : f32
    %20 = vector.broadcast %cst_10 : f32 to vector<128x1xf32>
    %21 = arith.divf %19, %20 : vector<128x1xf32>
    %cst_11 = arith.constant 9.99999974E-6 : f32
    %22 = vector.broadcast %cst_11 : f32 to vector<128x1xf32>
    %23 = arith.addf %21, %22 : vector<128x1xf32>
    %24 = math.rsqrt %23 : vector<128x1xf32>
    %25 = vector.broadcast %24 : vector<128x1xf32> to vector<128x512xf32>
    %26 = arith.mulf %16, %25 : vector<128x512xf32>
    %27 = vector.broadcast %9 : vector<1x512xf32> to vector<128x512xf32>
    %28 = arith.mulf %26, %27 : vector<128x512xf32>
    %29 = vector.broadcast %10 : vector<1x512xf32> to vector<128x512xf32>
    %30 = arith.addf %28, %29 : vector<128x512xf32>
    %31 = arith.negf %30 : vector<128x512xf32>
    %32 = math.exp %31 : vector<128x512xf32>
    %cst_12 = arith.constant 1.000000e+00 : f32
    %33 = vector.broadcast %cst_12 : f32 to vector<128x512xf32>
    %34 = arith.addf %33, %32 : vector<128x512xf32>
    %35 = arith.divf %33, %34 : vector<128x512xf32>
    %36 = arith.mulf %30, %35 : vector<128x512xf32>
    %37 = arith.truncf %36 : vector<128x512xf32> to vector<128x512xbf16>
    %c0_13 = arith.constant 0 : index
    %c0_14 = arith.constant 0 : index
    %38 = vector.load %arg4[%c0_13, %c0_14] : memref<512x256xbf16, #tpu.memory_space<vmem>>, vector<512x256xbf16>
    %cst_15 = arith.constant dense<0.000000e+00> : vector<128x256xf32>
    %39 = tpu.matmul %37, %38, %cst_15 {dimension_numbers = #tpu.dot_dimension_numbers<[1], [0], [0], [1], [0, 0, 1, 1], [], []>} : vector<128x512xbf16>, vector<512x256xbf16>, vector<128x256xf32> -> vector<128x256xf32>
    %40 = vector.extract_strided_slice %1 {offsets = [0, 0], sizes = [1, 256], strides = [1, 1]} : vector<3x256xf32> to vector<1x256xf32>
    %41 = vector.broadcast %40 : vector<1x256xf32> to vector<128x256xf32>
    %42 = arith.addf %39, %41 : vector<128x256xf32>
    %43 = vector.extract_strided_slice %1 {offsets = [1, 0], sizes = [1, 256], strides = [1, 1]} : vector<3x256xf32> to vector<1x256xf32>
    %44 = vector.extract_strided_slice %1 {offsets = [2, 0], sizes = [1, 256], strides = [1, 1]} : vector<3x256xf32> to vector<1x256xf32>
    %cst_16 = arith.constant dense<0.000000e+00> : vector<128xf32>
    %45 = vector.multi_reduction <add>, %42, %cst_16 [1] : vector<128x256xf32> to vector<128xf32>
    %46 = vector.shape_cast %45 : vector<128xf32> to vector<128x1xf32>
    %cst_17 = arith.constant 2.560000e+02 : f32
    %47 = vector.broadcast %cst_17 : f32 to vector<128x1xf32>
    %48 = arith.divf %46, %47 : vector<128x1xf32>
    %49 = vector.broadcast %48 : vector<128x1xf32> to vector<128x256xf32>
    %50 = arith.subf %42, %49 : vector<128x256xf32>
    %51 = arith.mulf %50, %50 : vector<128x256xf32>
    %cst_18 = arith.constant dense<0.000000e+00> : vector<128xf32>
    %52 = vector.multi_reduction <add>, %51, %cst_18 [1] : vector<128x256xf32> to vector<128xf32>
    %53 = vector.shape_cast %52 : vector<128xf32> to vector<128x1xf32>
    %cst_19 = arith.constant 2.560000e+02 : f32
    %54 = vector.broadcast %cst_19 : f32 to vector<128x1xf32>
    %55 = arith.divf %53, %54 : vector<128x1xf32>
    %cst_20 = arith.constant 9.99999974E-6 : f32
    %56 = vector.broadcast %cst_20 : f32 to vector<128x1xf32>
    %57 = arith.addf %55, %56 : vector<128x1xf32>
    %58 = math.rsqrt %57 : vector<128x1xf32>
    %59 = vector.broadcast %58 : vector<128x1xf32> to vector<128x256xf32>
    %60 = arith.mulf %50, %59 : vector<128x256xf32>
    %61 = vector.broadcast %43 : vector<1x256xf32> to vector<128x256xf32>
    %62 = arith.mulf %60, %61 : vector<128x256xf32>
    %63 = vector.broadcast %44 : vector<1x256xf32> to vector<128x256xf32>
    %64 = arith.addf %62, %63 : vector<128x256xf32>
    %c0_21 = arith.constant 0 : index
    %c0_22 = arith.constant 0 : index
    %65 = vector.load %arg6[%c0_21, %c0_22] : memref<128x256xf32, #tpu.memory_space<vmem>>, vector<128x256xf32>
    tpu.vector_store %arg6[%c0_21, %c0_22], %64 {strides = array<i32>} : memref<128x256xf32, #tpu.memory_space<vmem>>, vector<128x256xf32>,
    return
  }
  func.func @transform_0(%arg0: i32) -> (i32, i32) {
    %c0_i32 = arith.constant 0 : i32
    %c0_i32_0 = arith.constant 0 : i32
    return %arg0, %c0_i32 : i32, i32
  }
  func.func @transform_1(%arg0: i32) -> (i32, i32) {
    %c0_i32 = arith.constant 0 : i32
    %c0_i32_0 = arith.constant 0 : i32
    %c0_i32_1 = arith.constant 0 : i32
    return %c0_i32, %c0_i32_0 : i32, i32
  }
  func.func @transform_2(%arg0: i32) -> (i32, i32) {
    %c0_i32 = arith.constant 0 : i32
    %c0_i32_0 = arith.constant 0 : i32
    %c0_i32_1 = arith.constant 0 : i32
    return %c0_i32, %c0_i32_0 : i32, i32
  }
  func.func @transform_3(%arg0: i32) -> (i32, i32) {
    %c0_i32 = arith.constant 0 : i32
    %c0_i32_0 = arith.constant 0 : i32
    %c0_i32_1 = arith.constant 0 : i32
    return %c0_i32, %c0_i32_0 : i32, i32
  }
  func.func @transform_4(%arg0: i32) -> (i32, i32) {
    %c0_i32 = arith.constant 0 : i32
    %c0_i32_0 = arith.constant 0 : i32
    %c0_i32_1 = arith.constant 0 : i32
    return %c0_i32, %c0_i32_0 : i32, i32
  }
  func.func @transform_5(%arg0: i32) -> (i32, i32) {
    %c0_i32 = arith.constant 0 : i32
    %c0_i32_0 = arith.constant 0 : i32
    return %arg0, %c0_i32 : i32, i32
  }
}

</mosaic_0001>

<bundles_post_ra>
// kernel: smiles_embed.1
= control target key start
LH: loop header
LB: loop body
LE: loop exit
PB: predicated region body
PF: predicated region fallthrough
CT: control target
= control target key end

     0   :  { %10 = vsyncpa [#allocation3], 0  ;;  %s6481_s0 = inlined_call_operand.hbm [shape: f32[200,256], index: 0, kind: input, shape index: {}]   ;;  %s6482_s1 = inlined_call_operand.hbm [shape: bf16[256,512], index: 1, kind: input, shape index: {}]   ;;  %s6483_s2 = inlined_call_operand.hbm [shape: f32[3,512], index: 2, kind: input, shape index: {}]   ;;  %s6484_s3 = inlined_call_operand.hbm [shape: bf16[512,256], index: 3, kind: input, shape index: {}]   ;;  %s6485_s4 = inlined_call_operand.vmem [shape: f32[3,256], index: 4, kind: input, shape index: {}]   ;;  %s6486_s5 = inlined_call_operand.hbm [shape: f32[200,256], index: 5, kind: output, shape index: {}]  }
   0x1   :  { %12 = vsyncpa [#allocation3 + $0x1], 0 }
   0x2   :  { %13 = vsyncpa [#allocation6], 0 }
   0x3   :  { %14 = vsyncpa [#allocation9], 0 }
   0x4   :  { %15 = vsyncpa [#allocation4], 0 }
   0x5   :  { %17 = vsyncpa [#allocation4 + $0x1], 0  ;;  %s4358_s18 = smov 0   ;;  %s4360_s19 = smov 0  }
   0x6   :  { %s4362_s20 = smov 0   ;;  %s4364_s21 = smov 0  }
   0x7 LB: > { %s4379_s22 = sadd.s32 4294967295, %s4313_s21   ;;  %s3243_s23 = sadd.s32 4294967294, %s4313_s21   ;;  %s4313_s21 = sphi %s4364_s21, %s6711_s21   ;;  %s4309_s20 = sphi %s4362_s20, %s6715_s20   ;;  %s4305_s19 = sphi %s4360_s19, %s6714_s19   ;;  %s4301_s18 = sphi %s4358_s18, %s6713_s18  }
   0x8   : > { %s4383_s24 = sadd.s32 1, %s4313_s21   ;;  %s30_s25 = sadd.s32 1, %s4309_s20 }
   0x9   : > { %6567 = sst [smem:[#allocation15_spill]] %s4383_s24  ;;  %s27_s26 = ssub.s32 %s4313_s21, %s4383_s24 }
   0xa   : > { %p37_p0 = scmp.ne.s32.totalorder %s4309_s20, %s4305_s19  ;;  %p28_p1 = scmp.eq.s32.totalorder %s27_s26, 0 }
   0xb   : > { %p38_p2 = scmp.eq.s32.totalorder %s4313_s21, 0  ;;  %p43_p3 = scmp.ne.s32.totalorder %s4305_s19, %s4301_s18 }
   0xc   : > { %p6487_p4 = scmp.eq.s32.totalorder %s4379_s22, 0  ;;  %p151_p7 = scmp.eq.s32.totalorder %s4379_s22, 1 }
   0xd   : > { %s4395_s27 = scalar_select %p28_p1, %s4309_s20, %s30_s25  }
   0xe   : > { %p4397_p5 = por %p38_p2, %p37_p0  ;;  %p4403_p6 = por %p6487_p4, %p43_p3 }
   0xf   : > { %6568 = sst [smem:[#allocation16_spill]] %s4395_s27  ;;  %p157_p8 = scmp.eq.s32.totalorder %s3243_s23, 1 }
  0x10   : > { %s6569_s28 = scalar_select %p4397_p5, 1, 0 }
  0x11   : > { %s6570_s29 = scalar_select %p4403_p6, 1, 0 }
  0x12   : > { %p3244_p9 = scmp.ge.s32.totalorder %s4313_s21, 1  ;;  %p164_p10 = scmp.lt.s32.totalorder %s4313_s21, 3 }
  0x13   : > { %p4410_p11 = por %p151_p7, %p37_p0  ;;  %p4414_p12 = por %p157_p8, %p43_p3 }
  0x14   : > { %p4418_p13 = pnand %p3244_p9, %p164_p10  ;;  %s4315_s8 = smov [#allocation5]  }
  0x15   : > { %s6571_s30 = scalar_select %p4410_p11, 1, 0 }
  0x16   : > { %s6572_s6 = scalar_select %p4414_p12, 1, 0 }
  0x17   : > { %s6573_s7 = scalar_select %p4418_p13, 1, 0 }
  0x18   : > { %p3551_p1 = pneg %p4418_p13  ;;  %s176_s9 = sshll.u32 %s4315_s8, 4  ;;  %s177_s9 = int_to_ptr.vmem [resolvable:$true] %s176_s9 }
  0x19   : > { %s4316_s11 = smov [#allocation7]   ;;  %s4127_s15 = scalar_lea.hbm %s6482_s1, 8192 }
  0x1a   : > { %p4426_p2 = pnand %p3551_p1, %p6487_p4  ;;  %s190_s12 = sshll.u32 %s4316_s11, 4  ;;  %s4430_s12 = int_to_ptr.vmem [resolvable:$true] %s190_s12 }
  0x1b   : > { %p4128_p0 = scmp.ne.s32.totalorder %s6482_s1, %s4127_s15  ;;  %p4134_p9 = scmp.lt.u32.totalorder %s4127_s15, %s6482_s1 }
  0x1c   : > { %p4440_p3 = pneg %p4426_p2 }
  0x1e   : > { %p4130_p7 = pnand %p4440_p3, %p4128_p0 }
  0x20   : > { %p4131_p8 = pneg %p4130_p7 }
  0x22   : > { %p4136_p10 = pnand %p4134_p9, %p4131_p8 }
  0x24   : > { %4139 = shalt.err (!%p4136_p10)
}
  0x25   : > { %s4140_s8 = scalar_lea.vmem %s177_s9, 8192  ;;  %p4148_p11 = scmp.lt.s32.totalorder %s177_s9, %s177_s9 }
  0x26   : > { %p4141_p1 = scmp.ne.s32.totalorder %s177_s9, %s4140_s8  ;;  %p4149_p6 = scmp.lt.s32.totalorder %s4140_s8, %s4140_s8 }
  0x28   : > { %p4143_p4 = pnand %p4141_p1, %p4440_p3  ;;  %p4150_p13 = por %p4149_p6, %p4148_p11 }
  0x2a   : > { %p4144_p12 = pneg %p4143_p4 }
  0x2c   : > { %p4151_p5 = pnand %p4150_p13, %p4144_p12 }
  0x2e   : > { %4154 = shalt.err (!%p4151_p5)
}
  0x2f   : > { %s4317_s11 = smov 256   ;;  %s4318_s13 = smov 16  }
  0x30   : > { %3554 = dma.hbm_to_vmem [thread:$0]  (!%p4426_p2), %s6482_s1, 8192, %s177_s9, [#allocation6], %s4317_s11, %s4317_s11, %s4318_s13  }
  0x31   : > { %s4155_s25 = scalar_lea.hbm %s6483_s2, 256 }
  0x32   : > { %p4156_p4 = scmp.ne.s32.totalorder %s6483_s2, %s4155_s25  ;;  %p4162_p11 = scmp.lt.u32.totalorder %s4155_s25, %s6483_s2 }
  0x34   : > { %p4158_p6 = pnand %p4156_p4, %p4440_p3 }
  0x36   : > { %p4159_p5 = pneg %p4158_p6 }
  0x38   : > { %p4164_p12 = pnand %p4162_p11, %p4159_p5 }
  0x3a   : > { %4167 = shalt.err (!%p4164_p12)
}
  0x3b   : > { %s4168_s9 = scalar_lea.vmem %s4430_s12, 256  ;;  %p4176_p8 = scmp.lt.s32.totalorder %s4430_s12, %s4430_s12 }
  0x3c   : > { %p4169_p13 = scmp.ne.s32.totalorder %s4430_s12, %s4168_s9  ;;  %p4177_p9 = scmp.lt.s32.totalorder %s4168_s9, %s4168_s9 }
  0x3e   : > { %p4171_p0 = pnand %p4169_p13, %p4440_p3  ;;  %p4178_p10 = por %p4177_p9, %p4176_p8 }
  0x40   : > { %p4172_p7 = pneg %p4171_p0 }
  0x42   : > { %p4179_p1 = pnand %p4178_p10, %p4172_p7 }
  0x44   : > { %4182 = shalt.err (!%p4179_p1)
}
  0x45   : > { %3557 = dma.hbm_to_vmem [thread:$0]  (!%p4426_p2), %s6483_s2, 256, %s4430_s12, [#allocation6]  }
  0x46   : > { %s4319_s11 = smov [#allocation8]   ;;  %s4183_s16 = scalar_lea.hbm %s6484_s3, 8192 }
  0x47   : > { %s200_s13 = sshll.u32 %s4319_s11, 4  ;;  %p4184_p4 = scmp.ne.s32.totalorder %s6484_s3, %s4183_s16  ;;  %s201_s13 = int_to_ptr.vmem [resolvable:$true] %s200_s13 }
  0x48   : > { %p4190_p11 = scmp.lt.u32.totalorder %s4183_s16, %s6484_s3 }
  0x49   : > { %p4186_p6 = pnand %p4184_p4, %p4440_p3 }
  0x4b   : > { %p4187_p5 = pneg %p4186_p6 }
  0x4d   : > { %p4192_p12 = pnand %p4190_p11, %p4187_p5 }
  0x4f   : > { %4195 = shalt.err (!%p4192_p12)
}
  0x50   : > { %s4196_s12 = scalar_lea.vmem %s201_s13, 8192  ;;  %p4204_p8 = scmp.lt.s32.totalorder %s201_s13, %s201_s13 }
  0x51   : > { %p4197_p13 = scmp.ne.s32.totalorder %s201_s13, %s4196_s12  ;;  %p4205_p9 = scmp.lt.s32.totalorder %s4196_s12, %s4196_s12 }
  0x53   : > { %p4199_p0 = pnand %p4197_p13, %p4440_p3  ;;  %p4206_p10 = por %p4205_p9, %p4204_p8 }
  0x55   : > { %p4200_p7 = pneg %p4199_p0 }
  0x57   : > { %p4207_p1 = pnand %p4206_p10, %p4200_p7 }
  0x59   : > { %4210 = shalt.err (!%p4207_p1)
}
  0x5a   : > { %s4320_s9 = smov 128   ;;  %s4321_s24 = smov 8  }
  0x5b   : > { %3560 = dma.hbm_to_vmem [thread:$0]  (!%p4426_p2), %s6484_s3, 8192, %s201_s13, [#allocation9], %s4320_s9, %s4320_s9, %s4321_s24  }
  0x5c   : > { %p3248_p4 = scmp.ge.s32.totalorder %s4313_s21, 2 }
  0x5d   : > { %p6576_p3 = scmp.ne.s32.totalorder (!%p3248_p4), %s6569_s28, 0 }
  0x5e   : > { %213 = sbr.rel (%p3248_p4) target bundleno = 136 (0x88), region = 32 }
  0x65   : > { %216 = sbr.rel (!%p6576_p3) target bundleno = 136 (0x88), region = 36  ;;  %s217_s23 = sand.u32 (%p6576_p3), 1, %s4309_s20  }
  0x66   : > { %s3250_s14 = sshll.u32 (%p6576_p3), %s4313_s21, 4  ;;  %s3249_s15 = sshll.u32 (%p6576_p3), %s217_s23, 8 }
  0x67   : > { %s223_s16 = ssub.s32 (%p6576_p3), 25, %s3250_s14  ;;  %s4507_s17 = scalar_lea.sflag (%p6576_p3), [#allocation3], %s217_s23 }
  0x68   : > { %p224_p6 = scmp.lt.s32.totalorder (%p6576_p3), %s223_s16, 16  ;;  %s221_s25 = scalar_lea.vmem (%p6576_p3), [#allocation2], %s3249_s15 }
  0x6c   : > { %s6717_s16 = smov (!%p224_p6, %s223_s16), 16 }
  0x6d   : > { %s4504_s10 = sshll.u32 %s6717_s16, 8 }
  0x6e   : > { %s229_s13 = ssub.s32 4096, %s4504_s10 }
  0x6f   : > { %230 = vsyncadd %s4507_s17, %s229_s13  ;;  %p3253_p2 = scmp.ne.s32.totalorder %s4504_s10, 0  ;;  %s3469_s28 = sshll.u32 %s4313_s21, 12 }
  0x70   : > { %s4515_s12 = scalar_lea.hbm %s6481_s0, %s3469_s28  ;;  %s236_s9 = sshll.u32 %s221_s25, 4  ;;  %s4517_s9 = int_to_ptr.vmem [resolvable:$true] %s236_s9 }
  0x71   : > { %s4211_s24 = scalar_lea.hbm %s4515_s12, %s4504_s10  ;;  %s4215_s23 = scalar_lea.hbm %s6481_s0, 6400 }
  0x72   : > { %p4212_p5 = scmp.ne.s32.totalorder %s4515_s12, %s4211_s24  ;;  %p4216_p13 = scmp.lt.u32.totalorder %s4515_s12, %s6481_s0 }
  0x73   : > { %p4217_p0 = scmp.lt.u32.totalorder %s4215_s23, %s4211_s24  ;;  %p4219_p8 = scmp.lt.u32.totalorder %s4211_s24, %s4515_s12 }
  0x74   : > { %p4213_p11 = pnand %p4212_p5, %p3253_p2 }
  0x75   : > { %p4218_p7 = por %p4217_p0, %p4216_p13 }
  0x76   : > { %p4214_p12 = pneg %p4213_p11 }
  0x77   : > { %p4220_p9 = por %p4219_p8, %p4218_p7 }
  0x79   : > { %p4221_p10 = pnand %p4220_p9, %p4214_p12 }
  0x7b   : > { %4224 = shalt.err (!%p4221_p10)
}
  0x7c   : > { %s4225_s16 = scalar_lea.vmem %s4517_s9, %s4504_s10  ;;  %s4322_s13 = smov [#allocation2]  }
  0x7d   : > { %p4226_p1 = scmp.ne.s32.totalorder %s4517_s9, %s4225_s16  ;;  %s4229_s25 = sshll.u32 %s4322_s13, 4  ;;  %s4230_s25 = int_to_ptr.vmem [resolvable:$false] %s4229_s25 }
  0x7e   : > { %s4231_s28 = scalar_lea.vmem %s4230_s25, 8192  ;;  %p4232_p5 = scmp.lt.s32.totalorder %s4517_s9, %s4230_s25 }
  0x7f   : > { %p4227_p3 = pnand %p4226_p1, %p3253_p2  ;;  %p4233_p11 = scmp.lt.s32.totalorder %s4231_s28, %s4225_s16 }
  0x81   : > { %p4228_p6 = pneg %p4227_p3  ;;  %p4234_p13 = por %p4233_p11, %p4232_p5 }
  0x83   : > { %p4235_p0 = pnand %p4234_p13, %p4228_p6 }
  0x85   : > { %4238 = shalt.err (!%p4235_p0)
}
  0x86   : > { %s4323_s26 = smov 256   ;;  %s4324_s8 = smov 16  }
  0x87   : > { %242 = dma.hbm_to_vmem [thread:$0]  (%p3253_p2), %s4515_s12, %s4504_s10, %s4517_s9, %s4507_s17, %s4323_s26, %s4323_s26, %s4324_s8  }
  0x88 PF: > { %p6577_p12 = scmp.ne.s32.totalorder %s6573_s7, 0 }
  0x8a   : > { %248 = sbr.rel (%p6577_p12) target bundleno = 1548 (0x60c), region = 40 }
  0x91   : > { %s4547_s24 = sand.u32 1, %s4305_s19   ;;  %p6578_p7 = scmp.ne.s32.totalorder %s6570_s29, 0 }
  0x92   : > { %s3259_s27 = sshll.u32 %s4547_s24, 8  ;;  %s251_s11 = scalar_lea.sflag [#allocation3], %s4547_s24 }
  0x93   : > { %s4553_s23 = scalar_lea.vmem [#allocation2], %s3259_s27 }
  0x94   : > { %4284 = dma.done.wait (%p6578_p7), %s251_s11, 4096  }
  0x95   : > { %4286 = vsyncadd (%p6578_p7), %s251_s11, 4294963200  ;;  %p6579_p2 = scmp.eq.s32.totalorder %s4379_s22, 0 }
  0x97   : > { %4288 = dma.done.wait (%p6579_p2), [#allocation6], 8448   ;;  %p6580_p8 = pmov %p6579_p2 }
  0x98   : > { %p6581_p9 = pmov %p6579_p2 }
  0x99   : > { %4290 = vsyncadd (%p6580_p8), [#allocation6], 4294958848 }
  0x9a   : > { %4292 = dma.done.wait (%p6581_p9), [#allocation9], 8192   ;;  %p6582_p10 = pmov %p6579_p2 }
  0x9b   : > { %v3615_v0 = vld [vmem:[#allocation5 + $0x4] ss:$16 sps:$4 sm:$0xff]   ;;  %v3617_v1 = vld [vmem:[#allocation5] ss:$16 sps:$4 sm:$0xff]   ;;  %v309_v13 = vld [vmem:[%s4553_s23 + $0x8] sm:$0xff]  ;;  %s6298_s10 = scalar_lea.vmem [#allocation10], %s3259_s27 }
  0x9c   : > { %4294 = vsyncadd (%p6582_p10), [#allocation9], 4294959104  ;;  %778 = vmatprep.subr.bf16.mxu1 %v3615_v0  ;;  %v3618_v2 = vld [vmem:[#allocation5 + $0x24] ss:$16 sps:$4 sm:$0xff]   ;;  %v3620_v3 = vld [vmem:[#allocation5 + $0x20] ss:$16 sps:$4 sm:$0xff]  }
  0x9d   : > { %779 = vmatpush1.bf16.msra.mxu1 %v3617_v1  ;;  %v3621_v4 = vld [vmem:[#allocation5 + $0x44] ss:$16 sps:$4 sm:$0xff]   ;;  %v3623_v5 = vld [vmem:[#allocation5 + $0x40] ss:$16 sps:$4 sm:$0xff]   ;;  %v311_v14 = vld [vmem:[%s4553_s23 + $0x18] sm:$0xff]  ;;  %s3120_s17 = scalar_lea.sflag [#allocation4], %s4547_s24 }
  0x9e   : > { %780 = vmatprep.subr.bf16.mxu1 %v3618_v2  ;;  %v3624_v6 = vld [vmem:[#allocation5 + $0x64] ss:$16 sps:$4 sm:$0xff]   ;;  %v3626_v7 = vld [vmem:[#allocation5 + $0x60] ss:$16 sps:$4 sm:$0xff]   ;;  %v4569_v15 = vpack.c.bf16 %v311_v14, %v309_v13  ;;  %v3665_v37 = vld [vmem:[#allocation5 + $0xc] ss:$16 sps:$4 sm:$0xff]  }
  0x9f   : > { %v3627_v8 = vld [vmem:[#allocation5 + $0x84] ss:$16 sps:$4 sm:$0xff]   ;;  %v3629_v9 = vld [vmem:[#allocation5 + $0x80] ss:$16 sps:$4 sm:$0xff]   ;;  %v313_v38 = vld [vmem:[%s4553_s23 + $0x28] sm:$0xff]  ;;  %p6709_p1 = scmp.ne.s32.totalorder %s6571_s30, 0 }
  0xa0   : > { %v3630_v10 = vld [vmem:[#allocation5 + $0xa4] ss:$16 sps:$4 sm:$0xff]   ;;  %v3632_v11 = vld [vmem:[#allocation5 + $0xa0] ss:$16 sps:$4 sm:$0xff]   ;;  %810 = vmatprep.mubr.bf16.mxu1 %v4569_v15  ;;  %v315_v39 = vld [vmem:[%s4553_s23 + $0x38] sm:$0xff]  ;;  %s3457_s12 = sshll.u32 (%p6709_p1), %s4379_s22, 4 }
  0xa1   : > { %781 = vmatpush1.bf16.msra.mxu1 %v3620_v3  ;;  %v3633_v12 = vld [vmem:[#allocation5 + $0xc4] ss:$16 sps:$4 sm:$0xff]   ;;  %v3635_v16 = vld [vmem:[#allocation5 + $0xc0] ss:$16 sps:$4 sm:$0xff]   ;;  %v3663_v40 = vld [vmem:[#allocation5 + $0x8] ss:$16 sps:$4 sm:$0xff]   ;;  %v4578_v43 = vpack.c.bf16 %v315_v39, %v313_v38 }
  0xa2   : > { %782 = vmatprep.subr.bf16.mxu1 %v3621_v4  ;;  %v3636_v17 = vld [vmem:[#allocation5 + $0xe4] ss:$16 sps:$4 sm:$0xff]   ;;  %v3638_v18 = vld [vmem:[#allocation5 + $0xe0] ss:$16 sps:$4 sm:$0xff]   ;;  %v3668_v42 = vld [vmem:[#allocation5 + $0x2c] ss:$16 sps:$4 sm:$0xff]  }
  0xa3   : > { %v3639_v19 = vld [vmem:[#allocation5 + $0x104] ss:$16 sps:$4 sm:$0xff]   ;;  %v3641_v20 = vld [vmem:[#allocation5 + $0x100] ss:$16 sps:$4 sm:$0xff]   ;;  %v3666_v44 = vld [vmem:[#allocation5 + $0x28] ss:$16 sps:$4 sm:$0xff]  }
  0xa4   : > { %v3642_v21 = vld [vmem:[#allocation5 + $0x124] ss:$16 sps:$4 sm:$0xff]   ;;  %v3644_v22 = vld [vmem:[#allocation5 + $0x120] ss:$16 sps:$4 sm:$0xff]   ;;  %v3671_v47 = vld [vmem:[#allocation5 + $0x4c] ss:$16 sps:$4 sm:$0xff]  }
  0xa5   : > { %783 = vmatpush1.bf16.msra.mxu1 %v3623_v5  ;;  %v3645_v23 = vld [vmem:[#allocation5 + $0x144] ss:$16 sps:$4 sm:$0xff]   ;;  %v3647_v24 = vld [vmem:[#allocation5 + $0x140] ss:$16 sps:$4 sm:$0xff]   ;;  %v317_v48 = vld [vmem:[%s4553_s23 + $0x48] sm:$0xff]  ;;  %s3128_s9 = ssub.s32 (%p6709_p1), 25, %s3457_s12 }
  0xa6   : > { %784 = vmatprep.subr.bf16.mxu1 %v3624_v6  ;;  %v3648_v25 = vld [vmem:[#allocation5 + $0x164] ss:$16 sps:$4 sm:$0xff]   ;;  %v3650_v26 = vld [vmem:[#allocation5 + $0x160] ss:$16 sps:$4 sm:$0xff]   ;;  %v319_v49 = vld [vmem:[%s4553_s23 + $0x58] sm:$0xff]  ;;  %p3129_p3 = scmp.lt.s32.totalorder (%p6709_p1), %s3128_s9, 16 }
  0xa7   : > { %v3651_v27 = vld [vmem:[#allocation5 + $0x184] ss:$16 sps:$4 sm:$0xff]   ;;  %v3653_v28 = vld [vmem:[#allocation5 + $0x180] ss:$16 sps:$4 sm:$0xff]   ;;  %v3669_v50 = vld [vmem:[#allocation5 + $0x48] ss:$16 sps:$4 sm:$0xff]   ;;  %v4588_v53 = vpack.c.bf16 %v319_v49, %v317_v48 }
  0xa8   : > { %v3654_v29 = vld [vmem:[#allocation5 + $0x1a4] ss:$16 sps:$4 sm:$0xff]   ;;  %v3656_v30 = vld [vmem:[#allocation5 + $0x1a0] ss:$16 sps:$4 sm:$0xff]   ;;  %v3674_v52 = vld [vmem:[#allocation5 + $0x6c] ss:$16 sps:$4 sm:$0xff]  }
  0xa9   : > { %785 = vmatpush1.bf16.msra.mxu1 %v3626_v7  ;;  %v3657_v31 = vld [vmem:[#allocation5 + $0x1c4] ss:$16 sps:$4 sm:$0xff]   ;;  %v3659_v32 = vld [vmem:[#allocation5 + $0x1c0] ss:$16 sps:$4 sm:$0xff]   ;;  %v3672_v54 = vld [vmem:[#allocation5 + $0x68] ss:$16 sps:$4 sm:$0xff]  }
  0xaa   : > { %786 = vmatprep.subr.bf16.mxu1 %v3627_v8  ;;  %v3660_v33 = vld [vmem:[#allocation5 + $0x1e4] ss:$16 sps:$4 sm:$0xff]   ;;  %v3662_v34 = vld [vmem:[#allocation5 + $0x1e0] ss:$16 sps:$4 sm:$0xff]   ;;  %v3677_v57 = vld [vmem:[#allocation5 + $0x8c] ss:$16 sps:$4 sm:$0xff]  }
  0xab   : > { %v308_v35 = vld [vmem:[%s4553_s23] sm:$0xff]  ;;  %v310_v36 = vld [vmem:[%s4553_s23 + $0x10] sm:$0xff]  ;;  %v321_v58 = vld [vmem:[%s4553_s23 + $0x68] sm:$0xff] }
  0xac   : > { %v4576_v41 = vpack.c.bf16 %v310_v36, %v308_v35  ;;  %v312_v45 = vld [vmem:[%s4553_s23 + $0x20] sm:$0xff]  ;;  %v314_v46 = vld [vmem:[%s4553_s23 + $0x30] sm:$0xff]  ;;  %v323_v59 = vld [vmem:[%s4553_s23 + $0x78] sm:$0xff] }
  0xad   : > { %787 = vmatpush1.bf16.msra.mxu1 %v3629_v9  ;;  %v4586_v51 = vpack.c.bf16 %v314_v46, %v312_v45  ;;  %v316_v55 = vld [vmem:[%s4553_s23 + $0x40] sm:$0xff]  ;;  %v318_v56 = vld [vmem:[%s4553_s23 + $0x50] sm:$0xff]  ;;  %v3675_v61 = vld [vmem:[#allocation5 + $0x88] ss:$16 sps:$4 sm:$0xff]   ;;  %v4598_v62 = vpack.c.bf16 %v323_v59, %v321_v58 }
  0xae   : > { %788 = vmatprep.subr.bf16.mxu1 %v3630_v10  ;;  %v4596_v60 = vpack.c.bf16 %v318_v56, %v316_v55  ;;  %v3680_v63 = vld [vmem:[#allocation5 + $0xac] ss:$16 sps:$4 sm:$0xff]   ;;  %v3678_v0 = vld [vmem:[#allocation5 + $0xa8] ss:$16 sps:$4 sm:$0xff]   ;;  %v320_v1 = vld [vmem:[%s4553_s23 + $0x60] sm:$0xff] }
  0xaf   : > { %v322_v2 = vld [vmem:[%s4553_s23 + $0x70] sm:$0xff]  ;;  %v3683_v3 = vld [vmem:[#allocation5 + $0xcc] ss:$16 sps:$4 sm:$0xff]   ;;  %v3681_v7 = vld [vmem:[#allocation5 + $0xc8] ss:$16 sps:$4 sm:$0xff]  }
  0xb0   : > { %v325_v4 = vld [vmem:[%s4553_s23 + $0x88] sm:$0xff]  ;;  %v327_v5 = vld [vmem:[%s4553_s23 + $0x98] sm:$0xff]  ;;  %v4606_v6 = vpack.c.bf16 %v322_v2, %v320_v1  ;;  %v338_v45 = vld [vmem:[%s4553_s23 + $0xf0] sm:$0xff] }
  0xb1   : > { %789 = vmatpush1.bf16.msra.mxu1 %v3632_v11  ;;  %v4608_v8 = vpack.c.bf16 %v327_v5, %v325_v4  ;;  %v3686_v9 = vld [vmem:[#allocation5 + $0xec] ss:$16 sps:$4 sm:$0xff]   ;;  %v3684_v10 = vld [vmem:[#allocation5 + $0xe8] ss:$16 sps:$4 sm:$0xff]   ;;  %v324_v11 = vld [vmem:[%s4553_s23 + $0x80] sm:$0xff]  ;;  %v422_v5 = vlaneseq }
  0xb2   : > { %790 = vmatprep.subr.bf16.mxu1 %v3633_v12  ;;  %v326_v12 = vld [vmem:[%s4553_s23 + $0x90] sm:$0xff]  ;;  %v3689_v13 = vld [vmem:[#allocation5 + $0x10c] ss:$16 sps:$4 sm:$0xff]   ;;  %v3699_v38 = vld [vmem:[#allocation5 + $0x188] ss:$16 sps:$4 sm:$0xff]  }
  0xb3   : > { %v329_v14 = vld [vmem:[%s4553_s23 + $0xa8] sm:$0xff]  ;;  %v339_v36 = vld [vmem:[%s4553_s23 + $0xf8] sm:$0xff] }
  0xb4   : > { %v337_v35 = vld [vmem:[%s4553_s23 + $0xe8] sm:$0xff] }
  0xb5   : > { %791 = vmatpush1.bf16.msra.mxu1 %v3635_v16  ;;  %v331_v16 = vld [vmem:[%s4553_s23 + $0xb8] sm:$0xff]  ;;  %v355_v39 = vpack.c.bf16 %v339_v36, %v337_v35 }
  0xb6   : > { %792 = vmatprep.subr.bf16.mxu1 %v3636_v17  ;;  %v4616_v17 = vpack.c.bf16 %v326_v12, %v324_v11  ;;  %v3707_v46 = vld [vmem:[#allocation5 + $0x1cc] ss:$16 sps:$4 sm:$0xff]   ;;  %v3705_v48 = vld [vmem:[#allocation5 + $0x1c8] ss:$16 sps:$4 sm:$0xff]  }
  0xb7   : > { %v3710_v49 = vld [vmem:[#allocation5 + $0x1ec] ss:$16 sps:$4 sm:$0xff]  }
  0xb9   : > { %793 = vmatpush1.bf16.msra.mxu1 %v3638_v18  ;;  %v3687_v18 = vld [vmem:[#allocation5 + $0x108] ss:$16 sps:$4 sm:$0xff]  }
  0xba   : > { %794 = vmatprep.subr.bf16.mxu1 %v3639_v19  ;;  %v351_v19 = vpack.c.bf16 %v331_v16, %v329_v14  ;;  %v4683_v14 = vld [vmem:[#allocation7] sm:$0x77] }
  0xbb   : > { %6586 = vst [vmem:[#allocation20_spill] sm:$0xff] %v4683_v14 }
  0xbd   : > { %795 = vmatpush1.bf16.msra.mxu1 %v3641_v20  ;;  %v3692_v20 = vld [vmem:[#allocation5 + $0x12c] ss:$16 sps:$4 sm:$0xff]  }
  0xbe   : > { %796 = vmatprep.subr.bf16.mxu1 %v3642_v21  ;;  %v3690_v21 = vld [vmem:[#allocation5 + $0x128] ss:$16 sps:$4 sm:$0xff]  }
  0xc1   : > { %797 = vmatpush1.bf16.msra.mxu1 %v3644_v22  ;;  %v328_v22 = vld [vmem:[%s4553_s23 + $0xa0] sm:$0xff] }
  0xc2   : > { %798 = vmatprep.subr.bf16.mxu1 %v3645_v23  ;;  %v330_v23 = vld [vmem:[%s4553_s23 + $0xb0] sm:$0xff] }
  0xc5   : > { %799 = vmatpush1.bf16.msra.mxu1 %v3647_v24  ;;  %v3695_v24 = vld [vmem:[#allocation5 + $0x14c] ss:$16 sps:$4 sm:$0xff]  }
  0xc6   : > { %800 = vmatprep.subr.bf16.mxu1 %v3648_v25  ;;  %v333_v25 = vld [vmem:[%s4553_s23 + $0xc8] sm:$0xff] }
  0xc9   : > { %801 = vmatpush1.bf16.msra.mxu1 %v3650_v26  ;;  %v335_v26 = vld [vmem:[%s4553_s23 + $0xd8] sm:$0xff] }
  0xca   : > { %802 = vmatprep.subr.bf16.mxu1 %v3651_v27  ;;  %v350_v27 = vpack.c.bf16 %v330_v23, %v328_v22 }
  0xcd   : > { %803 = vmatpush1.bf16.msra.mxu1 %v3653_v28  ;;  %v3693_v28 = vld [vmem:[#allocation5 + $0x148] ss:$16 sps:$4 sm:$0xff]  }
  0xce   : > { %804 = vmatprep.subr.bf16.mxu1 %v3654_v29  ;;  %v353_v29 = vpack.c.bf16 %v335_v26, %v333_v25 }
  0xd1   : > { %805 = vmatpush1.bf16.msra.mxu1 %v3656_v30  ;;  %v3698_v30 = vld [vmem:[#allocation5 + $0x16c] ss:$16 sps:$4 sm:$0xff]  }
  0xd2   : > { %806 = vmatprep.subr.bf16.mxu1 %v3657_v31  ;;  %v3696_v31 = vld [vmem:[#allocation5 + $0x168] ss:$16 sps:$4 sm:$0xff]  }
  0xd5   : > { %807 = vmatpush1.bf16.msra.mxu1 %v3659_v32  ;;  %v332_v32 = vld [vmem:[%s4553_s23 + $0xc0] sm:$0xff] }
  0xd6   : > { %808 = vmatprep.subr.bf16.mxu1 %v3660_v33  ;;  %v334_v33 = vld [vmem:[%s4553_s23 + $0xd0] sm:$0xff] }
  0xd9   : > { %809 = vmatpush1.bf16.msra.mxu1 %v3662_v34  ;;  %v3701_v34 = vld [vmem:[#allocation5 + $0x18c] ss:$16 sps:$4 sm:$0xff]  }
  0xda   : > { %891 = vmatprep.subr.bf16.mxu1 %v3665_v37  ;;  %v352_v37 = vpack.c.bf16 %v334_v33, %v332_v32 }
  0xdc   : > { %811 = vmatmul.mubr.bf16.vlgmr.msra.gmra.mrb[0].mxu1 %v4576_v41 }
  0xdd   : > { %892 = vmatpush1.bf16.msra.mxu1 %v3663_v40  ;;  %820 = vmatprep.mubr.bf16.mxu1 %v4578_v43  ;;  %v3704_v40 = vld [vmem:[#allocation5 + $0x1ac] ss:$16 sps:$4 sm:$0xff]  }
  0xde   : > { %893 = vmatprep.subr.bf16.mxu1 %v3668_v42  ;;  %v3702_v42 = vld [vmem:[#allocation5 + $0x1a8] ss:$16 sps:$4 sm:$0xff]  }
  0xe1   : > { %894 = vmatpush1.bf16.msra.mxu1 %v3666_v44  ;;  %v336_v44 = vld [vmem:[%s4553_s23 + $0xe0] sm:$0xff] }
  0xe2   : > { %895 = vmatprep.subr.bf16.mxu1 %v3671_v47  ;;  %v354_v47 = vpack.c.bf16 %v338_v45, %v336_v44 }
  0xe4   : > { %821 = vmatmul.mubr.bf16.gmra.mrb[4].mxu1 %v4586_v51 }
  0xe5   : > { %896 = vmatpush1.bf16.msra.mxu1 %v3669_v50  ;;  %830 = vmatprep.mubr.bf16.mxu1 %v4588_v53  ;;  %v3708_v50 = vld [vmem:[#allocation5 + $0x1e8] ss:$16 sps:$4 sm:$0xff]  }
  0xe6   : > { %897 = vmatprep.subr.bf16.mxu1 %v3674_v52 }
  0xe9   : > { %898 = vmatpush1.bf16.msra.mxu1 %v3672_v54 }
  0xea   : > { %899 = vmatprep.subr.bf16.mxu1 %v3677_v57 }
  0xec   : > { %831 = vmatmul.mubr.bf16.gmra.mrb[8].mxu1 %v4596_v60 }
  0xed   : > { %900 = vmatpush1.bf16.msra.mxu1 %v3675_v61  ;;  %840 = vmatprep.mubr.bf16.mxu1 %v4598_v62 }
  0xee   : > { %901 = vmatprep.subr.bf16.mxu1 %v3680_v63 }
  0xf1   : > { %902 = vmatpush1.bf16.msra.mxu1 %v3678_v0 }
  0xf2   : > { %903 = vmatprep.subr.bf16.mxu1 %v3683_v3 }
  0xf4   : > { %841 = vmatmul.mubr.bf16.gmra.mrb[12].mxu1 %v4606_v6 }
  0xf5   : > { %904 = vmatpush1.bf16.msra.mxu1 %v3681_v7  ;;  %850 = vmatprep.mubr.bf16.mxu1 %v4608_v8 }
  0xf6   : > { %905 = vmatprep.subr.bf16.mxu1 %v3686_v9  ;;  %v4671_v9 = vshrl.u32 %v422_v5, 7 }
  0xf8   : > { %6583 = vst [vmem:[#allocation17_spill] sm:$0xff] %v4671_v9  ;;  %v4676_v11 = vsub.s32 0, %v4671_v9  ;;  %v4679_v12 = vsub.s32 4, %v4671_v9 }
  0xf9   : > { %906 = vmatpush1.bf16.msra.mxu1 %v3684_v10 }
  0xfa   : > { %907 = vmatprep.subr.bf16.mxu1 %v3689_v13  ;;  %6584 = vst [vmem:[#allocation18_spill] sm:$0xff] %v4676_v11  ;;  %6585 = vst [vmem:[#allocation19_spill] sm:$0xff] %v4679_v12 }
  0xfc   : > { %851 = vmatmul.mubr.bf16.gmra.mrb[16].mxu1 %v4616_v17 }
  0xfd   : > { %908 = vmatpush1.bf16.msra.mxu1 %v3687_v18  ;;  %860 = vmatprep.mubr.bf16.mxu1 %v351_v19  ;;  %v425_v18 = vrot.slane %v4683_v14, %v4676_v11 }
  0xfe   : > { %909 = vmatprep.subr.bf16.mxu1 %v3692_v20  ;;  %v4693_v20 = vld [vmem:[#allocation7 + $0x8] sm:$0x77] }
  0xff   : > { %6587 = vst [vmem:[#allocation21_spill] sm:$0xff] %v4693_v20  ;;  %v4698_v22 = vrot.slane %v425_v18, %v4676_v11  ;;  %v433_v25 = vrot.slane %v4693_v20, %v4676_v11 }
 0x101   : > { %910 = vmatpush1.bf16.msra.mxu1 %v3690_v21 }
 0x102   : > { %911 = vmatprep.subr.bf16.mxu1 %v3695_v24 }
 0x104   : > { %861 = vmatmul.mubr.bf16.gmra.mrb[20].mxu1 %v350_v27 }
 0x105   : > { %912 = vmatpush1.bf16.msra.mxu1 %v3693_v28  ;;  %870 = vmatprep.mubr.bf16.mxu1 %v353_v29 }
 0x106   : > { %913 = vmatprep.subr.bf16.mxu1 %v3698_v30 }
 0x109   : > { %914 = vmatpush1.bf16.msra.mxu1 %v3696_v31  ;;  %v4720_v31 = vrot.slane %v433_v25, %v4676_v11 }
 0x10a   : > { %915 = vmatprep.subr.bf16.mxu1 %v3701_v34 }
 0x10c   : > { %871 = vmatmul.mubr.bf16.gmra.mrb[24].mxu1 %v352_v37 }
 0x10d   : > { %916 = vmatpush1.bf16.msra.mxu1 %v3699_v38  ;;  %880 = vmatprep.mubr.bf16.mxu1 %v355_v39 }
 0x10e   : > { %917 = vmatprep.subr.bf16.mxu1 %v3704_v40 }
 0x111   : > { %918 = vmatpush1.bf16.msra.mxu1 %v3702_v42 }
 0x112   : > { %919 = vmatprep.subr.bf16.mxu1 %v3707_v46 }
 0x114   : > { %881 = vmatmul.mubr.bf16.gmra.mrb[28].mxu1 %v354_v47 }
 0x115   : > { %920 = vmatpush1.bf16.msra.mxu1 %v3705_v48  ;;  %923 = vmatprep.mubr.bf16.mxu1 %v4569_v15 }
 0x116   : > { %921 = vmatprep.subr.bf16.mxu1 %v3710_v49 }
 0x119   : > { %922 = vmatpush1.bf16.msra.mxu1 %v3708_v50 }
 0x11c   : > { %924 = vmatmul.mubr.bf16.vlgmr.msra.gmra.mrb[32].mxu1 %v4576_v41 }
 0x11d   : > { %933 = vmatprep.mubr.bf16.mxu1 %v4578_v43 }
 0x124   : > { %934 = vmatmul.mubr.bf16.gmra.mrb[36].mxu1 %v4586_v51 }
 0x125   : > { %943 = vmatprep.mubr.bf16.mxu1 %v4588_v53 }
 0x12c   : > { %944 = vmatmul.mubr.bf16.gmra.mrb[40].mxu1 %v4596_v60 }
 0x12d   : > { %953 = vmatprep.mubr.bf16.mxu1 %v4598_v62 }
 0x134   : > { %954 = vmatmul.mubr.bf16.gmra.mrb[44].mxu1 %v4606_v6 }
 0x135   : > { %963 = vmatprep.mubr.bf16.mxu1 %v4608_v8 }
 0x13c   : > { %964 = vmatmul.mubr.bf16.gmra.mrb[48].mxu1 %v4616_v17 }
 0x13d   : > { %973 = vmatprep.mubr.bf16.mxu1 %v351_v19  ;;  %v429_v19 = vrot.slane %v4683_v14, %v4679_v12 }
 0x13f   : > { %v4701_v23 = vrot.slane %v429_v19, %v4676_v11 }
 0x144   : > { %974 = vmatmul.mubr.bf16.gmra.mrb[52].mxu1 %v350_v27  ;;  %v437_v27 = vrot.slane %v4693_v20, %v4679_v12 }
 0x145   : > { %983 = vmatprep.mubr.bf16.mxu1 %v353_v29 }
 0x146   : > { %v4723_v32 = vrot.slane %v437_v27, %v4676_v11 }
 0x14c   : > { %984 = vmatmul.mubr.bf16.gmra.mrb[56].mxu1 %v352_v37 }
 0x14d   : > { %993 = vmatprep.mubr.bf16.mxu1 %v355_v39 }
 0x154   : > { %994 = vmatmul.mubr.bf16.gmra.mrb[60].mxu1 %v354_v47 }
 0x1af   : > { %v812_v15 = vpop.f32.mrb[0].mxu1 }
 0x1b0   : > { %v814_v41 = vpop.f32.mrb[1].mxu1  ;;  %v4714_v29 = vadd.f32 %v812_v15, %v4698_v22 }
 0x1b1   : > { %v816_v43 = vpop.f32.mrb[2].mxu1  ;;  %v4717_v30 = vadd.f32 %v814_v41, %v4701_v23 }
 0x1b2   : > { %v818_v51 = vpop.f32.mrb[3].mxu1  ;;  %v4726_v33 = vadd.f32 %v816_v43, %v4698_v22 }
 0x1b3   : > { %v4729_v34 = vadd.f32 %v818_v51, %v4701_v23  ;;  %v1004_v36 = vadd.f32 %v4717_v30, %v4714_v29 }
 0x1b5   : > { %v1009_v42 = vadd.f32 %v4729_v34, %v4726_v33 }
 0x1b7   : > { %v822_v52 = vpop.f32.mrb[4].mxu1 }
 0x1b8   : > { %v824_v53 = vpop.f32.mrb[5].mxu1  ;;  %v4746_v47 = vadd.f32 %v822_v52, %v4698_v22 }
 0x1b9   : > { %v826_v54 = vpop.f32.mrb[6].mxu1  ;;  %v4749_v48 = vadd.f32 %v824_v53, %v4701_v23 }
 0x1ba   : > { %v828_v55 = vpop.f32.mrb[7].mxu1  ;;  %v4757_v41 = vadd.f32 %v826_v54, %v4698_v22 }
 0x1bb   : > { %v4760_v43 = vadd.f32 %v828_v55, %v4701_v23  ;;  %v1014_v52 = vadd.f32 %v4749_v48, %v4746_v47 }
 0x1bd   : > { %v1019_v54 = vadd.f32 %v4760_v43, %v4757_v41 }
 0x1bf   : > { %v4639_v56 = vpop.f32.mrb[8].mxu1 }
 0x1c0   : > { %v4641_v57 = vpop.f32.mrb[9].mxu1 }
 0x1c1   : > { %v4643_v58 = vpop.f32.mrb[10].mxu1 }
 0x1c2   : > { %v4645_v59 = vpop.f32.mrb[11].mxu1 }
 0x1c7   : > { %v4647_v60 = vpop.f32.mrb[12].mxu1 }
 0x1c8   : > { %v4649_v61 = vpop.f32.mrb[13].mxu1 }
 0x1c9   : > { %v4651_v62 = vpop.f32.mrb[14].mxu1 }
 0x1ca   : > { %v4653_v63 = vpop.f32.mrb[15].mxu1 }
 0x1cf   : > { %v4655_v0 = vpop.f32.mrb[16].mxu1 }
 0x1d0   : > { %v4657_v1 = vpop.f32.mrb[17].mxu1 }
 0x1d1   : > { %v4659_v2 = vpop.f32.mrb[18].mxu1 }
 0x1d2   : > { %v4661_v3 = vpop.f32.mrb[19].mxu1 }
 0x1d7   : > { %v4663_v4 = vpop.f32.mrb[20].mxu1 }
 0x1d8   : > { %v4665_v6 = vpop.f32.mrb[21].mxu1 }
 0x1d9   : > { %v4667_v7 = vpop.f32.mrb[22].mxu1 }
 0x1da   : > { %v4669_v8 = vpop.f32.mrb[23].mxu1 }
 0x1df   : > { %v4673_v10 = vpop.f32.mrb[24].mxu1 }
 0x1e0   : > { %v4681_v13 = vpop.f32.mrb[25].mxu1 }
 0x1e1   : > { %v4685_v16 = vpop.f32.mrb[26].mxu1 }
 0x1e2   : > { %v4687_v17 = vpop.f32.mrb[27].mxu1 }
 0x1e7   : > { %v4695_v21 = vpop.f32.mrb[28].mxu1 }
 0x1e8   : > { %v4703_v24 = vpop.f32.mrb[29].mxu1 }
 0x1e9   : > { %v4707_v26 = vpop.f32.mrb[30].mxu1 }
 0x1ea   : > { %v4711_v28 = vpop.f32.mrb[31].mxu1 }
 0x1ef   : > { %v925_v35 = vpop.f32.mrb[32].mxu1 }
 0x1f0   : > { %v4734_v37 = vadd.f32 %v925_v35, %v4720_v31  ;;  %v927_v38 = vpop.f32.mrb[33].mxu1 }
 0x1f1   : > { %v4737_v39 = vadd.f32 %v927_v38, %v4723_v32  ;;  %v929_v40 = vpop.f32.mrb[34].mxu1  ;;  %v4783_v38 = vadd.f32 %v4641_v57, %v4701_v23 }
 0x1f2   : > { %v4742_v44 = vadd.f32 %v929_v40, %v4720_v31  ;;  %v931_v45 = vpop.f32.mrb[35].mxu1  ;;  %v1005_v46 = vadd.f32 %v1004_v36, %v4734_v37  ;;  %v4779_v36 = vadd.f32 %v4639_v56, %v4698_v22 }
 0x1f3   : > { %v4753_v50 = vadd.f32 %v931_v45, %v4723_v32 }
 0x1f4   : > { %v1010_v49 = vadd.f32 %v1009_v42, %v4742_v44  ;;  %v1006_v15 = vadd.f32 %v1005_v46, %v4737_v39  ;;  %v4792_v46 = vadd.f32 %v4643_v58, %v4698_v22  ;;  %v1024_v57 = vadd.f32 %v4783_v38, %v4779_v36 }
 0x1f6   : > { %1007 = vadd.xlane.f32.xlu0 %v1006_v15  ;;  %v1011_v18 = vadd.f32 %v1010_v49, %v4753_v50  ;;  %v4796_v49 = vadd.f32 %v4645_v59, %v4701_v23 }
 0x1f7   : > { %v935_v51 = vpop.f32.mrb[36].mxu1 }
 0x1f8   : > { %v4765_v53 = vadd.f32 %v935_v51, %v4720_v31  ;;  %v937_v5 = vpop.f32.mrb[37].mxu1 }
 0x1f9   : > { %v4769_v19 = vadd.f32 %v937_v5, %v4723_v32  ;;  %v939_v25 = vpop.f32.mrb[38].mxu1 }
 0x1fa   : > { %v4774_v55 = vadd.f32 %v939_v25, %v4720_v31  ;;  %v941_v27 = vpop.f32.mrb[39].mxu1  ;;  %1012 = vadd.xlane.f32.xlu0 %v1011_v18  ;;  %v1015_v35 = vadd.f32 %v1014_v52, %v4765_v53  ;;  %v1029_v18 = vadd.f32 %v4796_v49, %v4792_v46 }
 0x1fb   : > { %v4787_v42 = vadd.f32 %v941_v27, %v4723_v32 }
 0x1fc   : > { %v1020_v40 = vadd.f32 %v1019_v54, %v4774_v55  ;;  %v1016_v45 = vadd.f32 %v1015_v35, %v4769_v19  ;;  %v4818_v35 = vadd.f32 %v4647_v60, %v4698_v22 }
 0x1fe   : > { %1017 = vadd.xlane.f32.xlu1 %v1016_v45  ;;  %v1021_v52 = vadd.f32 %v1020_v40, %v4787_v42  ;;  %v4822_v40 = vadd.f32 %v4649_v61, %v4701_v23 }
 0x1ff   : > { %v945_v56 = vpop.f32.mrb[40].mxu1 }
 0x200   : > { %v4801_v15 = vadd.f32 %v945_v56, %v4720_v31  ;;  %v947_v51 = vpop.f32.mrb[41].mxu1  ;;  %v1034_v61 = vadd.f32 %v4822_v40, %v4818_v35 }
 0x201   : > { %v4805_v5 = vadd.f32 %v947_v51, %v4723_v32  ;;  %v949_v58 = vpop.f32.mrb[42].mxu1  ;;  %v4832_v51 = vadd.f32 %v4653_v63, %v4701_v23 }
 0x202   : > { %v1025_v59 = vadd.f32 %v1024_v57, %v4801_v15  ;;  %v4811_v25 = vadd.f32 %v949_v58, %v4720_v31  ;;  %v951_v54 = vpop.f32.mrb[43].mxu1  ;;  %1022 = vadd.xlane.f32.xlu1 %v1021_v52  ;;  %v4828_v57 = vadd.f32 %v4651_v62, %v4698_v22 }
 0x203   : > { %v4814_v27 = vadd.f32 %v951_v54, %v4723_v32 }
 0x204   : > { %v1030_v45 = vadd.f32 %v1029_v18, %v4811_v25  ;;  %v1026_v56 = vadd.f32 %v1025_v59, %v4805_v5  ;;  %v1039_v63 = vadd.f32 %v4832_v51, %v4828_v57 }
 0x206   : > { %1027 = vadd.xlane.f32.xlu0 %v1026_v56  ;;  %v1031_v60 = vadd.f32 %v1030_v45, %v4814_v27 }
 0x207   : > { %v955_v52 = vpop.f32.mrb[44].mxu1 }
 0x208   : > { %v4838_v58 = vadd.f32 %v955_v52, %v4720_v31  ;;  %v957_v18 = vpop.f32.mrb[45].mxu1  ;;  %1032 = vadd.xlane.f32.xlu1 %v1031_v60  ;;  %v4854_v52 = vadd.f32 %v4655_v0, %v4698_v22  ;;  %v4858_v60 = vadd.f32 %v4657_v1, %v4701_v23 }
 0x209   : > { %v4841_v59 = vadd.f32 %v957_v18, %v4723_v32  ;;  %v959_v62 = vpop.f32.mrb[46].mxu1 }
 0x20a   : > { %v1035_v54 = vadd.f32 %v1034_v61, %v4838_v58  ;;  %v4847_v45 = vadd.f32 %v959_v62, %v4720_v31  ;;  %v961_v56 = vpop.f32.mrb[47].mxu1  ;;  %v4864_v61 = vadd.f32 %v4659_v2, %v4698_v22  ;;  %v4868_v62 = vadd.f32 %v4661_v3, %v4701_v23 }
 0x20b   : > { %v4850_v12 = vadd.f32 %v961_v56, %v4723_v32  ;;  %v1044_v1 = vadd.f32 %v4858_v60, %v4854_v52 }
 0x20c   : > { %v1040_v18 = vadd.f32 %v1039_v63, %v4847_v45  ;;  %v1036_v11 = vadd.f32 %v1035_v54, %v4841_v59  ;;  %6588 = vst [vmem:[#allocation22_spill] sm:$0xff] %v4864_v61  ;;  %6589 = vst [vmem:[#allocation23_spill] sm:$0xff] %v4868_v62  ;;  %v1049_v3 = vadd.f32 %v4868_v62, %v4864_v61 }
 0x20e   : > { %1037 = vadd.xlane.f32.xlu0 %v1036_v11  ;;  %v1041_v0 = vadd.f32 %v1040_v18, %v4850_v12 }
 0x20f   : > { %v965_v56 = vpop.f32.mrb[48].mxu1 }
 0x210   : > { %v4874_v20 = vadd.f32 %v965_v56, %v4720_v31  ;;  %v967_v63 = vpop.f32.mrb[49].mxu1  ;;  %1042 = vadd.xlane.f32.xlu1 %v1041_v0  ;;  %v4890_v56 = vadd.f32 %v4663_v4, %v4698_v22  ;;  %v4894_v0 = vadd.f32 %v4665_v6, %v4701_v23 }
 0x211   : > { %v4877_v54 = vadd.f32 %v967_v63, %v4723_v32  ;;  %v969_v2 = vpop.f32.mrb[50].mxu1 }
 0x212   : > { %v1045_v11 = vadd.f32 %v1044_v1, %v4874_v20  ;;  %v4883_v18 = vadd.f32 %v969_v2, %v4720_v31  ;;  %v971_v14 = vpop.f32.mrb[51].mxu1  ;;  %6591 = vst [vmem:[#allocation25_spill] sm:$0xff] %v4894_v0  ;;  %v4900_v1 = vadd.f32 %v4667_v7, %v4698_v22  ;;  %v1054_v6 = vadd.f32 %v4894_v0, %v4890_v56 }
 0x213   : > { %v4886_v9 = vadd.f32 %v971_v14, %v4723_v32  ;;  %v4904_v14 = vadd.f32 %v4669_v8, %v4701_v23 }
 0x214   : > { %v1050_v63 = vadd.f32 %v1049_v3, %v4883_v18  ;;  %v1046_v62 = vadd.f32 %v1045_v11, %v4877_v54  ;;  %6592 = vst [vmem:[#allocation26_spill] sm:$0xff] %v4900_v1 }
 0x215   : > { %6590 = vst [vmem:[#allocation24_spill] sm:$0xff] %v4886_v9  ;;  %6593 = vst [vmem:[#allocation27_spill] sm:$0xff] %v4904_v14  ;;  %v1059_v8 = vadd.f32 %v4904_v14, %v4900_v1 }
 0x216   : > { %1047 = vadd.xlane.f32.xlu0 %v1046_v62  ;;  %v1051_v4 = vadd.f32 %v1050_v63, %v4886_v9 }
 0x217   : > { %v975_v2 = vpop.f32.mrb[52].mxu1 }
 0x218   : > { %v4910_v61 = vadd.f32 %v975_v2, %v4720_v31  ;;  %v977_v3 = vpop.f32.mrb[53].mxu1  ;;  %1052 = vadd.xlane.f32.xlu1 %v1051_v4  ;;  %v4926_v2 = vadd.f32 %v4673_v10, %v4698_v22  ;;  %v4930_v4 = vadd.f32 %v4681_v13, %v4701_v23 }
 0x219   : > { %v4913_v11 = vadd.f32 %v977_v3, %v4723_v32  ;;  %v979_v7 = vpop.f32.mrb[54].mxu1 }
 0x21a   : > { %v1055_v62 = vadd.f32 %v1054_v6, %v4910_v61  ;;  %v4919_v63 = vadd.f32 %v979_v7, %v4720_v31  ;;  %v981_v9 = vpop.f32.mrb[55].mxu1  ;;  %6595 = vst [vmem:[#allocation29_spill] sm:$0xff] %v4930_v4  ;;  %v4936_v6 = vadd.f32 %v4685_v16, %v4698_v22  ;;  %v1064_v13 = vadd.f32 %v4930_v4, %v4926_v2 }
 0x21b   : > { %v4922_v0 = vadd.f32 %v981_v9, %v4723_v32  ;;  %v4940_v9 = vadd.f32 %v4687_v17, %v4701_v23 }
 0x21c   : > { %v1060_v3 = vadd.f32 %v1059_v8, %v4919_v63  ;;  %v1056_v14 = vadd.f32 %v1055_v62, %v4913_v11  ;;  %6596 = vst [vmem:[#allocation30_spill] sm:$0xff] %v4936_v6 }
 0x21d   : > { %6594 = vst [vmem:[#allocation28_spill] sm:$0xff] %v4922_v0  ;;  %6597 = vst [vmem:[#allocation31_spill] sm:$0xff] %v4940_v9  ;;  %v1069_v17 = vadd.f32 %v4940_v9, %v4936_v6 }
 0x21e   : > { %1057 = vadd.xlane.f32.xlu0 %v1056_v14  ;;  %v1061_v10 = vadd.f32 %v1060_v3, %v4922_v0 }
 0x21f   : > { %v985_v7 = vpop.f32.mrb[56].mxu1 }
 0x220   : > { %v4946_v1 = vadd.f32 %v985_v7, %v4720_v31  ;;  %v987_v8 = vpop.f32.mrb[57].mxu1  ;;  %1062 = vadd.xlane.f32.xlu1 %v1061_v10  ;;  %v4962_v7 = vadd.f32 %v4695_v21, %v4698_v22  ;;  %v4966_v10 = vadd.f32 %v4703_v24, %v4701_v23 }
 0x221   : > { %v4949_v62 = vadd.f32 %v987_v8, %v4723_v32  ;;  %v989_v16 = vpop.f32.mrb[58].mxu1 }
 0x222   : > { %v1065_v14 = vadd.f32 %v1064_v13, %v4946_v1  ;;  %v4955_v3 = vadd.f32 %v989_v16, %v4720_v31  ;;  %v991_v0 = vpop.f32.mrb[59].mxu1  ;;  %6598 = vst [vmem:[#allocation32_spill] sm:$0xff] %v4962_v7  ;;  %6599 = vst [vmem:[#allocation33_spill] sm:$0xff] %v4966_v10  ;;  %v4972_v13 = vadd.f32 %v4707_v26, %v4698_v22 }
 0x223   : > { %v4958_v4 = vadd.f32 %v991_v0, %v4723_v32  ;;  %v4976_v0 = vadd.f32 %v4711_v28, %v4701_v23  ;;  %v1074_v24 = vadd.f32 %v4966_v10, %v4962_v7  ;;  %v3711_v10 = vld [vmem:[#allocation8 + $0x4] ss:$8 sps:$4 sm:$0xff]   ;;  %v3713_v7 = vld [vmem:[#allocation8] ss:$8 sps:$4 sm:$0xff]  }
 0x224   : > { %v1070_v8 = vadd.f32 %v1069_v17, %v4955_v3  ;;  %v1066_v9 = vadd.f32 %v1065_v14, %v4949_v62  ;;  %2504 = vmatprep.subr.bf16.mxu0 %v3711_v10 }
 0x225   : > { %6600 = vst [vmem:[#allocation34_spill] sm:$0xff] %v4976_v0  ;;  %v1079_v23 = vadd.f32 %v4976_v0, %v4972_v13  ;;  %v3714_v0 = vld [vmem:[#allocation8 + $0x14] ss:$8 sps:$4 sm:$0xff]   ;;  %2505 = vmatpush1.bf16.msra.mxu0 %v3713_v7 }
 0x226   : > { %1067 = vadd.xlane.f32.xlu0 %v1066_v9  ;;  %v1071_v21 = vadd.f32 %v1070_v8, %v4958_v4  ;;  %2506 = vmatprep.subr.bf16.mxu0 %v3714_v0 }
 0x227   : > { %v995_v16 = vpop.f32.mrb[60].mxu1 }
 0x228   : > { %v4982_v6 = vadd.f32 %v995_v16, %v4720_v31  ;;  %v997_v17 = vpop.f32.mrb[61].mxu1  ;;  %1072 = vadd.xlane.f32.xlu1 %v1071_v21 }
 0x229   : > { %v4985_v14 = vadd.f32 %v997_v17, %v4723_v32  ;;  %v999_v22 = vpop.f32.mrb[62].mxu1 }
 0x22a   : > { %v1075_v26 = vadd.f32 %v1074_v24, %v4982_v6  ;;  %v4991_v28 = vadd.f32 %v999_v22, %v4720_v31  ;;  %v1001_v9 = vpop.f32.mrb[63].mxu1  ;;  %v3716_v24 = vld [vmem:[#allocation8 + $0x10] ss:$8 sps:$4 sm:$0xff]  }
 0x22b   : > { %v4994_v8 = vadd.f32 %v1001_v9, %v4723_v32  ;;  %2507 = vmatpush1.bf16.msra.mxu0 %v3716_v24 }
 0x22c   : > { %v1080_v16 = vadd.f32 %v1079_v23, %v4991_v28  ;;  %v1076_v21 = vadd.f32 %v1075_v26, %v4985_v14 }
 0x22e   : > { %1077 = vadd.xlane.f32.xlu0 %v1076_v21  ;;  %v1081_v17 = vadd.f32 %v1080_v16, %v4994_v8 }
 0x230   : > { %1082 = vadd.xlane.f32.xlu1 %v1081_v17 }
 0x283   : > { %v1008_v31 = vpop.xlane.xlu0 %1007 }
 0x284   : > { %v1085_v22 = vmul.f32 0.001953125, %v1008_v31 }
 0x286   : > { %v5000_v32 = vsub.f32 %v4714_v29, %v1085_v22  ;;  %v5003_v23 = vsub.f32 %v4717_v30, %v1085_v22  ;;  %v5006_v26 = vsub.f32 %v4734_v37, %v1085_v22  ;;  %v5009_v16 = vsub.f32 %v4737_v39, %v1085_v22 }
 0x287   : > { %v1013_v9 = vpop.xlane.xlu0 %1012 }
 0x288   : > { %6601 = vst [vmem:[#allocation35_spill] sm:$0xff] %v5006_v26  ;;  %v1086_v10 = vmul.f32 0.001953125, %v1013_v9  ;;  %v1165_v7 = vmul.f32 %v5000_v32, %v5000_v32  ;;  %v1166_v0 = vmul.f32 %v5003_v23, %v5003_v23  ;;  %v1167_v29 = vmul.f32 %v5006_v26, %v5006_v26 }
 0x289   : > { %v1168_v24 = vmul.f32 %v5009_v16, %v5009_v16 }
 0x28a   : > { %v5018_v30 = vsub.f32 %v4726_v33, %v1086_v10  ;;  %v5021_v37 = vsub.f32 %v4729_v34, %v1086_v10  ;;  %v1229_v21 = vadd.f32 %v1166_v0, %v1165_v7  ;;  %v5024_v39 = vsub.f32 %v4742_v44, %v1086_v10 }
 0x28b   : > { %v1018_v17 = vpop.xlane.xlu1 %1017  ;;  %v5029_v31 = vsub.f32 %v4753_v50, %v1086_v10 }
 0x28c   : > { %6602 = vst [vmem:[#allocation36_spill] sm:$0xff] %v5018_v30  ;;  %6603 = vst [vmem:[#allocation37_spill] sm:$0xff] %v5024_v39  ;;  %v1087_v22 = vmul.f32 0.001953125, %v1018_v17  ;;  %v1230_v9 = vadd.f32 %v1229_v21, %v1167_v29  ;;  %v1169_v33 = vmul.f32 %v5018_v30, %v5018_v30  ;;  %v1170_v34 = vmul.f32 %v5021_v37, %v5021_v37 }
 0x28d   : > { %v1171_v7 = vmul.f32 %v5024_v39, %v5024_v39  ;;  %v1172_v29 = vmul.f32 %v5029_v31, %v5029_v31 }
 0x28e   : > { %v5038_v44 = vsub.f32 %v4746_v47, %v1087_v22  ;;  %v5041_v0 = vsub.f32 %v4749_v48, %v1087_v22  ;;  %v1231_v26 = vadd.f32 %v1230_v9, %v1168_v24  ;;  %v1234_v50 = vadd.f32 %v1170_v34, %v1169_v33 }
 0x28f   : > { %v1023_v10 = vpop.xlane.xlu1 %1022  ;;  %v5046_v21 = vsub.f32 %v4765_v53, %v1087_v22  ;;  %v5049_v17 = vsub.f32 %v4769_v19, %v1087_v22 }
 0x290   : > { %v1088_v30 = vmul.f32 0.001953125, %v1023_v10  ;;  %1232 = vadd.xlane.f32.xlu0 %v1231_v26  ;;  %v1235_v39 = vadd.f32 %v1234_v50, %v1171_v7  ;;  %v1173_v47 = vmul.f32 %v5038_v44, %v5038_v44  ;;  %v1174_v48 = vmul.f32 %v5041_v0, %v5041_v0 }
 0x291   : > { %v1175_v24 = vmul.f32 %v5046_v21, %v5046_v21  ;;  %v1176_v26 = vmul.f32 %v5049_v17, %v5049_v17 }
 0x292   : > { %v5058_v9 = vsub.f32 %v4757_v41, %v1088_v30  ;;  %v5061_v53 = vsub.f32 %v4760_v43, %v1088_v30  ;;  %v1236_v19 = vadd.f32 %v1235_v39, %v1172_v29  ;;  %v1239_v22 = vadd.f32 %v1174_v48, %v1173_v47 }
 0x293   : > { %v1028_v33 = vpop.xlane.xlu0 %1027  ;;  %v5066_v34 = vsub.f32 %v4774_v55, %v1088_v30  ;;  %v5073_v39 = vsub.f32 %v4787_v42, %v1088_v30 }
 0x294   : > { %v1089_v7 = vmul.f32 0.001953125, %v1028_v33  ;;  %1237 = vadd.xlane.f32.xlu1 %v1236_v19  ;;  %v1240_v50 = vadd.f32 %v1239_v22, %v1175_v24  ;;  %v1177_v10 = vmul.f32 %v5058_v9, %v5058_v9  ;;  %v1178_v41 = vmul.f32 %v5061_v53, %v5061_v53 }
 0x295   : > { %6604 = vst [vmem:[#allocation38_spill] sm:$0xff] %v5066_v34  ;;  %v1033_v43 = vpop.xlane.xlu1 %1032  ;;  %v1179_v24 = vmul.f32 %v5066_v34, %v5066_v34 }
 0x296   : > { %v5076_v29 = vsub.f32 %v4779_v36, %v1089_v7  ;;  %v5079_v47 = vsub.f32 %v4783_v38, %v1089_v7  ;;  %v1090_v55 = vmul.f32 0.001953125, %v1033_v43  ;;  %v1241_v48 = vadd.f32 %v1240_v50, %v1176_v26 }
 0x297   : > { %v1244_v19 = vadd.f32 %v1178_v41, %v1177_v10  ;;  %v5084_v22 = vsub.f32 %v4801_v15, %v1089_v7  ;;  %v5087_v33 = vsub.f32 %v4805_v5, %v1089_v7  ;;  %v1180_v15 = vmul.f32 %v5073_v39, %v5073_v39 }
 0x298   : > { %v5090_v42 = vsub.f32 %v4792_v46, %v1090_v55  ;;  %v5093_v36 = vsub.f32 %v4796_v49, %v1090_v55  ;;  %1242 = vadd.xlane.f32.xlu0 %v1241_v48  ;;  %v1181_v38 = vmul.f32 %v5076_v29, %v5076_v29  ;;  %v1182_v30 = vmul.f32 %v5079_v47, %v5079_v47 }
 0x299   : > { %6605 = vst [vmem:[#allocation39_spill] sm:$0xff] %v5084_v22  ;;  %6606 = vst [vmem:[#allocation40_spill] sm:$0xff] %v5087_v33  ;;  %v1245_v26 = vadd.f32 %v1244_v19, %v1179_v24  ;;  %v5102_v5 = vsub.f32 %v4811_v25, %v1090_v55  ;;  %v1183_v46 = vmul.f32 %v5084_v22, %v5084_v22 }
 0x29a   : > { %v1249_v7 = vadd.f32 %v1182_v30, %v1181_v38  ;;  %v1185_v49 = vmul.f32 %v5090_v42, %v5090_v42  ;;  %v1186_v50 = vmul.f32 %v5093_v36, %v5093_v36  ;;  %v5111_v43 = vsub.f32 %v4814_v27, %v1090_v55  ;;  %v3717_v55 = vld [vmem:[#allocation8 + $0x24] ss:$8 sps:$4 sm:$0xff]  }
 0x29b   : > { %6607 = vst [vmem:[#allocation41_spill] sm:$0xff] %v5102_v5  ;;  %v1038_v10 = vpop.xlane.xlu0 %1037  ;;  %v1246_v41 = vadd.f32 %v1245_v26, %v1180_v15  ;;  %v1184_v25 = vmul.f32 %v5087_v33, %v5087_v33  ;;  %v1187_v38 = vmul.f32 %v5102_v5, %v5102_v5  ;;  %2508 = vmatprep.subr.bf16.mxu0 %v3717_v55 }
 0x29c   : > { %6608 = vst [vmem:[#allocation42_spill] sm:$0xff] %v5111_v43  ;;  %v1091_v48 = vmul.f32 0.001953125, %v1038_v10  ;;  %v1250_v24 = vadd.f32 %v1249_v7, %v1183_v46  ;;  %v1254_v19 = vadd.f32 %v1186_v50, %v1185_v49  ;;  %v1188_v26 = vmul.f32 %v5111_v43, %v5111_v43  ;;  %v3719_v49 = vld [vmem:[#allocation8 + $0x20] ss:$8 sps:$4 sm:$0xff]  }
 0x29d   : > { %1247 = vadd.xlane.f32.xlu1 %v1246_v41  ;;  %v1043_v22 = vpop.xlane.xlu1 %1042  ;;  %2509 = vmatpush1.bf16.msra.mxu0 %v3719_v49 }
 0x29e   : > { %v5118_v30 = vsub.f32 %v4818_v35, %v1091_v48  ;;  %v5121_v34 = vsub.f32 %v4822_v40, %v1091_v48  ;;  %v1092_v15 = vmul.f32 0.001953125, %v1043_v22  ;;  %v1251_v27 = vadd.f32 %v1250_v24, %v1184_v25  ;;  %v3720_v25 = vld [vmem:[#allocation8 + $0x34] ss:$8 sps:$4 sm:$0xff]  }
 0x29f   : > { %v1255_v10 = vadd.f32 %v1254_v19, %v1187_v38  ;;  %v5126_v46 = vsub.f32 %v4838_v58, %v1091_v48  ;;  %v5129_v7 = vsub.f32 %v4841_v59, %v1091_v48  ;;  %2510 = vmatprep.subr.bf16.mxu0 %v3720_v25 }
 0x2a0   : > { %v5132_v35 = vsub.f32 %v4828_v57, %v1092_v15  ;;  %v5135_v40 = vsub.f32 %v4832_v51, %v1092_v15  ;;  %1252 = vadd.xlane.f32.xlu0 %v1251_v27  ;;  %v1189_v22 = vmul.f32 %v5118_v30, %v5118_v30  ;;  %v1190_v50 = vmul.f32 %v5121_v34, %v5121_v34 }
 0x2a1   : > { %6609 = vst [vmem:[#allocation43_spill] sm:$0xff] %v5126_v46  ;;  %6610 = vst [vmem:[#allocation44_spill] sm:$0xff] %v5129_v7  ;;  %v1256_v41 = vadd.f32 %v1255_v10, %v1188_v26  ;;  %v5142_v58 = vsub.f32 %v4847_v45, %v1092_v15  ;;  %v1191_v59 = vmul.f32 %v5126_v46, %v5126_v46  ;;  %v3722_v45 = vld [vmem:[#allocation8 + $0x30] ss:$8 sps:$4 sm:$0xff]  }
 0x2a2   : > { %v1259_v57 = vadd.f32 %v1190_v50, %v1189_v22  ;;  %v1193_v51 = vmul.f32 %v5132_v35, %v5132_v35  ;;  %v1194_v48 = vmul.f32 %v5135_v40, %v5135_v40  ;;  %v5151_v19 = vsub.f32 %v4850_v12, %v1092_v15  ;;  %2511 = vmatpush1.bf16.msra.mxu0 %v3722_v45 }
 0x2a3   : > { %6611 = vst [vmem:[#allocation45_spill] sm:$0xff] %v5142_v58  ;;  %1257 = vadd.xlane.f32.xlu1 %v1256_v41  ;;  %v1048_v24 = vpop.xlane.xlu0 %1047  ;;  %v1192_v27 = vmul.f32 %v5129_v7, %v5129_v7  ;;  %v1195_v22 = vmul.f32 %v5142_v58, %v5142_v58  ;;  %v3723_v41 = vld [vmem:[#allocation8 + $0x44] ss:$8 sps:$4 sm:$0xff]  }
 0x2a4   : > { %6612 = vst [vmem:[#allocation46_spill] sm:$0xff] %v5151_v19  ;;  %v1093_v38 = vmul.f32 0.001953125, %v1048_v24  ;;  %v1260_v55 = vadd.f32 %v1259_v57, %v1191_v59  ;;  %v1264_v26 = vadd.f32 %v1194_v48, %v1193_v51  ;;  %v1196_v24 = vmul.f32 %v5151_v19, %v5151_v19  ;;  %v3725_v48 = vld [vmem:[#allocation8 + $0x40] ss:$8 sps:$4 sm:$0xff]   ;;  %2512 = vmatprep.subr.bf16.mxu0 %v3723_v41 }
 0x2a5   : > { %v1053_v10 = vpop.xlane.xlu1 %1052 }
 0x2a6   : > { %v5158_v49 = vsub.f32 %v4854_v52, %v1093_v38  ;;  %v5161_v50 = vsub.f32 %v4858_v60, %v1093_v38  ;;  %v1094_v12 = vmul.f32 0.001953125, %v1053_v10  ;;  %v1261_v15 = vadd.f32 %v1260_v55, %v1192_v27  ;;  %v6615_v52 = vld [vmem:[#allocation22_spill] sm:$0xff]  ;;  %v6616_v60 = vld [vmem:[#allocation23_spill] sm:$0xff]  ;;  %2513 = vmatpush1.bf16.msra.mxu0 %v3725_v48 }
 0x2a7   : > { %v1265_v59 = vadd.f32 %v1264_v26, %v1195_v22  ;;  %v5166_v57 = vsub.f32 %v4874_v20, %v1093_v38  ;;  %v5169_v51 = vsub.f32 %v4877_v54, %v1093_v38  ;;  %v3726_v22 = vld [vmem:[#allocation8 + $0x54] ss:$8 sps:$4 sm:$0xff]  }
 0x2a8   : > { %v5172_v25 = vsub.f32 %v6615_v52, %v1094_v12  ;;  %v5175_v58 = vsub.f32 %v6616_v60, %v1094_v12  ;;  %1262 = vadd.xlane.f32.xlu0 %v1261_v15  ;;  %v1197_v45 = vmul.f32 %v5158_v49, %v5158_v49  ;;  %v1198_v27 = vmul.f32 %v5161_v50, %v5161_v50  ;;  %v6618_v52 = vld [vmem:[#allocation24_spill] sm:$0xff] }
 0x2a9   : > { %6613 = vst [vmem:[#allocation47_spill] sm:$0xff] %v5166_v57  ;;  %6614 = vst [vmem:[#allocation48_spill] sm:$0xff] %v5169_v51  ;;  %v1266_v55 = vadd.f32 %v1265_v59, %v1196_v24  ;;  %v5182_v20 = vsub.f32 %v4883_v18, %v1094_v12  ;;  %v1199_v54 = vmul.f32 %v5166_v57, %v5166_v57  ;;  %v3728_v18 = vld [vmem:[#allocation8 + $0x50] ss:$8 sps:$4 sm:$0xff]   ;;  %2514 = vmatprep.subr.bf16.mxu0 %v3726_v22 }
 0x2aa   : > { %v1269_v38 = vadd.f32 %v1198_v27, %v1197_v45  ;;  %v1201_v26 = vmul.f32 %v5172_v25, %v5172_v25  ;;  %v1202_v10 = vmul.f32 %v5175_v58, %v5175_v58  ;;  %v5191_v24 = vsub.f32 %v6618_v52, %v1094_v12  ;;  %2515 = vmatpush1.bf16.msra.mxu0 %v3728_v18 }
 0x2ab   : > { %6617 = vst [vmem:[#allocation22_spill] sm:$0xff] %v5182_v20  ;;  %1267 = vadd.xlane.f32.xlu1 %v1266_v55  ;;  %v1058_v15 = vpop.xlane.xlu0 %1057  ;;  %v1200_v41 = vmul.f32 %v5169_v51, %v5169_v51  ;;  %v1203_v57 = vmul.f32 %v5182_v20, %v5182_v20  ;;  %v6620_v55 = vld [vmem:[#allocation25_spill] sm:$0xff] }
 0x2ac   : > { %6619 = vst [vmem:[#allocation23_spill] sm:$0xff] %v5191_v24  ;;  %v1095_v59 = vmul.f32 0.001953125, %v1058_v15  ;;  %v1270_v60 = vadd.f32 %v1269_v38, %v1199_v54  ;;  %v1274_v45 = vadd.f32 %v1202_v10, %v1201_v26  ;;  %v3729_v15 = vld [vmem:[#allocation8 + $0x64] ss:$8 sps:$4 sm:$0xff]   ;;  %v1204_v51 = vmul.f32 %v5191_v24, %v5191_v24  ;;  %v3731_v10 = vld [vmem:[#allocation8 + $0x60] ss:$8 sps:$4 sm:$0xff]  }
 0x2ad   : > { %v1063_v27 = vpop.xlane.xlu1 %1062  ;;  %2516 = vmatprep.subr.bf16.mxu0 %v3729_v15 }
 0x2ae   : > { %v5198_v48 = vsub.f32 %v4890_v56, %v1095_v59  ;;  %v5201_v46 = vsub.f32 %v6620_v55, %v1095_v59  ;;  %v1096_v12 = vmul.f32 0.001953125, %v1063_v27  ;;  %v1271_v52 = vadd.f32 %v1270_v60, %v1200_v41  ;;  %v6623_v56 = vld [vmem:[#allocation26_spill] sm:$0xff]  ;;  %v6624_v55 = vld [vmem:[#allocation27_spill] sm:$0xff]  ;;  %2517 = vmatpush1.bf16.msra.mxu0 %v3731_v10 }
 0x2af   : > { %v1275_v54 = vadd.f32 %v1274_v45, %v1203_v57  ;;  %v5206_v38 = vsub.f32 %v4910_v61, %v1095_v59  ;;  %v5209_v26 = vsub.f32 %v4913_v11, %v1095_v59  ;;  %v3732_v27 = vld [vmem:[#allocation8 + $0x74] ss:$8 sps:$4 sm:$0xff]  }
 0x2b0   : > { %v5212_v22 = vsub.f32 %v6623_v56, %v1096_v12  ;;  %v5215_v20 = vsub.f32 %v6624_v55, %v1096_v12  ;;  %1272 = vadd.xlane.f32.xlu0 %v1271_v52  ;;  %v1205_v18 = vmul.f32 %v5198_v48, %v5198_v48  ;;  %v1206_v57 = vmul.f32 %v5201_v46, %v5201_v46  ;;  %v6626_v56 = vld [vmem:[#allocation28_spill] sm:$0xff] }
 0x2b1   : > { %6621 = vst [vmem:[#allocation24_spill] sm:$0xff] %v5206_v38  ;;  %6622 = vst [vmem:[#allocation25_spill] sm:$0xff] %v5209_v26  ;;  %v1276_v41 = vadd.f32 %v1275_v54, %v1204_v51  ;;  %v5222_v61 = vsub.f32 %v4919_v63, %v1096_v12  ;;  %v1207_v11 = vmul.f32 %v5206_v38, %v5206_v38  ;;  %v3734_v63 = vld [vmem:[#allocation8 + $0x70] ss:$8 sps:$4 sm:$0xff]   ;;  %2518 = vmatprep.subr.bf16.mxu0 %v3732_v27 }
 0x2b2   : > { %v1279_v59 = vadd.f32 %v1206_v57, %v1205_v18  ;;  %v1209_v60 = vmul.f32 %v5212_v22, %v5212_v22  ;;  %v1210_v45 = vmul.f32 %v5215_v20, %v5215_v20  ;;  %v5231_v51 = vsub.f32 %v6626_v56, %v1096_v12  ;;  %2519 = vmatpush1.bf16.msra.mxu0 %v3734_v63 }
 0x2b3   : > { %6625 = vst [vmem:[#allocation26_spill] sm:$0xff] %v5222_v61  ;;  %1277 = vadd.xlane.f32.xlu1 %v1276_v41  ;;  %v1068_v52 = vpop.xlane.xlu0 %1067  ;;  %v1208_v15 = vmul.f32 %v5209_v26, %v5209_v26  ;;  %v1211_v38 = vmul.f32 %v5222_v61, %v5222_v61  ;;  %v6628_v41 = vld [vmem:[#allocation29_spill] sm:$0xff] }
 0x2b4   : > { %6627 = vst [vmem:[#allocation27_spill] sm:$0xff] %v5231_v51  ;;  %v1097_v54 = vmul.f32 0.001953125, %v1068_v52  ;;  %v1280_v55 = vadd.f32 %v1279_v59, %v1207_v11  ;;  %v1284_v18 = vadd.f32 %v1210_v45, %v1209_v60  ;;  %v3735_v52 = vld [vmem:[#allocation8 + $0x84] ss:$8 sps:$4 sm:$0xff]   ;;  %v1212_v26 = vmul.f32 %v5231_v51, %v5231_v51  ;;  %v3737_v45 = vld [vmem:[#allocation8 + $0x80] ss:$8 sps:$4 sm:$0xff]  }
 0x2b5   : > { %v1073_v57 = vpop.xlane.xlu1 %1072  ;;  %2520 = vmatprep.subr.bf16.mxu0 %v3735_v52 }
 0x2b6   : > { %v5238_v10 = vsub.f32 %v4926_v2, %v1097_v54  ;;  %v5241_v24 = vsub.f32 %v6628_v41, %v1097_v54  ;;  %v1098_v12 = vmul.f32 0.001953125, %v1073_v57  ;;  %v1281_v56 = vadd.f32 %v1280_v55, %v1208_v15  ;;  %v6631_v2 = vld [vmem:[#allocation30_spill] sm:$0xff]  ;;  %v6632_v41 = vld [vmem:[#allocation31_spill] sm:$0xff]  ;;  %2521 = vmatpush1.bf16.msra.mxu0 %v3737_v45 }
 0x2b7   : > { %v1285_v11 = vadd.f32 %v1284_v18, %v1211_v38  ;;  %v5246_v59 = vsub.f32 %v4946_v1, %v1097_v54  ;;  %v5249_v60 = vsub.f32 %v4949_v62, %v1097_v54  ;;  %v3738_v57 = vld [vmem:[#allocation8 + $0x94] ss:$8 sps:$4 sm:$0xff]  }
 0x2b8   : > { %v5252_v27 = vsub.f32 %v6631_v2, %v1098_v12  ;;  %v5255_v61 = vsub.f32 %v6632_v41, %v1098_v12  ;;  %1282 = vadd.xlane.f32.xlu0 %v1281_v56  ;;  %v1213_v63 = vmul.f32 %v5238_v10, %v5238_v10  ;;  %v1214_v38 = vmul.f32 %v5241_v24, %v5241_v24 }
 0x2b9   : > { %6629 = vst [vmem:[#allocation28_spill] sm:$0xff] %v5246_v59  ;;  %6630 = vst [vmem:[#allocation29_spill] sm:$0xff] %v5249_v60  ;;  %v1286_v15 = vadd.f32 %v1285_v11, %v1212_v26  ;;  %v5262_v1 = vsub.f32 %v4955_v3, %v1098_v12  ;;  %v1215_v62 = vmul.f32 %v5246_v59, %v5246_v59  ;;  %v3740_v3 = vld [vmem:[#allocation8 + $0x90] ss:$8 sps:$4 sm:$0xff]   ;;  %2522 = vmatprep.subr.bf16.mxu0 %v3738_v57  ;;  %v6639_v57 = vld [vmem:[#allocation34_spill] sm:$0xff] }
 0x2ba   : > { %v1289_v54 = vadd.f32 %v1214_v38, %v1213_v63  ;;  %v1217_v55 = vmul.f32 %v5252_v27, %v5252_v27  ;;  %v1218_v18 = vmul.f32 %v5255_v61, %v5255_v61  ;;  %v5271_v26 = vsub.f32 %v4958_v4, %v1098_v12  ;;  %v6635_v59 = vld [vmem:[#allocation32_spill] sm:$0xff]  ;;  %2523 = vmatpush1.bf16.msra.mxu0 %v3740_v3 }
 0x2bb   : > { %6633 = vst [vmem:[#allocation30_spill] sm:$0xff] %v5262_v1  ;;  %1287 = vadd.xlane.f32.xlu1 %v1286_v15  ;;  %v1078_v56 = vpop.xlane.xlu0 %1077  ;;  %v1216_v52 = vmul.f32 %v5249_v60, %v5249_v60  ;;  %v1219_v38 = vmul.f32 %v5262_v1, %v5262_v1  ;;  %v6636_v15 = vld [vmem:[#allocation33_spill] sm:$0xff] }
 0x2bc   : > { %6634 = vst [vmem:[#allocation31_spill] sm:$0xff] %v5271_v26  ;;  %v1099_v11 = vmul.f32 0.001953125, %v1078_v56  ;;  %v1290_v2 = vadd.f32 %v1289_v54, %v1215_v62  ;;  %v1294_v41 = vadd.f32 %v1218_v18, %v1217_v55  ;;  %v3741_v56 = vld [vmem:[#allocation8 + $0xa4] ss:$8 sps:$4 sm:$0xff]   ;;  %v1220_v60 = vmul.f32 %v5271_v26, %v5271_v26  ;;  %v3743_v18 = vld [vmem:[#allocation8 + $0xa0] ss:$8 sps:$4 sm:$0xff]  }
 0x2bd   : > { %v1083_v63 = vpop.xlane.xlu1 %1082  ;;  %2524 = vmatprep.subr.bf16.mxu0 %v3741_v56 }
 0x2be   : > { %v5278_v45 = vsub.f32 %v6635_v59, %v1099_v11  ;;  %v5281_v51 = vsub.f32 %v6636_v15, %v1099_v11  ;;  %v1100_v4 = vmul.f32 0.001953125, %v1083_v63  ;;  %v1291_v12 = vadd.f32 %v1290_v2, %v1216_v52  ;;  %2525 = vmatpush1.bf16.msra.mxu0 %v3743_v18  ;;  %v3749_v18 = vld [vmem:[#allocation8 + $0xc0] ss:$8 sps:$4 sm:$0xff]  }
 0x2bf   : > { %v1295_v62 = vadd.f32 %v1294_v41, %v1219_v38  ;;  %v5286_v54 = vsub.f32 %v4982_v6, %v1099_v11  ;;  %v5289_v55 = vsub.f32 %v4985_v14, %v1099_v11  ;;  %v3744_v38 = vld [vmem:[#allocation8 + $0xb4] ss:$8 sps:$4 sm:$0xff]  }
 0x2c0   : > { %v5292_v59 = vsub.f32 %v4972_v13, %v1100_v4  ;;  %v5295_v15 = vsub.f32 %v6639_v57, %v1100_v4  ;;  %1292 = vadd.xlane.f32.xlu0 %v1291_v12  ;;  %v1221_v3 = vmul.f32 %v5278_v45, %v5278_v45  ;;  %v1222_v52 = vmul.f32 %v5281_v51, %v5281_v51 }
 0x2c1   : > { %6637 = vst [vmem:[#allocation32_spill] sm:$0xff] %v5286_v54  ;;  %6638 = vst [vmem:[#allocation33_spill] sm:$0xff] %v5289_v55  ;;  %v1296_v2 = vadd.f32 %v1295_v62, %v1220_v60  ;;  %v1223_v6 = vmul.f32 %v5286_v54, %v5286_v54  ;;  %v5304_v14 = vsub.f32 %v4991_v28, %v1100_v4  ;;  %v3746_v60 = vld [vmem:[#allocation8 + $0xb0] ss:$8 sps:$4 sm:$0xff]   ;;  %2526 = vmatprep.subr.bf16.mxu0 %v3744_v38 }
 0x2c2   : > { %v1299_v13 = vadd.f32 %v1222_v52, %v1221_v3  ;;  %v5307_v11 = vsub.f32 %v4994_v8, %v1100_v4  ;;  %v1225_v41 = vmul.f32 %v5292_v59, %v5292_v59  ;;  %v1226_v63 = vmul.f32 %v5295_v15, %v5295_v15  ;;  %2527 = vmatpush1.bf16.msra.mxu0 %v3746_v60  ;;  %v3747_v3 = vld [vmem:[#allocation8 + $0xc4] ss:$8 sps:$4 sm:$0xff]   ;;  %v3758_v38 = vld [vmem:[#allocation8 + $0xf0] ss:$8 sps:$4 sm:$0xff]  }
 0x2c3   : > { %6640 = vst [vmem:[#allocation34_spill] sm:$0xff] %v5304_v14  ;;  %1297 = vadd.xlane.f32.xlu1 %v1296_v2  ;;  %v1224_v12 = vmul.f32 %v5289_v55, %v5289_v55  ;;  %v1227_v56 = vmul.f32 %v5304_v14, %v5304_v14  ;;  %2528 = vmatprep.subr.bf16.mxu0 %v3747_v3  ;;  %v3750_v2 = vld [vmem:[#allocation8 + $0xd4] ss:$8 sps:$4 sm:$0xff]   ;;  %v3761_v60 = vld [vmem:[#allocation8 + $0x104] ss:$8 sps:$4 sm:$0xff]  }
 0x2c4   : > { %6641 = vst [vmem:[#allocation49_spill] sm:$0xff] %v5307_v11  ;;  %v1300_v28 = vadd.f32 %v1299_v13, %v1223_v6  ;;  %v1304_v62 = vadd.f32 %v1226_v63, %v1225_v41  ;;  %v1228_v4 = vmul.f32 %v5307_v11, %v5307_v11  ;;  %v3752_v6 = vld [vmem:[#allocation8 + $0xd0] ss:$8 sps:$4 sm:$0xff]   ;;  %v3753_v13 = vld [vmem:[#allocation8 + $0xe4] ss:$8 sps:$4 sm:$0xff]  }
 0x2c5   : > { %v3755_v41 = vld [vmem:[#allocation8 + $0xe0] ss:$8 sps:$4 sm:$0xff]   ;;  %v3756_v63 = vld [vmem:[#allocation8 + $0xf4] ss:$8 sps:$4 sm:$0xff]  }
 0x2c6   : > { %v1301_v8 = vadd.f32 %v1300_v28, %v1224_v12  ;;  %v1305_v57 = vadd.f32 %v1304_v62, %v1227_v56  ;;  %2529 = vmatpush1.bf16.msra.mxu0 %v3749_v18 }
 0x2c7   : > { %2530 = vmatprep.subr.bf16.mxu0 %v3750_v2 }
 0x2c8   : > { %1302 = vadd.xlane.f32.xlu0 %v1301_v8  ;;  %v1306_v52 = vadd.f32 %v1305_v57, %v1228_v4  ;;  %v6642_v4 = vld [vmem:[#allocation17_spill] sm:$0xff] }
 0x2c9   : > { %v5320_v57 = vsub.s32 1, %v6642_v4  ;;  %v5323_v3 = vsub.s32 5, %v6642_v4 }
 0x2ca   : > { %1307 = vadd.xlane.f32.xlu1 %v1306_v52  ;;  %2531 = vmatpush1.bf16.msra.mxu0 %v3752_v6  ;;  %v5326_v52 = vsub.s32 6, %v6642_v4 }
 0x2cb   : > { %2532 = vmatprep.subr.bf16.mxu0 %v3753_v13  ;;  %6643 = vst [vmem:[#allocation17_spill] sm:$0xff] %v5320_v57  ;;  %6644 = vst [vmem:[#allocation50_spill] sm:$0xff] %v5323_v3  ;;  %v5329_v13 = vsub.s32 2, %v6642_v4 }
 0x2cc   : > { %6645 = vst [vmem:[#allocation51_spill] sm:$0xff] %v5326_v52 }
 0x2cd   : > { %6646 = vst [vmem:[#allocation52_spill] sm:$0xff] %v5329_v13 }
 0x2ce   : > { %2533 = vmatpush1.bf16.msra.mxu0 %v3755_v41  ;;  %v6647_v41 = vld [vmem:[#allocation20_spill] sm:$0xff] }
 0x2cf   : > { %2534 = vmatprep.subr.bf16.mxu0 %v3756_v63  ;;  %v1428_v63 = vrot.slane %v6647_v41, %v5323_v3  ;;  %v1524_v4 = vrot.slane %v6647_v41, %v5329_v13 }
 0x2d1   : > { %v5346_v14 = vrot.slane %v1428_v63, %v5320_v57  ;;  %v5366_v1 = vrot.slane %v1524_v4, %v5329_v13 }
 0x2d2   : > { %2535 = vmatpush1.bf16.msra.mxu0 %v3758_v38  ;;  %v1424_v38 = vrot.slane %v6647_v41, %v5320_v57 }
 0x2d3   : > { %2617 = vmatprep.subr.bf16.mxu0 %v3761_v60  ;;  %v6648_v60 = vld [vmem:[#allocation21_spill] sm:$0xff] }
 0x31d   : > { %v1233_v12 = vpop.xlane.xlu0 %1232 }
 0x31e   : > { %v1309_v28 = vmul.f32 0.001953125, %v1233_v12  ;;  %v1436_v12 = vrot.slane %v6648_v60, %v5323_v3 }
 0x320   : > { %v1325_v56 = vadd.f32 1e-05, %v1309_v28  ;;  %v5352_v3 = vrot.slane %v1436_v12, %v5320_v57 }
 0x321   : > { %v1238_v62 = vpop.xlane.xlu1 %1237 }
 0x322   : > { %3807 = vrsqrt.f32 %v1325_v56  ;;  %v1310_v8 = vmul.f32 0.001953125, %v1238_v62  ;;  %v1528_v56 = vrot.slane %v6647_v41, %v5326_v52  ;;  %v1432_v62 = vrot.slane %v6648_v60, %v5320_v57 }
 0x323   : > { %v1532_v41 = vrot.slane %v6648_v60, %v5329_v13 }
 0x324   : > { %v1326_v18 = vadd.f32 1e-05, %v1310_v8  ;;  %v5358_v11 = vrot.slane %v1432_v62, %v5320_v57  ;;  %v6651_v62 = vld [vmem:[#allocation35_spill] sm:$0xff] }
 0x325   : > { %v1243_v2 = vpop.xlane.xlu0 %1242 }
 0x326   : > { %3809 = vrsqrt.f32 %v1326_v18  ;;  %v1311_v6 = vmul.f32 0.001953125, %v1243_v2  ;;  %v1536_v18 = vrot.slane %v6648_v60, %v5326_v52  ;;  %6649 = vst [vmem:[#allocation20_spill] sm:$0xff] %v5358_v11 }
 0x328   : > { %v1327_v28 = vadd.f32 1e-05, %v1311_v6  ;;  %v5349_v6 = vrot.slane %v1424_v38, %v5320_v57 }
 0x32a   : > { %3811 = vrsqrt.f32 %v1327_v28  ;;  %v1248_v8 = vpop.xlane.xlu1 %1247  ;;  %v5355_v28 = vrot.slane %v1528_v56, %v5329_v13  ;;  %v5369_v56 = vrot.slane %v1536_v18, %v5329_v13 }
 0x32b   : > { %v1312_v2 = vmul.f32 0.001953125, %v1248_v8 }
 0x32c   : > { %v3808_v54 = vpop.eup %3807  ;;  %6650 = vst [vmem:[#allocation21_spill] sm:$0xff] %v5369_v56 }
 0x32d   : > { %v1328_v8 = vadd.f32 1e-05, %v1312_v2  ;;  %v1253_v52 = vpop.xlane.xlu0 %1252  ;;  %v1358_v63 = vmul.f32 %v3808_v54, %v5003_v23  ;;  %v1357_v38 = vmul.f32 %v3808_v54, %v5000_v32  ;;  %v1360_v55 = vmul.f32 %v3808_v54, %v5009_v16 }
 0x32e   : > { %v1313_v12 = vmul.f32 0.001953125, %v1253_v52  ;;  %v1359_v57 = vmul.f32 %v3808_v54, %v6651_v62  ;;  %v5377_v52 = vrot.slane %v1532_v41, %v5329_v13 }
 0x32f   : > { %3813 = vrsqrt.f32 %v1328_v8  ;;  %v1458_v60 = vmul.f32 %v5346_v14, %v1358_v63  ;;  %v1457_v2 = vmul.f32 %v5349_v6, %v1357_v38  ;;  %v1460_v23 = vmul.f32 %v5352_v3, %v1360_v55  ;;  %v6653_v8 = vld [vmem:[#allocation36_spill] sm:$0xff] }
 0x330   : > { %v3810_v26 = vpop.eup %3809  ;;  %v1329_v32 = vadd.f32 1e-05, %v1313_v12  ;;  %v1258_v19 = vpop.xlane.xlu1 %1257  ;;  %v1459_v16 = vmul.f32 %v5358_v11, %v1359_v57  ;;  %6652 = vst [vmem:[#allocation35_spill] sm:$0xff] %v5377_v52 }
 0x331   : > { %v1314_v4 = vmul.f32 0.001953125, %v1258_v19  ;;  %v1362_v18 = vmul.f32 %v3810_v26, %v5021_v37  ;;  %v5381_v54 = vadd.f32 %v5355_v28, %v1458_v60  ;;  %v1361_v63 = vmul.f32 %v3810_v26, %v6653_v8  ;;  %v6655_v8 = vld [vmem:[#allocation37_spill] sm:$0xff] }
 0x332   : > { %3815 = vrsqrt.f32 %v1329_v32  ;;  %v5385_v38 = vadd.f32 %v5366_v1, %v1457_v2  ;;  %v1364_v55 = vmul.f32 %v3810_v26, %v5029_v31  ;;  %v5389_v12 = vadd.f32 %v5369_v56, %v1460_v23 }
 0x333   : > { %v1330_v57 = vadd.f32 1e-05, %v1314_v4  ;;  %v1462_v41 = vmul.f32 %v5346_v14, %v1362_v18  ;;  %v3329_v19 = vmul.f32 -1.442695, %v5381_v54  ;;  %v1461_v37 = vmul.f32 %v5349_v6, %v1361_v63 }
 0x334   : > { %6654 = vst [vmem:[#allocation36_spill] sm:$0xff] %v5389_v12  ;;  %v5394_v62 = vpop.eup %3811  ;;  %v3328_v60 = vmul.f32 -1.442695, %v5385_v38  ;;  %v1464_v32 = vmul.f32 %v5352_v3, %v1364_v55  ;;  %v3331_v2 = vmul.f32 -1.442695, %v5389_v12  ;;  %v1363_v31 = vmul.f32 %v3810_v26, %v6655_v8 }
 0x335   : > { %3817 = vrsqrt.f32 %v1330_v57  ;;  %v1263_v23 = vpop.xlane.xlu0 %1262  ;;  %v5401_v4 = vadd.f32 %v5355_v28, %v1462_v41  ;;  %v5404_v18 = vadd.f32 %v5366_v1, %v1461_v37  ;;  %v1366_v63 = vmul.f32 %v5394_v62, %v5041_v0 }
 0x336   : > { %v1315_v13 = vmul.f32 0.001953125, %v1263_v23  ;;  %3819 = vpow2.f32 %v3329_v19  ;;  %v1365_v55 = vmul.f32 %v5394_v62, %v5038_v44  ;;  %v5411_v12 = vadd.f32 %v5369_v56, %v1464_v32 }
 0x337   : > { %v3333_v26 = vmul.f32 -1.442695, %v5401_v4  ;;  %3821 = vpow2.f32 %v3328_v60  ;;  %v3332_v57 = vmul.f32 -1.442695, %v5404_v18  ;;  %v1466_v41 = vmul.f32 %v5346_v14, %v1366_v63 }
 0x338   : > { %6656 = vst [vmem:[#allocation37_spill] sm:$0xff] %v5411_v12  ;;  %v1331_v37 = vadd.f32 1e-05, %v1315_v13  ;;  %v1268_v8 = vpop.xlane.xlu1 %1267  ;;  %v1465_v7 = vmul.f32 %v5349_v6, %v1365_v55  ;;  %3823 = vpow2.f32 %v3331_v2  ;;  %v3335_v0 = vmul.f32 -1.442695, %v5411_v12 }
 0x339   : > { %v5418_v19 = vpop.eup %3813  ;;  %v1316_v44 = vmul.f32 0.001953125, %v1268_v8  ;;  %3825 = vpow2.f32 %v3333_v26  ;;  %v5421_v32 = vadd.f32 %v5355_v28, %v1466_v41  ;;  %v1463_v60 = vmul.f32 %v5358_v11, %v1363_v31 }
 0x33a   : > { %3827 = vrsqrt.f32 %v1331_v37  ;;  %v1370_v23 = vmul.f32 %v5418_v19, %v5061_v53  ;;  %v1369_v13 = vmul.f32 %v5418_v19, %v5058_v9  ;;  %v5429_v2 = vadd.f32 %v5366_v1, %v1465_v7 }
 0x33b   : > { %v1332_v63 = vadd.f32 1e-05, %v1316_v44  ;;  %3829 = vpow2.f32 %v3332_v57  ;;  %v3337_v55 = vmul.f32 -1.442695, %v5421_v32  ;;  %v5433_v26 = vadd.f32 %v5377_v52, %v1459_v16 }
 0x33c   : > { %v5435_v41 = vpop.eup %3815  ;;  %v1470_v31 = vmul.f32 %v5346_v14, %v1370_v23  ;;  %v1469_v37 = vmul.f32 %v5349_v6, %v1369_v13  ;;  %v3336_v53 = vmul.f32 -1.442695, %v5429_v2  ;;  %3831 = vpow2.f32 %v3335_v0 }
 0x33d   : > { %6657 = vst [vmem:[#allocation53_spill] sm:$0xff] %v5433_v26  ;;  %6658 = vst [vmem:[#allocation54_spill] sm:$0xff] %v5435_v41  ;;  %3833 = vrsqrt.f32 %v1332_v63  ;;  %v1273_v9 = vpop.xlane.xlu0 %1272  ;;  %v1374_v7 = vmul.f32 %v5435_v41, %v5079_v47  ;;  %v1373_v57 = vmul.f32 %v5435_v41, %v5076_v29  ;;  %v5448_v44 = vadd.f32 %v5377_v52, %v1463_v60 }
 0x33e   : > { %v1317_v8 = vmul.f32 0.001953125, %v1273_v9  ;;  %v5445_v16 = vadd.f32 %v5355_v28, %v1470_v31  ;;  %3835 = vpow2.f32 %v3337_v55  ;;  %v5453_v0 = vadd.f32 %v5366_v1, %v1469_v37 }
 0x33f   : > { %v5450_v23 = vpop.eup %3817  ;;  %3837 = vpow2.f32 %v3336_v53  ;;  %v1474_v13 = vmul.f32 %v5346_v14, %v1374_v7  ;;  %v1473_v47 = vmul.f32 %v5349_v6, %v1373_v57  ;;  %v5461_v60 = vmul.f32 -1.442695, %v5433_v26 }
 0x340   : > { %6659 = vst [vmem:[#allocation55_spill] sm:$0xff] %v5450_v23  ;;  %v3820_v63 = vpop.eup %3819  ;;  %v1333_v29 = vadd.f32 1e-05, %v1317_v8  ;;  %v1278_v9 = vpop.xlane.xlu1 %1277  ;;  %v3341_v31 = vmul.f32 -1.442695, %v5445_v16  ;;  %v1378_v55 = vmul.f32 %v5450_v23, %v5093_v36  ;;  %v1377_v7 = vmul.f32 %v5450_v23, %v5090_v42 }
 0x341   : > { %6660 = vst [vmem:[#allocation56_spill] sm:$0xff] %v5461_v60  ;;  %v3822_v12 = vpop.eup %3821  ;;  %v1318_v5 = vmul.f32 0.001953125, %v1278_v9  ;;  %v1814_v37 = vadd.f32 1.0, %v3820_v63  ;;  %v5464_v53 = vadd.f32 %v5355_v28, %v1474_v13  ;;  %v5470_v41 = vadd.f32 %v5366_v1, %v1473_v47 }
 0x342   : > { %v3824_v57 = vpop.eup %3823  ;;  %3839 = vrsqrt.f32 %v1333_v29  ;;  %v1813_v8 = vadd.f32 1.0, %v3822_v12  ;;  %v1478_v43 = vmul.f32 %v5346_v14, %v1378_v55  ;;  %v3340_v9 = vmul.f32 -1.442695, %v5453_v0 }
 0x343   : > { %v3826_v36 = vpop.eup %3825  ;;  %v1334_v26 = vadd.f32 1e-05, %v1318_v5  ;;  %3841 = vrcp.f32 %v1814_v37  ;;  %v1477_v63 = vmul.f32 %v5349_v6, %v1377_v7  ;;  %v3345_v12 = vmul.f32 -1.442695, %v5464_v53 }
 0x344   : > { %v5474_v13 = vpop.eup %3827  ;;  %v1818_v60 = vadd.f32 1.0, %v3826_v36  ;;  %3843 = vrcp.f32 %v1813_v8  ;;  %v5477_v42 = vadd.f32 %v5355_v28, %v1478_v43  ;;  %v3344_v55 = vmul.f32 -1.442695, %v5470_v41 }
 0x345   : > { %6661 = vst [vmem:[#allocation57_spill] sm:$0xff] %v5474_v13  ;;  %v3830_v29 = vpop.eup %3829  ;;  %3845 = vrsqrt.f32 %v1334_v26  ;;  %v1283_v47 = vpop.xlane.xlu0 %1282  ;;  %v1382_v5 = vmul.f32 %v5474_v13, %v5121_v34  ;;  %v1381_v37 = vmul.f32 %v5474_v13, %v5118_v30  ;;  %v5488_v43 = vadd.f32 %v5366_v1, %v1477_v63 }
 0x346   : > { %v5485_v7 = vpop.eup %3831  ;;  %v1319_v36 = vmul.f32 0.001953125, %v1283_v47  ;;  %3847 = vrcp.f32 %v1818_v60  ;;  %v1817_v8 = vadd.f32 1.0, %v3830_v29  ;;  %v3349_v26 = vmul.f32 -1.442695, %v5477_v42 }
 0x347   : > { %v5490_v23 = vpop.eup %3833  ;;  %3849 = vpow2.f32 %v3341_v31  ;;  %v1482_v33 = vmul.f32 %v5346_v14, %v1382_v5  ;;  %v1481_v34 = vmul.f32 %v5349_v6, %v1381_v37 }
 0x348   : > { %6662 = vst [vmem:[#allocation58_spill] sm:$0xff] %v5490_v23  ;;  %v3836_v52 = vpop.eup %3835  ;;  %v1335_v11 = vadd.f32 1e-05, %v1319_v36  ;;  %v1288_v30 = vpop.xlane.xlu1 %1287  ;;  %3851 = vrcp.f32 %v1817_v8  ;;  %v1386_v60 = vmul.f32 %v5490_v23, %v5135_v40  ;;  %v1385_v63 = vmul.f32 %v5490_v23, %v5132_v35 }
 0x349   : > { %v3838_v29 = vpop.eup %3837  ;;  %v1320_v47 = vmul.f32 0.001953125, %v1288_v30  ;;  %v1822_v13 = vadd.f32 1.0, %v3836_v52  ;;  %3853 = vpow2.f32 %v3340_v9  ;;  %v5500_v31 = vadd.f32 %v5355_v28, %v1482_v33 }
 0x34a   : > { %3855 = vrsqrt.f32 %v1335_v11  ;;  %v1821_v5 = vadd.f32 1.0, %v3838_v29  ;;  %v1486_v37 = vmul.f32 %v5346_v14, %v1386_v60  ;;  %v1485_v36 = vmul.f32 %v5349_v6, %v1385_v63 }
 0x34b   : > { %v1336_v8 = vadd.f32 1e-05, %v1320_v47  ;;  %3857 = vrcp.f32 %v1822_v13  ;;  %v3348_v40 = vmul.f32 -1.442695, %v5488_v43  ;;  %v5506_v56 = vadd.f32 %v5366_v1, %v1481_v34 }
 0x34c   : > { %v5508_v35 = vpop.eup %3839  ;;  %3859 = vrcp.f32 %v1821_v5  ;;  %v5511_v52 = vadd.f32 %v5355_v28, %v1486_v37  ;;  %v3353_v33 = vmul.f32 -1.442695, %v5500_v31  ;;  %v5515_v11 = vadd.f32 %v5366_v1, %v1485_v36 }
 0x34d   : > { %6663 = vst [vmem:[#allocation59_spill] sm:$0xff] %v5508_v35  ;;  %v3842_v9 = vpop.eup %3841  ;;  %3861 = vrsqrt.f32 %v1336_v8  ;;  %v1293_v30 = vpop.xlane.xlu0 %1292  ;;  %v5518_v13 = vmul.f32 -1.442695, %v5506_v56  ;;  %v1390_v34 = vmul.f32 %v5508_v35, %v5161_v50  ;;  %v5522_v60 = vadd.f32 1.0, %v3824_v57 }
 0x34e   : > { %v3844_v63 = vpop.eup %3843  ;;  %v1321_v29 = vmul.f32 0.001953125, %v1293_v30  ;;  %v2006_v47 = vmul.f32 %v3842_v9, %v5381_v54  ;;  %3863 = vpow2.f32 %v3345_v12  ;;  %v1389_v5 = vmul.f32 %v5508_v35, %v5158_v49 }
 0x34f   : > { %6664 = vst [vmem:[#allocation60_spill] sm:$0xff] %v5522_v60  ;;  %v5527_v37 = vpop.eup %3845  ;;  %v2005_v36 = vmul.f32 %v3844_v63, %v5385_v38  ;;  %3865 = vpow2.f32 %v3349_v26  ;;  %v3357_v8 = vmul.f32 -1.442695, %v5511_v52  ;;  %v1490_v23 = vmul.f32 %v5346_v14, %v1390_v34 }
 0x350   : > { %v3848_v50 = vpop.eup %3847  ;;  %v1337_v57 = vadd.f32 1e-05, %v1321_v29  ;;  %v1298_v60 = vpop.xlane.xlu1 %1297  ;;  %3867 = vpow2.f32 %v3344_v55  ;;  %v1394_v54 = vmul.f32 %v5527_v37, %v5175_v58  ;;  %v1393_v12 = vmul.f32 %v5527_v37, %v5172_v25 }
 0x351   : > { %v3850_v49 = vpop.eup %3849  ;;  %v1322_v9 = vmul.f32 0.001953125, %v1298_v60  ;;  %v2010_v30 = vmul.f32 %v3848_v50, %v5401_v4  ;;  %3869 = vpow2.f32 %v3348_v40  ;;  %v5538_v38 = vadd.f32 %v5355_v28, %v1490_v23  ;;  %v3759_v4 = vld [vmem:[#allocation8 + $0x100] ss:$8 sps:$4 sm:$0xff]  }
 0x352   : > { %v3852_v26 = vpop.eup %3851  ;;  %3871 = vrsqrt.f32 %v1337_v57  ;;  %v1826_v34 = vadd.f32 1.0, %v3850_v49  ;;  %v1494_v63 = vmul.f32 %v5346_v14, %v1394_v54  ;;  %v1489_v55 = vmul.f32 %v5349_v6, %v1389_v5  ;;  %v3764_v49 = vld [vmem:[#allocation8 + $0x114] ss:$8 sps:$4 sm:$0xff]  }
 0x353   : > { %v3854_v29 = vpop.eup %3853  ;;  %v1338_v58 = vadd.f32 1e-05, %v1322_v9  ;;  %v2070_v35 = vpack.c.bf16 %v2010_v30, %v2006_v47  ;;  %v2009_v25 = vmul.f32 %v3852_v26, %v5404_v18  ;;  %3873 = vpow2.f32 %v3353_v33 }
 0x354   : > { %v5543_v60 = vpop.eup %3855  ;;  %3875 = vrcp.f32 %v1826_v34  ;;  %v1825_v40 = vadd.f32 1.0, %v3854_v29  ;;  %v3356_v23 = vmul.f32 -1.442695, %v5515_v11  ;;  %v5547_v50 = vadd.f32 %v5355_v28, %v1494_v63 }
 0x355   : > { %v3858_v57 = vpop.eup %3857  ;;  %3877 = vrsqrt.f32 %v1338_v58  ;;  %2536 = vmatprep.mubr.bf16.mxu0 %v2070_v35  ;;  %v1303_v5 = vpop.xlane.xlu0 %1302  ;;  %v2069_v54 = vpack.c.bf16 %v2009_v25, %v2005_v36  ;;  %v1493_v47 = vmul.f32 %v5349_v6, %v1393_v12  ;;  %v5551_v18 = vadd.f32 %v5366_v1, %v1489_v55  ;;  %v3762_v58 = vld [vmem:[#allocation8 + $0x110] ss:$8 sps:$4 sm:$0xff]  }
 0x356   : > { %v3860_v33 = vpop.eup %3859  ;;  %v1323_v9 = vmul.f32 0.001953125, %v1303_v5  ;;  %v5554_v30 = vmul.f32 %v3858_v57, %v5421_v32  ;;  %3879 = vrcp.f32 %v1825_v40  ;;  %v5557_v26 = vmul.f32 -1.442695, %v5538_v38 }
 0x357   : > { %v5559_v34 = vpop.eup %3861  ;;  %2537 = vmatmul.mubr.bf16.vlgmr.msra.gmra.mrb[0].mxu0 %v2069_v54  ;;  %v1308_v35 = vpop.xlane.xlu1 %1307  ;;  %v5562_v36 = vmul.f32 %v3860_v33, %v5429_v2  ;;  %3881 = vpow2.f32 %v3357_v8  ;;  %v5565_v12 = vmul.f32 -1.442695, %v5547_v50  ;;  %v5568_v63 = vadd.f32 %v5366_v1, %v1493_v47  ;;  %v3767_v2 = vld [vmem:[#allocation8 + $0x124] ss:$8 sps:$4 sm:$0xff]  }
 0x358   : > { %v3864_v32 = vpop.eup %3863  ;;  %v1339_v55 = vadd.f32 1e-05, %v1323_v9  ;;  %v1324_v29 = vmul.f32 0.001953125, %v1308_v35  ;;  %2618 = vmatpush1.bf16.msra.mxu0 %v3759_v4  ;;  %3883 = vpow2.f32 %v5518_v13  ;;  %v1398_v25 = vmul.f32 %v5543_v60, %v5201_v46  ;;  %v3765_v35 = vld [vmem:[#allocation8 + $0x120] ss:$8 sps:$4 sm:$0xff]  }
 0x359   : > { %v3866_v40 = vpop.eup %3865  ;;  %2619 = vmatprep.subr.bf16.mxu0 %v3764_v49  ;;  %v1830_v8 = vadd.f32 1.0, %v3864_v32  ;;  %3885 = vpow2.f32 %v3356_v23  ;;  %v3360_v57 = vmul.f32 -1.442695, %v5551_v18  ;;  %v1402_v5 = vmul.f32 %v5559_v34, %v5215_v20 }
 0x35a   : > { %v3868_v54 = vpop.eup %3867  ;;  %3887 = vrsqrt.f32 %v1339_v55  ;;  %v1340_v47 = vadd.f32 1e-05, %v1324_v29  ;;  %v1834_v4 = vadd.f32 1.0, %v3866_v40  ;;  %v1498_v33 = vmul.f32 %v5346_v14, %v1398_v25  ;;  %v3770_v25 = vld [vmem:[#allocation8 + $0x134] ss:$8 sps:$4 sm:$0xff]  }
 0x35b   : > { %v3870_v13 = vpop.eup %3869  ;;  %3889 = vrcp.f32 %v1830_v8  ;;  %v1829_v9 = vadd.f32 1.0, %v3868_v54  ;;  %v1502_v46 = vmul.f32 %v5346_v14, %v1402_v5  ;;  %v1397_v49 = vmul.f32 %v5543_v60, %v5198_v48 }
 0x35c   : > { %v5580_v23 = vpop.eup %3871  ;;  %3891 = vrsqrt.f32 %v1340_v47  ;;  %2620 = vmatpush1.bf16.msra.mxu0 %v3762_v58  ;;  %v1833_v20 = vadd.f32 1.0, %v3870_v13  ;;  %v5583_v32 = vadd.f32 %v5355_v28, %v1498_v33  ;;  %v1401_v55 = vmul.f32 %v5559_v34, %v5212_v22 }
 0x35d   : > { %v3874_v29 = vpop.eup %3873  ;;  %2621 = vmatprep.subr.bf16.mxu0 %v3767_v2  ;;  %3893 = vrcp.f32 %v1834_v4  ;;  %v5588_v40 = vadd.f32 %v5355_v28, %v1502_v46  ;;  %v1497_v48 = vmul.f32 %v5349_v6, %v1397_v49  ;;  %v1406_v58 = vmul.f32 %v5580_v23, %v5241_v24  ;;  %v3768_v24 = vld [vmem:[#allocation8 + $0x130] ss:$8 sps:$4 sm:$0xff]  }
 0x35e   : > { %v3876_v8 = vpop.eup %3875  ;;  %3895 = vrcp.f32 %v1829_v9  ;;  %v1838_v5 = vadd.f32 1.0, %v3874_v29  ;;  %v3364_v54 = vmul.f32 -1.442695, %v5568_v63  ;;  %v1501_v47 = vmul.f32 %v5349_v6, %v1401_v55  ;;  %v3773_v29 = vld [vmem:[#allocation8 + $0x144] ss:$8 sps:$4 sm:$0xff]  }
 0x35f   : > { %v5595_v22 = vpop.eup %3877  ;;  %v2018_v2 = vmul.f32 %v3876_v8, %v5445_v16  ;;  %3897 = vrcp.f32 %v1833_v20  ;;  %v3369_v4 = vmul.f32 -1.442695, %v5583_v32  ;;  %v5600_v33 = vadd.f32 %v5366_v1, %v1497_v48 }
 0x360   : > { %v3880_v13 = vpop.eup %3879  ;;  %2622 = vmatpush1.bf16.msra.mxu0 %v3765_v35  ;;  %3899 = vrcp.f32 %v1838_v5  ;;  %v3373_v9 = vmul.f32 -1.442695, %v5588_v40  ;;  %v1410_v46 = vmul.f32 %v5595_v22, %v5255_v61  ;;  %v1506_v49 = vmul.f32 %v5346_v14, %v1406_v58 }
 0x361   : > { %v3882_v55 = vpop.eup %3881  ;;  %v2074_v16 = vpack.c.bf16 %v2018_v2, %v5554_v30  ;;  %v2017_v20 = vmul.f32 %v3880_v13, %v5453_v0  ;;  %2623 = vmatprep.subr.bf16.mxu0 %v3770_v25  ;;  %3901 = vpow2.f32 %v5557_v26  ;;  %v5610_v35 = vadd.f32 %v5366_v1, %v1501_v47  ;;  %v3771_v47 = vld [vmem:[#allocation8 + $0x140] ss:$8 sps:$4 sm:$0xff]  }
 0x362   : > { %v3884_v48 = vpop.eup %3883  ;;  %v1842_v8 = vadd.f32 1.0, %v3882_v55  ;;  %3903 = vpow2.f32 %v5565_v12  ;;  %v3368_v61 = vmul.f32 -1.442695, %v5600_v33  ;;  %v1510_v58 = vmul.f32 %v5346_v14, %v1410_v46 }
 0x363   : > { %v3886_v5 = vpop.eup %3885  ;;  %2546 = vmatprep.mubr.bf16.mxu0 %v2074_v16  ;;  %v2073_v30 = vpack.c.bf16 %v2017_v20, %v5562_v36  ;;  %v1837_v0 = vadd.f32 1.0, %v3884_v48  ;;  %3905 = vpow2.f32 %v3360_v57  ;;  %v5617_v25 = vadd.f32 %v5355_v28, %v1506_v49  ;;  %v3776_v36 = vld [vmem:[#allocation8 + $0x154] ss:$8 sps:$4 sm:$0xff]  }
 0x364   : > { %v5619_v26 = vpop.eup %3887  ;;  %2624 = vmatpush1.bf16.msra.mxu0 %v3768_v24  ;;  %3907 = vrcp.f32 %v1842_v8  ;;  %v1841_v2 = vadd.f32 1.0, %v3886_v5  ;;  %v5622_v12 = vadd.f32 %v5355_v28, %v1510_v58  ;;  %v1405_v13 = vmul.f32 %v5580_v23, %v5238_v10  ;;  %v3774_v5 = vld [vmem:[#allocation8 + $0x150] ss:$8 sps:$4 sm:$0xff]  }
 0x365   : > { %v3890_v46 = vpop.eup %3889  ;;  %2547 = vmatmul.mubr.bf16.gmra.mrb[4].mxu0 %v2073_v30  ;;  %2625 = vmatprep.subr.bf16.mxu0 %v3773_v29  ;;  %3909 = vrcp.f32 %v1837_v0  ;;  %v3372_v57 = vmul.f32 -1.442695, %v5610_v35  ;;  %v1409_v49 = vmul.f32 %v5595_v22, %v5252_v27  ;;  %v1414_v24 = vmul.f32 %v5619_v26, %v5281_v51 }
 0x366   : > { %v5631_v55 = vpop.eup %3891  ;;  %v2022_v16 = vmul.f32 %v3890_v46, %v5464_v53  ;;  %3911 = vrcp.f32 %v1841_v2  ;;  %v3377_v10 = vmul.f32 -1.442695, %v5617_v25  ;;  %v1505_v20 = vmul.f32 %v5349_v6, %v1405_v13 }
 0x367   : > { %v3894_v29 = vpop.eup %3893  ;;  %3913 = vpow2.f32 %v3364_v54  ;;  %v1509_v48 = vmul.f32 %v5349_v6, %v1409_v49  ;;  %v1418_v8 = vmul.f32 %v5631_v55, %v5295_v15  ;;  %v1514_v27 = vmul.f32 %v5346_v14, %v1414_v24  ;;  %v3779_v54 = vld [vmem:[#allocation8 + $0x164] ss:$8 sps:$4 sm:$0xff]  }
 0x368   : > { %v3896_v58 = vpop.eup %3895  ;;  %v2026_v51 = vmul.f32 %v3894_v29, %v5477_v42  ;;  %2626 = vmatpush1.bf16.msra.mxu0 %v3771_v47  ;;  %3915 = vpow2.f32 %v3369_v4  ;;  %v3381_v53 = vmul.f32 -1.442695, %v5622_v12  ;;  %v5643_v30 = vadd.f32 %v5366_v1, %v1505_v20 }
 0x369   : > { %v3898_v0 = vpop.eup %3897  ;;  %2627 = vmatprep.subr.bf16.mxu0 %v3776_v36  ;;  %3917 = vpow2.f32 %v3373_v9  ;;  %v5646_v2 = vadd.f32 %v5366_v1, %v1509_v48  ;;  %v1518_v15 = vmul.f32 %v5346_v14, %v1418_v8  ;;  %v1413_v42 = vmul.f32 %v5619_v26, %v5278_v45  ;;  %v3777_v45 = vld [vmem:[#allocation8 + $0x160] ss:$8 sps:$4 sm:$0xff]  }
 0x36a   : > { %v3900_v47 = vpop.eup %3899  ;;  %v2078_v13 = vpack.c.bf16 %v2026_v51, %v2022_v16  ;;  %v2021_v4 = vmul.f32 %v3896_v58, %v5470_v41  ;;  %v2025_v46 = vmul.f32 %v3898_v0, %v5488_v43  ;;  %3919 = vpow2.f32 %v3368_v61  ;;  %v3782_v61 = vld [vmem:[#allocation8 + $0x174] ss:$8 sps:$4 sm:$0xff]   ;;  %v3780_v0 = vld [vmem:[#allocation8 + $0x170] ss:$8 sps:$4 sm:$0xff]  }
 0x36b   : > { %v3902_v49 = vpop.eup %3901  ;;  %v2030_v36 = vmul.f32 %v3900_v47, %v5500_v31  ;;  %3921 = vpow2.f32 %v3372_v57  ;;  %v3376_v9 = vmul.f32 -1.442695, %v5643_v30  ;;  %v5656_v24 = vadd.f32 %v5355_v28, %v1514_v27 }
 0x36c   : > { %v3904_v14 = vpop.eup %3903  ;;  %2556 = vmatprep.mubr.bf16.mxu0 %v2078_v13  ;;  %v2077_v20 = vpack.c.bf16 %v2025_v46, %v2021_v4  ;;  %2628 = vmatpush1.bf16.msra.mxu0 %v3774_v5  ;;  %v1846_v16 = vadd.f32 1.0, %v3902_v49  ;;  %3923 = vpow2.f32 %v3377_v10  ;;  %v5659_v41 = vadd.f32 %v5355_v28, %v1518_v15  ;;  %v3785_v13 = vld [vmem:[#allocation8 + $0x184] ss:$8 sps:$4 sm:$0xff]  }
 0x36d   : > { %v3906_v43 = vpop.eup %3905  ;;  %2629 = vmatprep.subr.bf16.mxu0 %v3779_v54  ;;  %v1850_v31 = vadd.f32 1.0, %v3904_v14  ;;  %3925 = vpow2.f32 %v3381_v53  ;;  %v3380_v57 = vmul.f32 -1.442695, %v5646_v2  ;;  %v1417_v29 = vmul.f32 %v5631_v55, %v5292_v59 }
 0x36e   : > { %v3908_v48 = vpop.eup %3907  ;;  %2557 = vmatmul.mubr.bf16.gmra.mrb[8].mxu0 %v2077_v20  ;;  %3927 = vrcp.f32 %v1846_v16  ;;  %v1845_v8 = vadd.f32 1.0, %v3906_v43  ;;  %v3385_v27 = vmul.f32 -1.442695, %v5656_v24  ;;  %v1513_v10 = vmul.f32 %v5349_v6, %v1413_v42 }
 0x36f   : > { %v3910_v28 = vpop.eup %3909  ;;  %v2034_v58 = vmul.f32 %v3908_v48, %v5511_v52  ;;  %3929 = vrcp.f32 %v1850_v31  ;;  %v5668_v51 = vmul.f32 -1.442695, %v5659_v41  ;;  %v1517_v5 = vmul.f32 %v5349_v6, %v1417_v29 }
 0x370   : > { %v3912_v53 = vpop.eup %3911  ;;  %v2029_v59 = vmul.f32 %v3910_v28, %v5506_v56  ;;  %2630 = vmatpush1.bf16.msra.mxu0 %v3777_v45  ;;  %3931 = vrcp.f32 %v1845_v8  ;;  %v5673_v54 = vadd.f32 %v5366_v1, %v1513_v10  ;;  %v5676_v15 = vadd.f32 1.0, %v5485_v7 }
 0x371   : > { %v3914_v42 = vpop.eup %3913  ;;  %v2082_v52 = vpack.c.bf16 %v2034_v58, %v2030_v36  ;;  %v2033_v47 = vmul.f32 %v3912_v53, %v5515_v11  ;;  %2631 = vmatprep.subr.bf16.mxu0 %v3782_v61  ;;  %3933 = vpow2.f32 %v3376_v9  ;;  %v5680_v6 = vadd.f32 %v5366_v1, %v1517_v5  ;;  %v3783_v1 = vld [vmem:[#allocation8 + $0x180] ss:$8 sps:$4 sm:$0xff]   ;;  %v6667_v5 = vld [vmem:[#allocation20_spill] sm:$0xff] }
 0x372   : > { %v3916_v56 = vpop.eup %3915  ;;  %v1849_v4 = vadd.f32 1.0, %v3914_v42  ;;  %3935 = vpow2.f32 %v3380_v57  ;;  %v5683_v46 = vmul.f32 -1.442695, %v5448_v44  ;;  %v1368_v7 = vmul.f32 %v5394_v62, %v5049_v17  ;;  %v3788_v17 = vld [vmem:[#allocation8 + $0x194] ss:$8 sps:$4 sm:$0xff]   ;;  %v6665_v57 = vld [vmem:[#allocation38_spill] sm:$0xff] }
 0x373   : > { %v3918_v49 = vpop.eup %3917  ;;  %2566 = vmatprep.mubr.bf16.mxu0 %v2082_v52  ;;  %v2081_v36 = vpack.c.bf16 %v2033_v47, %v2029_v59  ;;  %v1854_v14 = vadd.f32 1.0, %v3916_v56  ;;  %3937 = vpow2.f32 %v3385_v27  ;;  %v3384_v11 = vmul.f32 -1.442695, %v5673_v54 }
 0x374   : > { %v3920_v9 = vpop.eup %3919  ;;  %2632 = vmatpush1.bf16.msra.mxu0 %v3780_v0  ;;  %3939 = vrcp.f32 %v1849_v4  ;;  %v1858_v20 = vadd.f32 1.0, %v3918_v49  ;;  %v1372_v45 = vmul.f32 %v5418_v19, %v5073_v39  ;;  %v1468_v16 = vmul.f32 %v5352_v3, %v1368_v7  ;;  %v6666_v39 = vld [vmem:[#allocation21_spill] sm:$0xff]  ;;  %v6668_v4 = vld [vmem:[#allocation35_spill] sm:$0xff] }
 0x375   : > { %v3922_v43 = vpop.eup %3921  ;;  %2633 = vmatprep.subr.bf16.mxu0 %v3785_v13  ;;  %3941 = vrcp.f32 %v1854_v14  ;;  %v1853_v61 = vadd.f32 1.0, %v3920_v9  ;;  %v1367_v31 = vmul.f32 %v5394_v62, %v5046_v21  ;;  %v1371_v29 = vmul.f32 %v5418_v19, %v6665_v57  ;;  %v3786_v62 = vld [vmem:[#allocation8 + $0x190] ss:$8 sps:$4 sm:$0xff]   ;;  %v3791_v13 = vld [vmem:[#allocation8 + $0x1a4] ss:$8 sps:$4 sm:$0xff]  }
 0x376   : > { %v3924_v48 = vpop.eup %3923  ;;  %2567 = vmatmul.mubr.bf16.gmra.mrb[12].mxu0 %v2081_v36  ;;  %3943 = vrcp.f32 %v1858_v20  ;;  %v1857_v8 = vadd.f32 1.0, %v3922_v43  ;;  %v1472_v27 = vmul.f32 %v5352_v3, %v1372_v45  ;;  %v5697_v10 = vadd.f32 %v6666_v39, %v1468_v16  ;;  %v6669_v9 = vld [vmem:[#allocation40_spill] sm:$0xff]  ;;  %v6671_v57 = vld [vmem:[#allocation42_spill] sm:$0xff] }
 0x377   : > { %v3926_v28 = vpop.eup %3925  ;;  %3945 = vrcp.f32 %v1853_v61  ;;  %v1862_v58 = vadd.f32 1.0, %v3924_v48  ;;  %v1467_v53 = vmul.f32 %v6667_v5, %v1367_v31  ;;  %v1471_v59 = vmul.f32 %v6667_v5, %v1371_v29  ;;  %v3789_v61 = vld [vmem:[#allocation8 + $0x1a0] ss:$8 sps:$4 sm:$0xff]   ;;  %v6672_v29 = vld [vmem:[#allocation55_spill] sm:$0xff] }
 0x378   : > { %v3928_v21 = vpop.eup %3927  ;;  %2634 = vmatpush1.bf16.msra.mxu0 %v3783_v1  ;;  %3947 = vrcp.f32 %v1857_v8  ;;  %v1866_v19 = vadd.f32 1.0, %v3926_v28  ;;  %v3388_v0 = vmul.f32 -1.442695, %v5680_v6  ;;  %v5703_v42 = vadd.f32 %v6666_v39, %v1472_v27  ;;  %v6670_v1 = vld [vmem:[#allocation54_spill] sm:$0xff]  ;;  %v6673_v28 = vld [vmem:[#allocation39_spill] sm:$0xff] }
 0x379   : > { %v3930_v52 = vpop.eup %3929  ;;  %v2038_v47 = vmul.f32 %v3928_v21, %v5538_v38  ;;  %2635 = vmatprep.subr.bf16.mxu0 %v3788_v17  ;;  %3949 = vrcp.f32 %v1862_v58  ;;  %v5707_v56 = vmul.f32 -1.442695, %v5697_v10  ;;  %v5710_v7 = vadd.f32 %v6668_v4, %v1467_v53 }
 0x37a   : > { %v3932_v49 = vpop.eup %3931  ;;  %v2042_v36 = vmul.f32 %v3930_v52, %v5547_v50  ;;  %3951 = vrcp.f32 %v1866_v19  ;;  %v5714_v14 = vadd.f32 %v6668_v4, %v1471_v59  ;;  %v1376_v20 = vmul.f32 %v6670_v1, %v6669_v9 }
 0x37b   : > { %v3934_v38 = vpop.eup %3933  ;;  %v2037_v45 = vmul.f32 %v3932_v49, %v5551_v18  ;;  %3953 = vpow2.f32 %v5668_v51  ;;  %v5721_v16 = vmul.f32 -1.442695, %v5703_v42  ;;  %v5724_v43 = vmul.f32 -1.442695, %v5710_v7  ;;  %v3794_v18 = vld [vmem:[#allocation8 + $0x1b4] ss:$8 sps:$4 sm:$0xff]  }
 0x37c   : > { %v3936_v17 = vpop.eup %3935  ;;  %v2086_v50 = vpack.c.bf16 %v2042_v36, %v2038_v47  ;;  %2636 = vmatpush1.bf16.msra.mxu0 %v3786_v62  ;;  %v1861_v31 = vadd.f32 1.0, %v3934_v38  ;;  %3955 = vpow2.f32 %v3384_v11  ;;  %v1380_v48 = vmul.f32 %v6672_v29, %v6671_v57  ;;  %v6674_v11 = vld [vmem:[#allocation41_spill] sm:$0xff]  ;;  %v3792_v49 = vld [vmem:[#allocation8 + $0x1b0] ss:$8 sps:$4 sm:$0xff]  }
 0x37d   : > { %v3938_v8 = vpop.eup %3937  ;;  %2637 = vmatprep.subr.bf16.mxu0 %v3791_v13  ;;  %v1865_v27 = vadd.f32 1.0, %v3936_v17  ;;  %3957 = vpow2.f32 %v3388_v0  ;;  %v1476_v51 = vmul.f32 %v5352_v3, %v1376_v20  ;;  %v1375_v58 = vmul.f32 %v6670_v1, %v6673_v28  ;;  %v6677_v28 = vld [vmem:[#allocation44_spill] sm:$0xff] }
 0x37e   : > { %v3940_v53 = vpop.eup %3939  ;;  %2576 = vmatprep.mubr.bf16.mxu0 %v2086_v50  ;;  %3959 = vrcp.f32 %v1861_v31  ;;  %v1870_v59 = vadd.f32 1.0, %v3938_v8  ;;  %v1480_v21 = vmul.f32 %v5352_v3, %v1380_v48  ;;  %v1379_v62 = vmul.f32 %v6672_v29, %v6674_v11  ;;  %v3797_v50 = vld [vmem:[#allocation8 + $0x1c4] ss:$8 sps:$4 sm:$0xff]   ;;  %v6675_v31 = vld [vmem:[#allocation60_spill] sm:$0xff] }
 0x37f   : > { %v3942_v19 = vpop.eup %3941  ;;  %v2041_v52 = vmul.f32 %v3940_v53, %v5568_v63  ;;  %3961 = vrcp.f32 %v1865_v27  ;;  %v5736_v0 = vadd.f32 %v6666_v39, %v1476_v51  ;;  %v1475_v47 = vmul.f32 %v6667_v5, %v1375_v58  ;;  %v6676_v8 = vld [vmem:[#allocation56_spill] sm:$0xff]  ;;  %v6678_v58 = vld [vmem:[#allocation57_spill] sm:$0xff] }
 0x380   : > { %v3944_v13 = vpop.eup %3943  ;;  %2638 = vmatpush1.bf16.msra.mxu0 %v3789_v61  ;;  %3963 = vrcp.f32 %v1870_v59  ;;  %v5740_v36 = vmul.f32 -1.442695, %v5714_v14  ;;  %v5743_v9 = vadd.f32 %v6666_v39, %v1480_v21  ;;  %v1479_v1 = vmul.f32 %v6667_v5, %v1379_v62  ;;  %v3800_v11 = vld [vmem:[#allocation8 + $0x1d4] ss:$8 sps:$4 sm:$0xff]  }
 0x381   : > { %v3946_v20 = vpop.eup %3945  ;;  %v2085_v63 = vpack.c.bf16 %v2041_v52, %v2037_v45  ;;  %v2046_v38 = vmul.f32 %v3942_v19, %v5583_v32  ;;  %v2050_v17 = vmul.f32 %v3944_v13, %v5588_v40  ;;  %2639 = vmatprep.subr.bf16.mxu0 %v3794_v18  ;;  %3965 = vrcp.f32 %v6675_v31  ;;  %v6680_v52 = vld [vmem:[#allocation58_spill] sm:$0xff] }
 0x382   : > { %v3948_v61 = vpop.eup %3947  ;;  %v2045_v57 = vmul.f32 %v3946_v20, %v5600_v33  ;;  %3967 = vrcp.f32 %v5676_v15  ;;  %v5752_v29 = vmul.f32 -1.442695, %v5736_v0  ;;  %v5755_v48 = vadd.f32 %v6668_v4, %v1475_v47  ;;  %v3795_v15 = vld [vmem:[#allocation8 + $0x1c0] ss:$8 sps:$4 sm:$0xff]  }
 0x383   : > { %v3950_v45 = vpop.eup %3949  ;;  %2577 = vmatmul.mubr.bf16.gmra.mrb[16].mxu0 %v2085_v63  ;;  %v2090_v32 = vpack.c.bf16 %v2050_v17, %v2046_v38  ;;  %v2049_v40 = vmul.f32 %v3948_v61, %v5610_v35  ;;  %3969 = vpow2.f32 %v6676_v8  ;;  %v3351_v18 = vmul.f32 -1.442695, %v5743_v9  ;;  %v3798_v38 = vld [vmem:[#allocation8 + $0x1d0] ss:$8 sps:$4 sm:$0xff]   ;;  %v3803_v61 = vld [vmem:[#allocation8 + $0x1e4] ss:$8 sps:$4 sm:$0xff]  }
 0x384   : > { %v3952_v27 = vpop.eup %3951  ;;  %v2054_v33 = vmul.f32 %v3950_v45, %v5617_v25  ;;  %2640 = vmatpush1.bf16.msra.mxu0 %v3792_v49  ;;  %3971 = vpow2.f32 %v5683_v46  ;;  %v5763_v51 = vadd.f32 %v6668_v4, %v1479_v1  ;;  %v1384_v53 = vmul.f32 %v6678_v58, %v6677_v28  ;;  %v6679_v46 = vld [vmem:[#allocation46_spill] sm:$0xff] }
 0x385   : > { %v3954_v59 = vpop.eup %3953  ;;  %2586 = vmatprep.mubr.bf16.mxu0 %v2090_v32  ;;  %v2089_v35 = vpack.c.bf16 %v2049_v40, %v2045_v57  ;;  %v2058_v21 = vmul.f32 %v3952_v27, %v5622_v12  ;;  %2641 = vmatprep.subr.bf16.mxu0 %v3797_v50  ;;  %3973 = vpow2.f32 %v5707_v56  ;;  %v3346_v25 = vmul.f32 -1.442695, %v5755_v48  ;;  %v6681_v12 = vld [vmem:[#allocation43_spill] sm:$0xff] }
 0x386   : > { %v3956_v62 = vpop.eup %3955  ;;  %v1874_v19 = vadd.f32 1.0, %v3954_v59  ;;  %3975 = vpow2.f32 %v5721_v16  ;;  %v1388_v47 = vmul.f32 %v6680_v52, %v6679_v46  ;;  %v1484_v13 = vmul.f32 %v5352_v3, %v1384_v53  ;;  %v3806_v46 = vld [vmem:[#allocation8 + $0x1f4] ss:$8 sps:$4 sm:$0xff]  }
 0x387   : > { %v3958_v49 = vpop.eup %3957  ;;  %v2094_v1 = vpack.c.bf16 %v2058_v21, %v2054_v33  ;;  %v1869_v20 = vadd.f32 1.0, %v3956_v62  ;;  %3977 = vpow2.f32 %v5724_v43  ;;  %v1383_v63 = vmul.f32 %v6678_v58, %v6681_v12  ;;  %v6682_v43 = vld [vmem:[#allocation45_spill] sm:$0xff]  ;;  %v6687_v12 = vld [vmem:[#allocation23_spill] sm:$0xff] }
 0x388   : > { %v3960_v56 = vpop.eup %3959  ;;  %2642 = vmatpush1.bf16.msra.mxu0 %v3795_v15  ;;  %3979 = vrcp.f32 %v1874_v19  ;;  %v1873_v17 = vadd.f32 1.0, %v3958_v49  ;;  %v1488_v16 = vmul.f32 %v5352_v3, %v1388_v47  ;;  %v5779_v50 = vadd.f32 %v6666_v39, %v1484_v13  ;;  %v3801_v21 = vld [vmem:[#allocation8 + $0x1e0] ss:$8 sps:$4 sm:$0xff]   ;;  %v6685_v49 = vld [vmem:[#allocation48_spill] sm:$0xff] }
 0x389   : > { %v3962_v31 = vpop.eup %3961  ;;  %2643 = vmatprep.subr.bf16.mxu0 %v3800_v11  ;;  %3981 = vrcp.f32 %v1869_v20  ;;  %v3350_v57 = vmul.f32 -1.442695, %v5763_v51  ;;  %v1387_v45 = vmul.f32 %v6680_v52, %v6682_v43  ;;  %v1483_v32 = vmul.f32 %v6667_v5, %v1383_v63  ;;  %v6683_v11 = vld [vmem:[#allocation36_spill] sm:$0xff] }
 0x38a   : > { %v3964_v40 = vpop.eup %3963  ;;  %v2053_v8 = vmul.f32 %v3960_v56, %v5643_v30  ;;  %v2057_v27 = vmul.f32 %v3962_v31, %v5646_v2  ;;  %3983 = vrcp.f32 %v1873_v17  ;;  %v5788_v33 = vadd.f32 %v6666_v39, %v1488_v16  ;;  %v3804_v16 = vld [vmem:[#allocation8 + $0x1f0] ss:$8 sps:$4 sm:$0xff]  }
 0x38b   : > { %v3966_v15 = vpop.eup %3965  ;;  %2587 = vmatmul.mubr.bf16.gmra.mrb[20].mxu0 %v2089_v35  ;;  %3985 = vpow2.f32 %v5740_v36  ;;  %v3355_v28 = vmul.f32 -1.442695, %v5779_v50  ;;  %v1487_v58 = vmul.f32 %v6667_v5, %v1387_v45  ;;  %v5794_v53 = vadd.f32 %v6668_v4, %v1483_v32  ;;  %v6684_v35 = vld [vmem:[#allocation37_spill] sm:$0xff]  ;;  %v6688_v32 = vld [vmem:[#allocation47_spill] sm:$0xff] }
 0x38c   : > { %v3968_v59 = vpop.eup %3967  ;;  %2596 = vmatprep.mubr.bf16.mxu0 %v2094_v1  ;;  %v2093_v30 = vpack.c.bf16 %v2057_v27, %v2053_v8  ;;  %v5797_v2 = vmul.f32 %v3964_v40, %v5656_v24  ;;  %2644 = vmatpush1.bf16.msra.mxu0 %v3798_v38  ;;  %v5800_v62 = vmul.f32 %v3966_v15, %v6683_v11  ;;  %3987 = vpow2.f32 %v5752_v29  ;;  %v6686_v1 = vld [vmem:[#allocation59_spill] sm:$0xff]  ;;  %v6689_v8 = vld [vmem:[#allocation22_spill] sm:$0xff] }
 0x38d   : > { %v3970_v36 = vpop.eup %3969  ;;  %2645 = vmatprep.subr.bf16.mxu0 %v3803_v61  ;;  %v5804_v19 = vmul.f32 %v3968_v59, %v6684_v35  ;;  %3989 = vpow2.f32 %v3351_v18  ;;  %v3359_v52 = vmul.f32 -1.442695, %v5788_v33  ;;  %v5808_v47 = vadd.f32 %v6668_v4, %v1487_v58 }
 0x38e   : > { %v3972_v24 = vpop.eup %3971  ;;  %v1815_v13 = vadd.f32 1.0, %v3970_v36  ;;  %3991 = vpow2.f32 %v3346_v25  ;;  %v1392_v20 = vmul.f32 %v6686_v1, %v6685_v49  ;;  %v1396_v29 = vmul.f32 %v5527_v37, %v6687_v12 }
 0x38f   : > { %v3974_v63 = vpop.eup %3973  ;;  %v2072_v56 = vpack.c.bf16 %v5804_v19, %v5800_v62  ;;  %v1819_v38 = vadd.f32 1.0, %v3972_v24  ;;  %3993 = vpow2.f32 %v3350_v57  ;;  %v3354_v18 = vmul.f32 -1.442695, %v5794_v53 }
 0x390   : > { %v3976_v17 = vpop.eup %3975  ;;  %2646 = vmatpush1.bf16.msra.mxu0 %v3801_v21  ;;  %3995 = vrcp.f32 %v1815_v13  ;;  %v1824_v31 = vadd.f32 1.0, %v3974_v63  ;;  %v1492_v25 = vmul.f32 %v5352_v3, %v1392_v20  ;;  %v1496_v61 = vmul.f32 %v5352_v3, %v1396_v29  ;;  %v6690_v29 = vld [vmem:[#allocation25_spill] sm:$0xff] }
 0x391   : > { %v3978_v43 = vpop.eup %3977  ;;  %2647 = vmatprep.subr.bf16.mxu0 %v3806_v46  ;;  %3997 = vrcp.f32 %v1819_v38  ;;  %v1828_v45 = vadd.f32 1.0, %v3976_v17  ;;  %v1391_v40 = vmul.f32 %v6686_v1, %v6688_v32  ;;  %v1395_v57 = vmul.f32 %v5527_v37, %v6689_v8  ;;  %v6692_v32 = vld [vmem:[#allocation24_spill] sm:$0xff] }
 0x392   : > { %v3980_v27 = vpop.eup %3979  ;;  %3999 = vrcp.f32 %v1824_v31  ;;  %v1823_v15 = vadd.f32 1.0, %v3978_v43  ;;  %v5824_v58 = vadd.f32 %v6666_v39, %v1492_v25  ;;  %v5827_v59 = vadd.f32 %v6666_v39, %v1496_v61  ;;  %v6691_v25 = vld [vmem:[#allocation27_spill] sm:$0xff] }
 0x393   : > { %v3982_v21 = vpop.eup %3981  ;;  %2597 = vmatmul.mubr.bf16.gmra.mrb[24].mxu0 %v2093_v30  ;;  %v2066_v11 = vmul.f32 %v3980_v27, %v5659_v41  ;;  %4001 = vrcp.f32 %v1828_v45  ;;  %v1491_v36 = vmul.f32 %v6667_v5, %v1391_v40  ;;  %v1495_v35 = vmul.f32 %v6667_v5, %v1395_v57  ;;  %v6693_v27 = vld [vmem:[#allocation26_spill] sm:$0xff] }
 0x394   : > { %v3984_v46 = vpop.eup %3983  ;;  %v2061_v37 = vmul.f32 %v3982_v21, %v5673_v54  ;;  %2648 = vmatpush1.bf16.msra.mxu0 %v3804_v16  ;;  %4003 = vrcp.f32 %v1823_v15  ;;  %v3358_v24 = vmul.f32 -1.442695, %v5808_v47  ;;  %v3363_v13 = vmul.f32 -1.442695, %v5824_v58 }
 0x395   : > { %v3986_v49 = vpop.eup %3985  ;;  %v2098_v1 = vpack.c.bf16 %v2066_v11, %v5797_v2  ;;  %v2065_v30 = vmul.f32 %v3984_v46, %v5680_v6  ;;  %4005 = vpow2.f32 %v3355_v28  ;;  %v5838_v41 = vadd.f32 %v6668_v4, %v1491_v36  ;;  %v6694_v11 = vld [vmem:[#allocation53_spill] sm:$0xff] }
 0x396   : > { %v3988_v20 = vpop.eup %3987  ;;  %v1827_v12 = vadd.f32 1.0, %v3986_v49  ;;  %4007 = vpow2.f32 %v3359_v52  ;;  %v3367_v54 = vmul.f32 -1.442695, %v5827_v59  ;;  %v1400_v63 = vmul.f32 %v5543_v60, %v6690_v29 }
 0x397   : > { %v3990_v38 = vpop.eup %3989  ;;  %2606 = vmatprep.mubr.bf16.mxu0 %v2098_v1  ;;  %v2097_v17 = vpack.c.bf16 %v2065_v30, %v2061_v37  ;;  %v1832_v16 = vadd.f32 1.0, %v3988_v20  ;;  %4009 = vpow2.f32 %v3354_v18  ;;  %v5844_v2 = vadd.f32 %v6668_v4, %v1495_v35 }
 0x398   : > { %v3992_v6 = vpop.eup %3991  ;;  %4011 = vrcp.f32 %v1827_v12  ;;  %v1836_v28 = vadd.f32 1.0, %v3990_v38  ;;  %v3362_v31 = vmul.f32 -1.442695, %v5838_v41  ;;  %v1404_v52 = vmul.f32 %v5559_v34, %v6691_v25 }
 0x399   : > { %v3994_v61 = vpop.eup %3993  ;;  %4013 = vrcp.f32 %v1832_v16  ;;  %v1831_v43 = vadd.f32 1.0, %v3992_v6  ;;  %v1500_v45 = vmul.f32 %v5352_v3, %v1400_v63  ;;  %v1399_v40 = vmul.f32 %v5543_v60, %v6692_v32  ;;  %v6695_v6 = vld [vmem:[#allocation29_spill] sm:$0xff] }
 0x39a   : > { %v3996_v18 = vpop.eup %3995  ;;  %4015 = vrcp.f32 %v1836_v28  ;;  %v1835_v8 = vadd.f32 1.0, %v3994_v61  ;;  %v1504_v57 = vmul.f32 %v5352_v3, %v1404_v52  ;;  %v1403_v15 = vmul.f32 %v5559_v34, %v6693_v27  ;;  %v6696_v52 = vld [vmem:[#allocation31_spill] sm:$0xff] }
 0x39b   : > { %v3998_v21 = vpop.eup %3997  ;;  %2607 = vmatmul.mubr.bf16.gmra.mrb[28].mxu0 %v2097_v17  ;;  %v2007_v36 = vmul.f32 %v3996_v18, %v6694_v11  ;;  %4017 = vrcp.f32 %v1831_v43  ;;  %v5857_v35 = vadd.f32 %v6666_v39, %v1500_v45  ;;  %v1499_v46 = vmul.f32 %v6667_v5, %v1399_v40  ;;  %v6697_v45 = vld [vmem:[#allocation28_spill] sm:$0xff] }
 0x39c   : > { %v4000_v37 = vpop.eup %3999  ;;  %2649 = vmatprep.mubr.bf16.mxu0 %v2072_v56  ;;  %v2011_v60 = vmul.f32 %v3998_v21, %v5448_v44  ;;  %4019 = vrcp.f32 %v1835_v8  ;;  %v5865_v34 = vadd.f32 %v6666_v39, %v1504_v57  ;;  %v1503_v49 = vmul.f32 %v6667_v5, %v1403_v15  ;;  %v6698_v8 = vld [vmem:[#allocation30_spill] sm:$0xff] }
 0x39d   : > { %v4002_v1 = vpop.eup %4001  ;;  %v2016_v30 = vmul.f32 %v4000_v37, %v5697_v10  ;;  %4021 = vpow2.f32 %v3358_v24  ;;  %v3366_v20 = vmul.f32 -1.442695, %v5844_v2  ;;  %v5871_v12 = vadd.f32 %v6668_v4, %v1499_v46 }
 0x39e   : > { %v4004_v29 = vpop.eup %4003  ;;  %v2071_v62 = vpack.c.bf16 %v2011_v60, %v2007_v36  ;;  %v2020_v19 = vmul.f32 %v4002_v1, %v5703_v42  ;;  %4023 = vpow2.f32 %v3363_v13  ;;  %v3371_v44 = vmul.f32 -1.442695, %v5857_v35 }
 0x39f   : > { %v4006_v56 = vpop.eup %4005  ;;  %v2015_v63 = vmul.f32 %v4004_v29, %v5710_v7  ;;  %4025 = vpow2.f32 %v3367_v54  ;;  %v3375_v38 = vmul.f32 -1.442695, %v5865_v34  ;;  %v5878_v10 = vadd.f32 %v6668_v4, %v1503_v49 }
 0x3a0   : > { %v4008_v24 = vpop.eup %4007  ;;  %v2076_v17 = vpack.c.bf16 %v2020_v19, %v2016_v30  ;;  %v1840_v16 = vadd.f32 1.0, %v4006_v56  ;;  %4027 = vpow2.f32 %v3362_v31  ;;  %v1408_v28 = vmul.f32 %v5580_v23, %v6695_v6 }
 0x3a1   : > { %v4010_v42 = vpop.eup %4009  ;;  %v1844_v13 = vadd.f32 1.0, %v4008_v24  ;;  %4029 = vpow2.f32 %v3366_v20  ;;  %v3370_v25 = vmul.f32 -1.442695, %v5871_v12  ;;  %v1412_v7 = vmul.f32 %v5595_v22, %v6696_v52 }
 0x3a2   : > { %v4012_v54 = vpop.eup %4011  ;;  %4031 = vrcp.f32 %v1840_v16  ;;  %v1839_v61 = vadd.f32 1.0, %v4010_v42  ;;  %v1508_v43 = vmul.f32 %v5352_v3, %v1408_v28  ;;  %v1407_v32 = vmul.f32 %v5580_v23, %v6697_v45  ;;  %v6700_v42 = vld [vmem:[#allocation49_spill] sm:$0xff] }
 0x3a3   : > { %v4014_v31 = vpop.eup %4013  ;;  %2650 = vmatmul.mubr.bf16.vlgmr.msra.gmra.mrb[0].mxu0 %v2071_v62  ;;  %v2019_v40 = vmul.f32 %v4012_v54, %v5714_v14  ;;  %4033 = vrcp.f32 %v1844_v13  ;;  %v1512_v18 = vmul.f32 %v5352_v3, %v1412_v7  ;;  %v1411_v57 = vmul.f32 %v5595_v22, %v6698_v8  ;;  %v6701_v54 = vld [vmem:[#allocation32_spill] sm:$0xff] }
 0x3a4   : > { %v4016_v27 = vpop.eup %4015  ;;  %2659 = vmatprep.mubr.bf16.mxu0 %v2076_v17  ;;  %4035 = vrcp.f32 %v1839_v61  ;;  %v3374_v15 = vmul.f32 -1.442695, %v5878_v10  ;;  %v5894_v21 = vadd.f32 %v6666_v39, %v1508_v43  ;;  %v1507_v23 = vmul.f32 %v6667_v5, %v1407_v32  ;;  %v6702_v43 = vld [vmem:[#allocation34_spill] sm:$0xff] }
 0x3a5   : > { %v4018_v11 = vpop.eup %4017  ;;  %v2075_v36 = vpack.c.bf16 %v2019_v40, %v2015_v63  ;;  %v2024_v14 = vmul.f32 %v4014_v31, %v5736_v0  ;;  %v2028_v46 = vmul.f32 %v4016_v27, %v5743_v9  ;;  %4037 = vpow2.f32 %v3371_v44 }
 0x3a6   : > { %v4020_v37 = vpop.eup %4019  ;;  %4039 = vpow2.f32 %v3375_v38  ;;  %v5900_v22 = vadd.f32 %v6666_v39, %v1512_v18  ;;  %v3379_v60 = vmul.f32 -1.442695, %v5894_v21  ;;  %v1511_v49 = vmul.f32 %v6667_v5, %v1411_v57  ;;  %v6699_v38 = vld [vmem:[#allocation33_spill] sm:$0xff] }
 0x3a7   : > { %v4022_v1 = vpop.eup %4021  ;;  %v2080_v30 = vpack.c.bf16 %v2028_v46, %v2024_v14  ;;  %v2023_v20 = vmul.f32 %v4018_v11, %v5755_v48  ;;  %v2027_v29 = vmul.f32 %v4020_v37, %v5763_v51  ;;  %4041 = vpow2.f32 %v3370_v25 }
 0x3a8   : > { %v4024_v0 = vpop.eup %4023  ;;  %v1843_v62 = vadd.f32 1.0, %v4022_v1  ;;  %4043 = vpow2.f32 %v3374_v15  ;;  %v5907_v9 = vadd.f32 %v6668_v4, %v1507_v23  ;;  %v5910_v19 = vadd.f32 %v6668_v4, %v1511_v49 }
 0x3a9   : > { %v4026_v44 = vpop.eup %4025  ;;  %v2079_v56 = vpack.c.bf16 %v2027_v29, %v2023_v20  ;;  %v1848_v63 = vadd.f32 1.0, %v4024_v0  ;;  %4045 = vpow2.f32 %v3379_v60  ;;  %v1416_v24 = vmul.f32 %v5619_v26, %v6699_v38 }
 0x3aa   : > { %v4028_v48 = vpop.eup %4027  ;;  %4047 = vrcp.f32 %v1843_v62  ;;  %v1852_v51 = vadd.f32 1.0, %v4026_v44  ;;  %v3383_v17 = vmul.f32 -1.442695, %v5900_v22  ;;  %v3378_v16 = vmul.f32 -1.442695, %v5907_v9 }
 0x3ab   : > { %v4030_v6 = vpop.eup %4029  ;;  %2660 = vmatmul.mubr.bf16.gmra.mrb[4].mxu0 %v2075_v36  ;;  %4049 = vrcp.f32 %v1848_v63  ;;  %v1847_v28 = vadd.f32 1.0, %v4028_v48  ;;  %v1420_v13 = vmul.f32 %v5631_v55, %v6700_v42  ;;  %v1516_v25 = vmul.f32 %v5352_v3, %v1416_v24 }
 0x3ac   : > { %v4032_v52 = vpop.eup %4031  ;;  %2669 = vmatprep.mubr.bf16.mxu0 %v2080_v30  ;;  %4051 = vrcp.f32 %v1852_v51  ;;  %v1851_v7 = vadd.f32 1.0, %v4030_v6  ;;  %v1415_v61 = vmul.f32 %v5619_v26, %v6701_v54  ;;  %v1419_v45 = vmul.f32 %v5631_v55, %v6702_v43 }
 0x3ad   : > { %v4034_v32 = vpop.eup %4033  ;;  %4053 = vrcp.f32 %v1847_v28  ;;  %v3382_v31 = vmul.f32 -1.442695, %v5910_v19  ;;  %v1520_v40 = vmul.f32 %v5352_v3, %v1420_v13  ;;  %v5929_v26 = vadd.f32 %v6666_v39, %v1516_v25 }
 0x3ae   : > { %v4036_v18 = vpop.eup %4035  ;;  %v2036_v8 = vmul.f32 %v4034_v32, %v5788_v33  ;;  %4055 = vrcp.f32 %v1851_v7  ;;  %v1515_v57 = vmul.f32 %v6667_v5, %v1415_v61  ;;  %v1519_v27 = vmul.f32 %v6667_v5, %v1419_v45 }
 0x3af   : > { %v4038_v15 = vpop.eup %4037  ;;  %4057 = vpow2.f32 %v3383_v17  ;;  %v2032_v23 = vmul.f32 %v4032_v52, %v5779_v50  ;;  %v5933_v3 = vadd.f32 %v6666_v39, %v1520_v40  ;;  %v3387_v39 = vmul.f32 -1.442695, %v5929_v26 }
 0x3b0   : > { %v4040_v55 = vpop.eup %4039  ;;  %v1856_v11 = vadd.f32 1.0, %v4038_v15  ;;  %4059 = vpow2.f32 %v3378_v16  ;;  %v5936_v14 = vadd.f32 %v6668_v4, %v1515_v57  ;;  %v5939_v60 = vadd.f32 %v6668_v4, %v1519_v27 }
 0x3b1   : > { %v4042_v36 = vpop.eup %4041  ;;  %v1860_v33 = vadd.f32 1.0, %v4040_v55  ;;  %4061 = vpow2.f32 %v3382_v31  ;;  %v2084_v46 = vpack.c.bf16 %v2036_v8, %v2032_v23  ;;  %v3391_v30 = vmul.f32 -1.442695, %v5933_v3 }
 0x3b2   : > { %v4044_v5 = vpop.eup %4043  ;;  %4063 = vrcp.f32 %v1856_v11  ;;  %v1855_v37 = vadd.f32 1.0, %v4042_v36  ;;  %v3386_v0 = vmul.f32 -1.442695, %v5936_v14  ;;  %v3390_v4 = vmul.f32 -1.442695, %v5939_v60 }
 0x3b3   : > { %v4046_v49 = vpop.eup %4045  ;;  %2670 = vmatmul.mubr.bf16.gmra.mrb[8].mxu0 %v2079_v56  ;;  %4065 = vrcp.f32 %v1860_v33  ;;  %v1859_v50 = vadd.f32 1.0, %v4044_v5  ;;  %v2031_v56 = vmul.f32 %v4036_v18, %v5794_v53 }
 0x3b4   : > { %v4048_v1 = vpop.eup %4047  ;;  %2679 = vmatprep.mubr.bf16.mxu0 %v2084_v46  ;;  %4067 = vrcp.f32 %v1855_v37  ;;  %v1864_v38 = vadd.f32 1.0, %v4046_v49 }
 0x3b5   : > { %v4050_v20 = vpop.eup %4049  ;;  %v2035_v29 = vmul.f32 %v4048_v1, %v5808_v47  ;;  %4069 = vrcp.f32 %v1859_v50 }
 0x3b6   : > { %v4052_v62 = vpop.eup %4051  ;;  %4071 = vpow2.f32 %v3387_v39  ;;  %v2040_v48 = vmul.f32 %v4050_v20, %v5824_v58 }
 0x3b7   : > { %v4054_v44 = vpop.eup %4053  ;;  %v2044_v63 = vmul.f32 %v4052_v62, %v5827_v59  ;;  %4073 = vpow2.f32 %v3391_v30  ;;  %v2083_v47 = vpack.c.bf16 %v2035_v29, %v2031_v56 }
 0x3b8   : > { %v4056_v24 = vpop.eup %4055  ;;  %4075 = vpow2.f32 %v3386_v0  ;;  %v2039_v7 = vmul.f32 %v4054_v44, %v5838_v41 }
 0x3b9   : > { %v4058_v51 = vpop.eup %4057  ;;  %v2088_v16 = vpack.c.bf16 %v2044_v63, %v2040_v48  ;;  %4077 = vpow2.f32 %v3390_v4  ;;  %v2043_v13 = vmul.f32 %v4056_v24, %v5844_v2 }
 0x3ba   : > { %v4060_v17 = vpop.eup %4059  ;;  %v1868_v6 = vadd.f32 1.0, %v4058_v51  ;;  %4079 = vrcp.f32 %v1864_v38 }
 0x3bb   : > { %v4062_v28 = vpop.eup %4061  ;;  %2680 = vmatmul.mubr.bf16.gmra.mrb[12].mxu0 %v2083_v47  ;;  %v1863_v25 = vadd.f32 1.0, %v4060_v17  ;;  %v2087_v45 = vpack.c.bf16 %v2043_v13, %v2039_v7 }
 0x3bc   : > { %v4064_v42 = vpop.eup %4063  ;;  %2689 = vmatprep.mubr.bf16.mxu0 %v2088_v16  ;;  %4081 = vrcp.f32 %v1868_v6  ;;  %v1867_v53 = vadd.f32 1.0, %v4062_v28 }
 0x3bd   : > { %v4066_v59 = vpop.eup %4065  ;;  %v2048_v61 = vmul.f32 %v4064_v42, %v5857_v35 }
 0x3be   : > { %v2052_v58 = vmul.f32 %v4066_v59, %v5865_v34  ;;  %v4068_v52 = vpop.eup %4067  ;;  %4083 = vrcp.f32 %v1867_v53 }
 0x3bf   : > { %v4070_v54 = vpop.eup %4069  ;;  %4085 = vrcp.f32 %v1863_v25  ;;  %v2047_v15 = vmul.f32 %v4068_v52, %v5871_v12 }
 0x3c0   : > { %v4072_v43 = vpop.eup %4071  ;;  %v2092_v31 = vpack.c.bf16 %v2052_v58, %v2048_v61  ;;  %v2051_v57 = vmul.f32 %v4070_v54, %v5878_v10 }
 0x3c1   : > { %v4074_v32 = vpop.eup %4073  ;;  %v1872_v40 = vadd.f32 1.0, %v4072_v43 }
 0x3c2   : > { %v4076_v18 = vpop.eup %4075  ;;  %v1876_v8 = vadd.f32 1.0, %v4074_v32  ;;  %v2091_v11 = vpack.c.bf16 %v2051_v57, %v2047_v15 }
 0x3c3   : > { %2690 = vmatmul.mubr.bf16.gmra.mrb[16].mxu0 %v2087_v45  ;;  %v4078_v2 = vpop.eup %4077  ;;  %4087 = vrcp.f32 %v1872_v40  ;;  %v1871_v35 = vadd.f32 1.0, %v4076_v18 }
 0x3c4   : > { %2699 = vmatprep.mubr.bf16.mxu0 %v2092_v31  ;;  %v4080_v34 = vpop.eup %4079  ;;  %4089 = vrcp.f32 %v1876_v8  ;;  %v1875_v41 = vadd.f32 1.0, %v4078_v2 }
 0x3c5   : > { %v2056_v23 = vmul.f32 %v4080_v34, %v5894_v21 }
 0x3c6   : > { %v4082_v27 = vpop.eup %4081  ;;  %4091 = vrcp.f32 %v1875_v41 }
 0x3c7   : > { %v2060_v55 = vmul.f32 %v4082_v27, %v5900_v22  ;;  %4093 = vrcp.f32 %v1871_v35 }
 0x3c8   : > { %v4084_v36 = vpop.eup %4083 }
 0x3c9   : > { %v2096_v33 = vpack.c.bf16 %v2060_v55, %v2056_v23  ;;  %v4086_v5 = vpop.eup %4085  ;;  %v2059_v10 = vmul.f32 %v4084_v36, %v5910_v19  ;;  %v6703_v19 = vld [vmem:[#allocation18_spill] sm:$0xff] }
 0x3ca   : > { %v2055_v49 = vmul.f32 %v4086_v5, %v5907_v9  ;;  %v5966_v9 = vld [vmem:[%s6485_s4] sm:$0x77] }
 0x3cb   : > { %2700 = vmatmul.mubr.bf16.gmra.mrb[20].mxu0 %v2091_v11 }
 0x3cc   : > { %2709 = vmatprep.mubr.bf16.mxu0 %v2096_v33  ;;  %v2095_v50 = vpack.c.bf16 %v2059_v10, %v2055_v49 }
 0x3cd   : > { %v4088_v46 = vpop.eup %4087 }
 0x3ce   : > { %v4090_v37 = vpop.eup %4089  ;;  %v2064_v12 = vmul.f32 %v4088_v46, %v5929_v26  ;;  %v2169_v26 = vrot.slane %v5966_v9, %v6703_v19 }
 0x3cf   : > { %v2068_v22 = vmul.f32 %v4090_v37, %v5933_v3  ;;  %v6704_v3 = vld [vmem:[#allocation19_spill] sm:$0xff] }
 0x3d0   : > { %v4092_v21 = vpop.eup %4091  ;;  %v2173_v0 = vrot.slane %v5966_v9, %v6704_v3  ;;  %v5973_v62 = vrot.slane %v2169_v26, %v6703_v19 }
 0x3d1   : > { %v2100_v39 = vpack.c.bf16 %v2068_v22, %v2064_v12  ;;  %v4094_v1 = vpop.eup %4093  ;;  %v2067_v30 = vmul.f32 %v4092_v21, %v5939_v60 }
 0x3d2   : > { %v2063_v20 = vmul.f32 %v4094_v1, %v5936_v14  ;;  %v5976_v60 = vrot.slane %v2173_v0, %v6703_v19 }
 0x3d3   : > { %2710 = vmatmul.mubr.bf16.gmra.mrb[24].mxu0 %v2095_v50 }
 0x3d4   : > { %2719 = vmatprep.mubr.bf16.mxu0 %v2100_v39  ;;  %v2099_v29 = vpack.c.bf16 %v2067_v30, %v2063_v20 }
 0x3db   : > { %2720 = vmatmul.mubr.bf16.gmra.mrb[28].mxu0 %v2099_v29 }
 0x476   : > { %v2651_v14 = vpop.f32.mrb[0].mxu0 }
 0x477   : > { %v5979_v4 = vadd.f32 %v2651_v14, %v5973_v62  ;;  %v2653_v44 = vpop.f32.mrb[1].mxu0 }
 0x478   : > { %v5982_v56 = vadd.f32 %v2653_v44, %v5976_v60  ;;  %v2655_v63 = vpop.f32.mrb[2].mxu0 }
 0x479   : > { %v5985_v38 = vadd.f32 %v2655_v63, %v5973_v62  ;;  %v2657_v24 = vpop.f32.mrb[3].mxu0 }
 0x47a   : > { %v5988_v48 = vadd.f32 %v2657_v24, %v5976_v60  ;;  %v2730_v51 = vadd.f32 %v5982_v56, %v5979_v4 }
 0x47c   : > { %2731 = vadd.xlane.f32.xlu0 %v2730_v51  ;;  %v2733_v47 = vadd.f32 %v5988_v48, %v5985_v38 }
 0x47e   : > { %v2661_v17 = vpop.f32.mrb[4].mxu0  ;;  %2734 = vadd.xlane.f32.xlu1 %v2733_v47 }
 0x47f   : > { %v5995_v16 = vadd.f32 %v2661_v17, %v5973_v62  ;;  %v2663_v6 = vpop.f32.mrb[5].mxu0 }
 0x480   : > { %v5998_v28 = vadd.f32 %v2663_v6, %v5976_v60  ;;  %v2665_v42 = vpop.f32.mrb[6].mxu0 }
 0x481   : > { %v6001_v53 = vadd.f32 %v2665_v42, %v5973_v62  ;;  %v2667_v59 = vpop.f32.mrb[7].mxu0 }
 0x482   : > { %v6004_v13 = vadd.f32 %v2667_v59, %v5976_v60  ;;  %v2736_v58 = vadd.f32 %v5998_v28, %v5995_v16 }
 0x484   : > { %2737 = vadd.xlane.f32.xlu0 %v2736_v58  ;;  %v2739_v25 = vadd.f32 %v6004_v13, %v6001_v53 }
 0x486   : > { %v2671_v52 = vpop.f32.mrb[8].mxu0  ;;  %2740 = vadd.xlane.f32.xlu1 %v2739_v25 }
 0x487   : > { %v6011_v7 = vadd.f32 %v2671_v52, %v5973_v62  ;;  %v2673_v54 = vpop.f32.mrb[9].mxu0 }
 0x488   : > { %v6014_v61 = vadd.f32 %v2673_v54, %v5976_v60  ;;  %v2675_v43 = vpop.f32.mrb[10].mxu0 }
 0x489   : > { %v6017_v45 = vadd.f32 %v2675_v43, %v5973_v62  ;;  %v2677_v32 = vpop.f32.mrb[11].mxu0 }
 0x48a   : > { %v6020_v31 = vadd.f32 %v2677_v32, %v5976_v60  ;;  %v2742_v40 = vadd.f32 %v6014_v61, %v6011_v7 }
 0x48c   : > { %2743 = vadd.xlane.f32.xlu0 %v2742_v40  ;;  %v2745_v18 = vadd.f32 %v6020_v31, %v6017_v45 }
 0x48e   : > { %v2681_v8 = vpop.f32.mrb[12].mxu0  ;;  %2746 = vadd.xlane.f32.xlu1 %v2745_v18 }
 0x48f   : > { %v6027_v2 = vadd.f32 %v2681_v8, %v5973_v62  ;;  %v2683_v34 = vpop.f32.mrb[13].mxu0 }
 0x490   : > { %v6030_v57 = vadd.f32 %v2683_v34, %v5976_v60  ;;  %v2685_v41 = vpop.f32.mrb[14].mxu0 }
 0x491   : > { %v6033_v27 = vadd.f32 %v2685_v41, %v5973_v62  ;;  %v2687_v35 = vpop.f32.mrb[15].mxu0 }
 0x492   : > { %v6036_v15 = vadd.f32 %v2687_v35, %v5976_v60  ;;  %v2748_v55 = vadd.f32 %v6030_v57, %v6027_v2 }
 0x494   : > { %2749 = vadd.xlane.f32.xlu0 %v2748_v55  ;;  %v2751_v23 = vadd.f32 %v6036_v15, %v6033_v27 }
 0x496   : > { %v2691_v11 = vpop.f32.mrb[16].mxu0  ;;  %2752 = vadd.xlane.f32.xlu1 %v2751_v23 }
 0x497   : > { %v6043_v36 = vadd.f32 %v2691_v11, %v5973_v62  ;;  %v2693_v33 = vpop.f32.mrb[17].mxu0 }
 0x498   : > { %v6046_v5 = vadd.f32 %v2693_v33, %v5976_v60  ;;  %v2695_v10 = vpop.f32.mrb[18].mxu0 }
 0x499   : > { %v6049_v46 = vadd.f32 %v2695_v10, %v5973_v62  ;;  %v2697_v37 = vpop.f32.mrb[19].mxu0 }
 0x49a   : > { %v6052_v49 = vadd.f32 %v2697_v37, %v5976_v60  ;;  %v2754_v12 = vadd.f32 %v6046_v5, %v6043_v36 }
 0x49c   : > { %2755 = vadd.xlane.f32.xlu0 %v2754_v12  ;;  %v2757_v22 = vadd.f32 %v6052_v49, %v6049_v46 }
 0x49e   : > { %v2701_v50 = vpop.f32.mrb[20].mxu0  ;;  %2758 = vadd.xlane.f32.xlu1 %v2757_v22 }
 0x49f   : > { %v6059_v21 = vadd.f32 %v2701_v50, %v5973_v62  ;;  %v2703_v39 = vpop.f32.mrb[21].mxu0 }
 0x4a0   : > { %v6062_v1 = vadd.f32 %v2703_v39, %v5976_v60  ;;  %v2705_v30 = vpop.f32.mrb[22].mxu0 }
 0x4a1   : > { %v6065_v20 = vadd.f32 %v2705_v30, %v5973_v62  ;;  %v2707_v29 = vpop.f32.mrb[23].mxu0 }
 0x4a2   : > { %v6068_v19 = vadd.f32 %v2707_v29, %v5976_v60  ;;  %v2760_v26 = vadd.f32 %v6062_v1, %v6059_v21 }
 0x4a4   : > { %2761 = vadd.xlane.f32.xlu0 %v2760_v26  ;;  %v2763_v3 = vadd.f32 %v6068_v19, %v6065_v20 }
 0x4a6   : > { %v2711_v0 = vpop.f32.mrb[24].mxu0  ;;  %2764 = vadd.xlane.f32.xlu1 %v2763_v3 }
 0x4a7   : > { %v6075_v14 = vadd.f32 %v2711_v0, %v5973_v62  ;;  %v2713_v44 = vpop.f32.mrb[25].mxu0 }
 0x4a8   : > { %v6078_v63 = vadd.f32 %v2713_v44, %v5976_v60  ;;  %v2715_v24 = vpop.f32.mrb[26].mxu0 }
 0x4a9   : > { %v6081_v51 = vadd.f32 %v2715_v24, %v5973_v62  ;;  %v2717_v47 = vpop.f32.mrb[27].mxu0 }
 0x4aa   : > { %v6084_v17 = vadd.f32 %v2717_v47, %v5976_v60  ;;  %v2766_v6 = vadd.f32 %v6078_v63, %v6075_v14 }
 0x4ac   : > { %2767 = vadd.xlane.f32.xlu0 %v2766_v6  ;;  %v2769_v42 = vadd.f32 %v6084_v17, %v6081_v51 }
 0x4ae   : > { %v2721_v59 = vpop.f32.mrb[28].mxu0  ;;  %2770 = vadd.xlane.f32.xlu1 %v2769_v42 }
 0x4af   : > { %v6091_v58 = vadd.f32 %v2721_v59, %v5973_v62  ;;  %v2723_v25 = vpop.f32.mrb[29].mxu0 }
 0x4b0   : > { %v6094_v52 = vadd.f32 %v2723_v25, %v5976_v60  ;;  %v2725_v54 = vpop.f32.mrb[30].mxu0 }
 0x4b1   : > { %v6097_v43 = vadd.f32 %v2725_v54, %v5973_v62  ;;  %v2727_v32 = vpop.f32.mrb[31].mxu0 }
 0x4b2   : > { %v6100_v40 = vadd.f32 %v2727_v32, %v5976_v60  ;;  %v2772_v18 = vadd.f32 %v6094_v52, %v6091_v58 }
 0x4b4   : > { %2773 = vadd.xlane.f32.xlu0 %v2772_v18  ;;  %v2775_v8 = vadd.f32 %v6100_v40, %v6097_v43 }
 0x4b6   : > { %2776 = vadd.xlane.f32.xlu1 %v2775_v8 }
 0x509   : > { %v2732_v34 = vpop.xlane.xlu0 %2731 }
 0x50a   : > { %v2779_v41 = vmul.f32 0.00390625, %v2732_v34 }
 0x50b   : > { %v2735_v35 = vpop.xlane.xlu1 %2734 }
 0x50c   : > { %v6107_v55 = vsub.f32 %v5979_v4, %v2779_v41  ;;  %v6110_v62 = vsub.f32 %v5982_v56, %v2779_v41  ;;  %v2780_v23 = vmul.f32 0.00390625, %v2735_v35 }
 0x50e   : > { %v6113_v60 = vsub.f32 %v5985_v38, %v2780_v23  ;;  %v6116_v11 = vsub.f32 %v5988_v48, %v2780_v23  ;;  %v2827_v33 = vmul.f32 %v6107_v55, %v6107_v55  ;;  %v2828_v10 = vmul.f32 %v6110_v62, %v6110_v62 }
 0x510   : > { %v2859_v37 = vadd.f32 %v2828_v10, %v2827_v33  ;;  %v2829_v4 = vmul.f32 %v6113_v60, %v6113_v60  ;;  %v2830_v56 = vmul.f32 %v6116_v11, %v6116_v11 }
 0x511   : > { %v2738_v12 = vpop.xlane.xlu0 %2737 }
 0x512   : > { %v2781_v22 = vmul.f32 0.00390625, %v2738_v12  ;;  %2860 = vadd.xlane.f32.xlu0 %v2859_v37  ;;  %v2862_v38 = vadd.f32 %v2830_v56, %v2829_v4 }
 0x513   : > { %v2741_v50 = vpop.xlane.xlu1 %2740 }
 0x514   : > { %v6127_v48 = vsub.f32 %v5995_v16, %v2781_v22  ;;  %v6130_v39 = vsub.f32 %v5998_v28, %v2781_v22  ;;  %v2782_v30 = vmul.f32 0.00390625, %v2741_v50  ;;  %2863 = vadd.xlane.f32.xlu1 %v2862_v38 }
 0x516   : > { %v6133_v29 = vsub.f32 %v6001_v53, %v2782_v30  ;;  %v6136_v26 = vsub.f32 %v6004_v13, %v2782_v30  ;;  %v2831_v3 = vmul.f32 %v6127_v48, %v6127_v48  ;;  %v2832_v0 = vmul.f32 %v6130_v39, %v6130_v39 }
 0x518   : > { %v2865_v44 = vadd.f32 %v2832_v0, %v2831_v3  ;;  %v2833_v16 = vmul.f32 %v6133_v29, %v6133_v29  ;;  %v2834_v28 = vmul.f32 %v6136_v26, %v6136_v26 }
 0x519   : > { %v2744_v24 = vpop.xlane.xlu0 %2743 }
 0x51a   : > { %v2783_v47 = vmul.f32 0.00390625, %v2744_v24  ;;  %2866 = vadd.xlane.f32.xlu0 %v2865_v44  ;;  %v2868_v53 = vadd.f32 %v2834_v28, %v2833_v16 }
 0x51b   : > { %v2747_v6 = vpop.xlane.xlu1 %2746 }
 0x51c   : > { %v6147_v13 = vsub.f32 %v6011_v7, %v2783_v47  ;;  %v6150_v42 = vsub.f32 %v6014_v61, %v2783_v47  ;;  %v2784_v59 = vmul.f32 0.00390625, %v2747_v6  ;;  %2869 = vadd.xlane.f32.xlu1 %v2868_v53 }
 0x51e   : > { %v6153_v25 = vsub.f32 %v6017_v45, %v2784_v59  ;;  %v6156_v54 = vsub.f32 %v6020_v31, %v2784_v59  ;;  %v2835_v32 = vmul.f32 %v6147_v13, %v6147_v13  ;;  %v2836_v18 = vmul.f32 %v6150_v42, %v6150_v42 }
 0x520   : > { %v2871_v8 = vadd.f32 %v2836_v18, %v2835_v32  ;;  %v2837_v7 = vmul.f32 %v6153_v25, %v6153_v25  ;;  %v2838_v61 = vmul.f32 %v6156_v54, %v6156_v54 }
 0x521   : > { %v2750_v34 = vpop.xlane.xlu0 %2749 }
 0x522   : > { %v2785_v41 = vmul.f32 0.00390625, %v2750_v34  ;;  %2872 = vadd.xlane.f32.xlu0 %v2871_v8  ;;  %v2874_v45 = vadd.f32 %v2838_v61, %v2837_v7 }
 0x523   : > { %v2753_v35 = vpop.xlane.xlu1 %2752 }
 0x524   : > { %v6167_v31 = vsub.f32 %v6027_v2, %v2785_v41  ;;  %v6170_v23 = vsub.f32 %v6030_v57, %v2785_v41  ;;  %v2786_v33 = vmul.f32 0.00390625, %v2753_v35  ;;  %2875 = vadd.xlane.f32.xlu1 %v2874_v45 }
 0x526   : > { %v6173_v10 = vsub.f32 %v6033_v27, %v2786_v33  ;;  %v6176_v37 = vsub.f32 %v6036_v15, %v2786_v33  ;;  %v2839_v4 = vmul.f32 %v6167_v31, %v6167_v31  ;;  %v2840_v56 = vmul.f32 %v6170_v23, %v6170_v23 }
 0x528   : > { %v2877_v12 = vadd.f32 %v2840_v56, %v2839_v4  ;;  %v2841_v2 = vmul.f32 %v6173_v10, %v6173_v10  ;;  %v2842_v57 = vmul.f32 %v6176_v37, %v6176_v37 }
 0x529   : > { %v2756_v22 = vpop.xlane.xlu0 %2755 }
 0x52a   : > { %v2787_v38 = vmul.f32 0.00390625, %v2756_v22  ;;  %2878 = vadd.xlane.f32.xlu0 %v2877_v12  ;;  %v2880_v27 = vadd.f32 %v2842_v57, %v2841_v2 }
 0x52b   : > { %v2759_v50 = vpop.xlane.xlu1 %2758 }
 0x52c   : > { %v6187_v15 = vsub.f32 %v6043_v36, %v2787_v38  ;;  %v6190_v30 = vsub.f32 %v6046_v5, %v2787_v38  ;;  %v2788_v3 = vmul.f32 0.00390625, %v2759_v50  ;;  %2881 = vadd.xlane.f32.xlu1 %v2880_v27 }
 0x52e   : > { %v6193_v0 = vsub.f32 %v6049_v46, %v2788_v3  ;;  %v6196_v44 = vsub.f32 %v6052_v49, %v2788_v3  ;;  %v2843_v16 = vmul.f32 %v6187_v15, %v6187_v15  ;;  %v2844_v28 = vmul.f32 %v6190_v30, %v6190_v30 }
 0x530   : > { %v2883_v24 = vadd.f32 %v2844_v28, %v2843_v16  ;;  %v2845_v36 = vmul.f32 %v6193_v0, %v6193_v0  ;;  %v2846_v5 = vmul.f32 %v6196_v44, %v6196_v44 }
 0x531   : > { %v2762_v47 = vpop.xlane.xlu0 %2761 }
 0x532   : > { %v2789_v53 = vmul.f32 0.00390625, %v2762_v47  ;;  %2884 = vadd.xlane.f32.xlu0 %v2883_v24  ;;  %v2886_v46 = vadd.f32 %v2846_v5, %v2845_v36 }
 0x533   : > { %v2765_v6 = vpop.xlane.xlu1 %2764 }
 0x534   : > { %v6207_v49 = vsub.f32 %v6059_v21, %v2789_v53  ;;  %v6210_v59 = vsub.f32 %v6062_v1, %v2789_v53  ;;  %v2790_v32 = vmul.f32 0.00390625, %v2765_v6  ;;  %2887 = vadd.xlane.f32.xlu1 %v2886_v46 }
 0x536   : > { %v6213_v18 = vsub.f32 %v6065_v20, %v2790_v32  ;;  %v6216_v8 = vsub.f32 %v6068_v19, %v2790_v32  ;;  %v2847_v7 = vmul.f32 %v6207_v49, %v6207_v49  ;;  %v2848_v61 = vmul.f32 %v6210_v59, %v6210_v59 }
 0x538   : > { %v2889_v34 = vadd.f32 %v2848_v61, %v2847_v7  ;;  %v2849_v21 = vmul.f32 %v6213_v18, %v6213_v18  ;;  %v2850_v1 = vmul.f32 %v6216_v8, %v6216_v8 }
 0x539   : > { %v2768_v41 = vpop.xlane.xlu0 %2767 }
 0x53a   : > { %v2791_v45 = vmul.f32 0.00390625, %v2768_v41  ;;  %2890 = vadd.xlane.f32.xlu0 %v2889_v34  ;;  %v2892_v20 = vadd.f32 %v2850_v1, %v2849_v21  ;;  %v6705_v21 = vld [vmem:[#allocation17_spill] sm:$0xff]  ;;  %v6706_v41 = vld [vmem:[#allocation50_spill] sm:$0xff] }
 0x53b   : > { %v2771_v35 = vpop.xlane.xlu1 %2770  ;;  %v2990_v1 = vrot.slane %v5966_v9, %v6705_v21 }
 0x53c   : > { %v6227_v19 = vsub.f32 %v6075_v14, %v2791_v45  ;;  %v6230_v33 = vsub.f32 %v6078_v63, %v2791_v45  ;;  %v2792_v4 = vmul.f32 0.00390625, %v2771_v35  ;;  %2893 = vadd.xlane.f32.xlu1 %v2892_v20  ;;  %v2994_v45 = vrot.slane %v5966_v9, %v6706_v41 }
 0x53e   : > { %v6233_v56 = vsub.f32 %v6081_v51, %v2792_v4  ;;  %v6236_v12 = vsub.f32 %v6084_v17, %v2792_v4  ;;  %v2851_v2 = vmul.f32 %v6227_v19, %v6227_v19  ;;  %v2852_v57 = vmul.f32 %v6230_v33, %v6230_v33 }
 0x540   : > { %v2895_v22 = vadd.f32 %v2852_v57, %v2851_v2  ;;  %v2853_v14 = vmul.f32 %v6233_v56, %v6233_v56  ;;  %v2854_v63 = vmul.f32 %v6236_v12, %v6236_v12  ;;  %v6707_v2 = vld [vmem:[#allocation51_spill] sm:$0xff] }
 0x541   : > { %v2774_v38 = vpop.xlane.xlu0 %2773  ;;  %v3044_v57 = vrot.slane %v5966_v9, %v6707_v2 }
 0x542   : > { %v2793_v27 = vmul.f32 0.00390625, %v2774_v38  ;;  %2896 = vadd.xlane.f32.xlu0 %v2895_v22  ;;  %v2898_v51 = vadd.f32 %v2854_v63, %v2853_v14  ;;  %v6708_v22 = vld [vmem:[#allocation52_spill] sm:$0xff]  ;;  %v6275_v38 = vrot.slane %v2990_v1, %v6705_v21 }
 0x543   : > { %v2777_v50 = vpop.xlane.xlu1 %2776  ;;  %v3040_v14 = vrot.slane %v5966_v9, %v6708_v22 }
 0x544   : > { %v6247_v17 = vsub.f32 %v6091_v58, %v2793_v27  ;;  %v6250_v3 = vsub.f32 %v6094_v52, %v2793_v27  ;;  %v2794_v16 = vmul.f32 0.00390625, %v2777_v50  ;;  %2899 = vadd.xlane.f32.xlu1 %v2898_v51  ;;  %v6278_v27 = vrot.slane %v2994_v45, %v6705_v21 }
 0x545   : > { %v6281_v50 = vrot.slane %v3040_v14, %v6708_v22 }
 0x546   : > { %v6253_v28 = vsub.f32 %v6097_v43, %v2794_v16  ;;  %v6256_v24 = vsub.f32 %v6100_v40, %v2794_v16  ;;  %v2855_v36 = vmul.f32 %v6247_v17, %v6247_v17  ;;  %v2856_v5 = vmul.f32 %v6250_v3, %v6250_v3 }
 0x547   : > { %v6284_v16 = vrot.slane %v3044_v57, %v6708_v22 }
 0x548   : > { %v2901_v47 = vadd.f32 %v2856_v5, %v2855_v36  ;;  %v2857_v58 = vmul.f32 %v6253_v28, %v6253_v28  ;;  %v2858_v52 = vmul.f32 %v6256_v24, %v6256_v24 }
 0x54a   : > { %2902 = vadd.xlane.f32.xlu0 %v2901_v47  ;;  %v2904_v53 = vadd.f32 %v2858_v52, %v2857_v58 }
 0x54c   : > { %2905 = vadd.xlane.f32.xlu1 %v2904_v53 }
 0x59f   : > { %v2861_v43 = vpop.xlane.xlu0 %2860 }
 0x5a0   : > { %v2907_v46 = vmul.f32 0.00390625, %v2861_v43 }
 0x5a1   : > { %v2864_v40 = vpop.xlane.xlu1 %2863 }
 0x5a2   : > { %v2923_v6 = vadd.f32 1e-05, %v2907_v46  ;;  %v2908_v32 = vmul.f32 0.00390625, %v2864_v40 }
 0x5a4   : > { %4095 = vrsqrt.f32 %v2923_v6  ;;  %v2924_v7 = vadd.f32 1e-05, %v2908_v32 }
 0x5a6   : > { %4097 = vrsqrt.f32 %v2924_v7 }
 0x5a7   : > { %v2867_v61 = vpop.xlane.xlu0 %2866 }
 0x5a8   : > { %v2909_v34 = vmul.f32 0.00390625, %v2867_v61 }
 0x5a9   : > { %v2870_v20 = vpop.xlane.xlu1 %2869 }
 0x5aa   : > { %v2925_v35 = vadd.f32 1e-05, %v2909_v34  ;;  %v2910_v4 = vmul.f32 0.00390625, %v2870_v20 }
 0x5ac   : > { %4099 = vrsqrt.f32 %v2925_v35  ;;  %v2926_v63 = vadd.f32 1e-05, %v2910_v4 }
 0x5ae   : > { %v4096_v51 = vpop.eup %4095  ;;  %4101 = vrsqrt.f32 %v2926_v63 }
 0x5af   : > { %v2955_v36 = vmul.f32 %v4096_v51, %v6107_v55  ;;  %v2956_v9 = vmul.f32 %v4096_v51, %v6110_v62  ;;  %v2873_v5 = vpop.xlane.xlu0 %2872 }
 0x5b0   : > { %v4098_v47 = vpop.eup %4097  ;;  %v2911_v58 = vmul.f32 0.00390625, %v2873_v5 }
 0x5b1   : > { %v3005_v52 = vmul.f32 %v6275_v38, %v2955_v36  ;;  %v3006_v53 = vmul.f32 %v6278_v27, %v2956_v9  ;;  %v2957_v43 = vmul.f32 %v4098_v47, %v6113_v60  ;;  %v2958_v46 = vmul.f32 %v4098_v47, %v6116_v11  ;;  %v2876_v40 = vpop.xlane.xlu1 %2875 }
 0x5b2   : > { %v2927_v6 = vadd.f32 1e-05, %v2911_v58  ;;  %v2912_v32 = vmul.f32 0.00390625, %v2876_v40 }
 0x5b3   : > { %v3055_v7 = vadd.f32 %v6281_v50, %v3005_v52  ;;  %v3056_v55 = vadd.f32 %v6284_v16, %v3006_v53  ;;  %v3007_v62 = vmul.f32 %v6275_v38, %v2957_v43  ;;  %v3008_v61 = vmul.f32 %v6278_v27, %v2958_v46 }
 0x5b4   : > { %4103 = vrsqrt.f32 %v2927_v6  ;;  %v2928_v34 = vadd.f32 1e-05, %v2912_v32 }
 0x5b5   : > { %3087 = vst [vmem:[%s6298_s10] sm:$0xff] %v3055_v7  ;;  %3088 = vst [vmem:[%s6298_s10 + $0x8] sm:$0xff] %v3056_v55  ;;  %v3057_v60 = vadd.f32 %v6281_v50, %v3007_v62  ;;  %v3058_v11 = vadd.f32 %v6284_v16, %v3008_v61 }
 0x5b6   : > { %v4100_v21 = vpop.eup %4099  ;;  %4105 = vrsqrt.f32 %v2928_v34 }
 0x5b7   : > { %3089 = vst [vmem:[%s6298_s10 + $0x10] sm:$0xff] %v3057_v60  ;;  %3090 = vst [vmem:[%s6298_s10 + $0x18] sm:$0xff] %v3058_v11  ;;  %v2959_v1 = vmul.f32 %v4100_v21, %v6127_v48  ;;  %v2960_v41 = vmul.f32 %v4100_v21, %v6130_v39  ;;  %v2879_v45 = vpop.xlane.xlu0 %2878 }
 0x5b8   : > { %v4102_v20 = vpop.eup %4101  ;;  %v2913_v35 = vmul.f32 0.00390625, %v2879_v45 }
 0x5b9   : > { %v3009_v4 = vmul.f32 %v6275_v38, %v2959_v1  ;;  %v3010_v2 = vmul.f32 %v6278_v27, %v2960_v41  ;;  %v2961_v57 = vmul.f32 %v4102_v20, %v6133_v29  ;;  %v2962_v22 = vmul.f32 %v4102_v20, %v6136_v26  ;;  %v2882_v14 = vpop.xlane.xlu1 %2881 }
 0x5ba   : > { %v2929_v63 = vadd.f32 1e-05, %v2913_v35  ;;  %v2914_v48 = vmul.f32 0.00390625, %v2882_v14 }
 0x5bb   : > { %v3059_v39 = vadd.f32 %v6281_v50, %v3009_v4  ;;  %v3060_v51 = vadd.f32 %v6284_v16, %v3010_v2  ;;  %v3011_v36 = vmul.f32 %v6275_v38, %v2961_v57  ;;  %v3012_v9 = vmul.f32 %v6278_v27, %v2962_v22 }
 0x5bc   : > { %4107 = vrsqrt.f32 %v2929_v63  ;;  %v2930_v5 = vadd.f32 1e-05, %v2914_v48 }
 0x5bd   : > { %3091 = vst [vmem:[%s6298_s10 + $0x20] sm:$0xff] %v3059_v39  ;;  %3092 = vst [vmem:[%s6298_s10 + $0x28] sm:$0xff] %v3060_v51  ;;  %v3061_v29 = vadd.f32 %v6281_v50, %v3011_v36  ;;  %v3062_v26 = vadd.f32 %v6284_v16, %v3012_v9 }
 0x5be   : > { %v4104_v47 = vpop.eup %4103  ;;  %4109 = vrsqrt.f32 %v2930_v5 }
 0x5bf   : > { %3093 = vst [vmem:[%s6298_s10 + $0x30] sm:$0xff] %v3061_v29  ;;  %3094 = vst [vmem:[%s6298_s10 + $0x38] sm:$0xff] %v3062_v26  ;;  %v2963_v58 = vmul.f32 %v4104_v47, %v6147_v13  ;;  %v2964_v52 = vmul.f32 %v4104_v47, %v6150_v42  ;;  %v2885_v53 = vpop.xlane.xlu0 %2884 }
 0x5c0   : > { %v4106_v43 = vpop.eup %4105  ;;  %v2915_v46 = vmul.f32 0.00390625, %v2885_v53 }
 0x5c1   : > { %v3013_v40 = vmul.f32 %v6275_v38, %v2963_v58  ;;  %v3014_v6 = vmul.f32 %v6278_v27, %v2964_v52  ;;  %v2965_v32 = vmul.f32 %v4106_v43, %v6153_v25  ;;  %v2966_v7 = vmul.f32 %v4106_v43, %v6156_v54  ;;  %v2888_v55 = vpop.xlane.xlu1 %2887 }
 0x5c2   : > { %v2931_v62 = vadd.f32 1e-05, %v2915_v46  ;;  %v2916_v13 = vmul.f32 0.00390625, %v2888_v55 }
 0x5c3   : > { %v3063_v42 = vadd.f32 %v6281_v50, %v3013_v40  ;;  %v3064_v61 = vadd.f32 %v6284_v16, %v3014_v6  ;;  %v3015_v34 = vmul.f32 %v6275_v38, %v2965_v32  ;;  %v3016_v60 = vmul.f32 %v6278_v27, %v2966_v7 }
 0x5c4   : > { %4111 = vrsqrt.f32 %v2931_v62  ;;  %v2932_v11 = vadd.f32 1e-05, %v2916_v13 }
 0x5c5   : > { %3095 = vst [vmem:[%s6298_s10 + $0x40] sm:$0xff] %v3063_v42  ;;  %3096 = vst [vmem:[%s6298_s10 + $0x48] sm:$0xff] %v3064_v61  ;;  %v3065_v25 = vadd.f32 %v6281_v50, %v3015_v34  ;;  %v3066_v54 = vadd.f32 %v6284_v16, %v3016_v60 }
 0x5c6   : > { %v4108_v21 = vpop.eup %4107  ;;  %4113 = vrsqrt.f32 %v2932_v11 }
 0x5c7   : > { %3097 = vst [vmem:[%s6298_s10 + $0x50] sm:$0xff] %v3065_v25  ;;  %3098 = vst [vmem:[%s6298_s10 + $0x58] sm:$0xff] %v3066_v54  ;;  %v2967_v1 = vmul.f32 %v4108_v21, %v6167_v31  ;;  %v2968_v41 = vmul.f32 %v4108_v21, %v6170_v23  ;;  %v2891_v45 = vpop.xlane.xlu0 %2890 }
 0x5c8   : > { %v4110_v20 = vpop.eup %4109  ;;  %v2917_v35 = vmul.f32 0.00390625, %v2891_v45 }
 0x5c9   : > { %v3017_v4 = vmul.f32 %v6275_v38, %v2967_v1  ;;  %v3018_v2 = vmul.f32 %v6278_v27, %v2968_v41  ;;  %v2969_v57 = vmul.f32 %v4110_v20, %v6173_v10  ;;  %v2970_v22 = vmul.f32 %v4110_v20, %v6176_v37  ;;  %v2894_v14 = vpop.xlane.xlu1 %2893 }
 0x5ca   : > { %v2933_v63 = vadd.f32 1e-05, %v2917_v35  ;;  %v2918_v31 = vmul.f32 0.00390625, %v2894_v14 }
 0x5cb   : > { %v3067_v23 = vadd.f32 %v6281_v50, %v3017_v4  ;;  %v3068_v48 = vadd.f32 %v6284_v16, %v3018_v2  ;;  %v3019_v39 = vmul.f32 %v6275_v38, %v2969_v57  ;;  %v3020_v51 = vmul.f32 %v6278_v27, %v2970_v22 }
 0x5cc   : > { %4115 = vrsqrt.f32 %v2933_v63  ;;  %v2934_v36 = vadd.f32 1e-05, %v2918_v31 }
 0x5cd   : > { %3099 = vst [vmem:[%s6298_s10 + $0x60] sm:$0xff] %v3067_v23  ;;  %3100 = vst [vmem:[%s6298_s10 + $0x68] sm:$0xff] %v3068_v48  ;;  %v3069_v10 = vadd.f32 %v6281_v50, %v3019_v39  ;;  %v3070_v37 = vadd.f32 %v6284_v16, %v3020_v51 }
 0x5ce   : > { %v4112_v9 = vpop.eup %4111  ;;  %4117 = vrsqrt.f32 %v2934_v36 }
 0x5cf   : > { %3101 = vst [vmem:[%s6298_s10 + $0x70] sm:$0xff] %v3069_v10  ;;  %3102 = vst [vmem:[%s6298_s10 + $0x78] sm:$0xff] %v3070_v37  ;;  %v2971_v5 = vmul.f32 %v4112_v9, %v6187_v15  ;;  %v2972_v29 = vmul.f32 %v4112_v9, %v6190_v30  ;;  %v2897_v26 = vpop.xlane.xlu0 %2896 }
 0x5d0   : > { %v4114_v47 = vpop.eup %4113  ;;  %v2919_v58 = vmul.f32 0.00390625, %v2897_v26 }
 0x5d1   : > { %v3021_v52 = vmul.f32 %v6275_v38, %v2971_v5  ;;  %v3022_v53 = vmul.f32 %v6278_v27, %v2972_v29  ;;  %v2973_v43 = vmul.f32 %v4114_v47, %v6193_v0  ;;  %v2974_v46 = vmul.f32 %v4114_v47, %v6196_v44  ;;  %v2900_v40 = vpop.xlane.xlu1 %2899 }
 0x5d2   : > { %v2935_v6 = vadd.f32 1e-05, %v2919_v58  ;;  %v2920_v15 = vmul.f32 0.00390625, %v2900_v40 }
 0x5d3   : > { %v3071_v30 = vadd.f32 %v6281_v50, %v3021_v52  ;;  %v3072_v32 = vadd.f32 %v6284_v16, %v3022_v53  ;;  %v3023_v7 = vmul.f32 %v6275_v38, %v2973_v43  ;;  %v3024_v55 = vmul.f32 %v6278_v27, %v2974_v46 }
 0x5d4   : > { %4119 = vrsqrt.f32 %v2935_v6  ;;  %v2936_v62 = vadd.f32 1e-05, %v2920_v15 }
 0x5d5   : > { %3103 = vst [vmem:[%s6298_s10 + $0x80] sm:$0xff] %v3071_v30  ;;  %3104 = vst [vmem:[%s6298_s10 + $0x88] sm:$0xff] %v3072_v32  ;;  %v3073_v0 = vadd.f32 %v6281_v50, %v3023_v7  ;;  %v3074_v44 = vadd.f32 %v6284_v16, %v3024_v55 }
 0x5d6   : > { %v4116_v13 = vpop.eup %4115  ;;  %4121 = vrsqrt.f32 %v2936_v62 }
 0x5d7   : > { %3105 = vst [vmem:[%s6298_s10 + $0x90] sm:$0xff] %v3073_v0  ;;  %3106 = vst [vmem:[%s6298_s10 + $0x98] sm:$0xff] %v3074_v44  ;;  %v2975_v42 = vmul.f32 %v4116_v13, %v6207_v49  ;;  %v2976_v61 = vmul.f32 %v4116_v13, %v6210_v59  ;;  %v2903_v34 = vpop.xlane.xlu0 %2902 }
 0x5d8   : > { %v4118_v60 = vpop.eup %4117  ;;  %v2921_v11 = vmul.f32 0.00390625, %v2903_v34 }
 0x5d9   : > { %v3025_v25 = vmul.f32 %v6275_v38, %v2975_v42  ;;  %v3026_v54 = vmul.f32 %v6278_v27, %v2976_v61  ;;  %v2977_v21 = vmul.f32 %v4118_v60, %v6213_v18  ;;  %v2978_v1 = vmul.f32 %v4118_v60, %v6216_v8  ;;  %v2906_v41 = vpop.xlane.xlu1 %2905 }
 0x5da   : > { %v2937_v45 = vadd.f32 1e-05, %v2921_v11  ;;  %v2922_v49 = vmul.f32 0.00390625, %v2906_v41 }
 0x5db   : > { %v3075_v59 = vadd.f32 %v6281_v50, %v3025_v25  ;;  %v3076_v20 = vadd.f32 %v6284_v16, %v3026_v54  ;;  %v3027_v35 = vmul.f32 %v6275_v38, %v2977_v21  ;;  %v3028_v4 = vmul.f32 %v6278_v27, %v2978_v1 }
 0x5dc   : > { %4123 = vrsqrt.f32 %v2937_v45  ;;  %v2938_v2 = vadd.f32 1e-05, %v2922_v49 }
 0x5dd   : > { %3107 = vst [vmem:[%s6298_s10 + $0xa0] sm:$0xff] %v3075_v59  ;;  %3108 = vst [vmem:[%s6298_s10 + $0xa8] sm:$0xff] %v3076_v20  ;;  %v3077_v18 = vadd.f32 %v6281_v50, %v3027_v35  ;;  %v3078_v8 = vadd.f32 %v6284_v16, %v3028_v4 }
 0x5de   : > { %v4120_v57 = vpop.eup %4119  ;;  %4125 = vrsqrt.f32 %v2938_v2 }
 0x5df   : > { %3109 = vst [vmem:[%s6298_s10 + $0xb0] sm:$0xff] %v3077_v18  ;;  %3110 = vst [vmem:[%s6298_s10 + $0xb8] sm:$0xff] %v3078_v8  ;;  %v2979_v22 = vmul.f32 %v4120_v57, %v6227_v19  ;;  %v2980_v14 = vmul.f32 %v4120_v57, %v6230_v33 }
 0x5e0   : > { %v4122_v63 = vpop.eup %4121 }
 0x5e1   : > { %v3029_v31 = vmul.f32 %v6275_v38, %v2979_v22  ;;  %v3030_v23 = vmul.f32 %v6278_v27, %v2980_v14  ;;  %v2981_v48 = vmul.f32 %v4122_v63, %v6233_v56  ;;  %v2982_v39 = vmul.f32 %v4122_v63, %v6236_v12 }
 0x5e3   : > { %v3079_v51 = vadd.f32 %v6281_v50, %v3029_v31  ;;  %v3080_v36 = vadd.f32 %v6284_v16, %v3030_v23  ;;  %v3031_v10 = vmul.f32 %v6275_v38, %v2981_v48  ;;  %v3032_v19 = vmul.f32 %v6278_v27, %v2982_v39 }
 0x5e5   : > { %3111 = vst [vmem:[%s6298_s10 + $0xc0] sm:$0xff] %v3079_v51  ;;  %3112 = vst [vmem:[%s6298_s10 + $0xc8] sm:$0xff] %v3080_v36  ;;  %v3081_v33 = vadd.f32 %v6281_v50, %v3031_v10  ;;  %v3082_v37 = vadd.f32 %v6284_v16, %v3032_v19 }
 0x5e6   : > { %v4124_v9 = vpop.eup %4123 }
 0x5e7   : > { %3113 = vst [vmem:[%s6298_s10 + $0xd0] sm:$0xff] %v3081_v33  ;;  %3114 = vst [vmem:[%s6298_s10 + $0xd8] sm:$0xff] %v3082_v37  ;;  %v2983_v56 = vmul.f32 %v4124_v9, %v6247_v17  ;;  %v2984_v12 = vmul.f32 %v4124_v9, %v6250_v3 }
 0x5e8   : > { %v4126_v5 = vpop.eup %4125 }
 0x5e9   : > { %v3033_v29 = vmul.f32 %v6275_v38, %v2983_v56  ;;  %v3034_v26 = vmul.f32 %v6278_v27, %v2984_v12  ;;  %v2985_v47 = vmul.f32 %v4126_v5, %v6253_v28  ;;  %v2986_v58 = vmul.f32 %v4126_v5, %v6256_v24  ;;  %3126 = sbr.rel (!%p6709_p1) target bundleno = 1548 (0x60c), region = 60 }
 0x5eb   : > { %v3083_v52 = vadd.f32 %v6281_v50, %v3033_v29  ;;  %v3084_v53 = vadd.f32 %v6284_v16, %v3034_v26  ;;  %v3035_v43 = vmul.f32 %v6275_v38, %v2985_v47  ;;  %v3036_v17 = vmul.f32 %v6278_v27, %v2986_v58 }
 0x5ed   : > { %3115 = vst [vmem:[%s6298_s10 + $0xe0] sm:$0xff] %v3083_v52  ;;  %3116 = vst [vmem:[%s6298_s10 + $0xe8] sm:$0xff] %v3084_v53  ;;  %v3085_v3 = vadd.f32 %v6281_v50, %v3035_v43  ;;  %v3086_v46 = vadd.f32 %v6284_v16, %v3036_v17 }
 0x5ef   : > { %3117 = vst [vmem:[%s6298_s10 + $0xf0] sm:$0xff] %v3085_v3  ;;  %3118 = vst [vmem:[%s6298_s10 + $0xf8] sm:$0xff] %v3086_v46 }
 0x5f0   : > { %s6719_s9 = smov (!%p3129_p3, %s3128_s9), 16 }
 0x5f1   : > { %s6422_s14 = sshll.u32 %s6719_s9, 8 }
 0x5f2   : > { %s3134_s15 = ssub.s32 4096, %s6422_s14 }
 0x5f3   : > { %3135 = vsyncadd %s3120_s17, %s3134_s15  ;;  %p3460_p6 = scmp.ne.s32.totalorder %s6422_s14, 0  ;;  %s3472_s30 = sshll.u32 %s4379_s22, 12 }
 0x5f4   : > { %s6432_s25 = scalar_lea.hbm %s6486_s5, %s3472_s30  ;;  %s3141_s28 = sshll.u32 %s6298_s10, 4  ;;  %s6435_s28 = int_to_ptr.vmem [resolvable:$true] %s3141_s28 }
 0x5f5   : > { %s4239_s26 = scalar_lea.vmem %s6435_s28, %s6422_s14  ;;  %s4325_s8 = smov [#allocation10]  }
 0x5f6   : > { %p4240_p5 = scmp.ne.s32.totalorder %s6435_s28, %s4239_s26  ;;  %s4243_s27 = sshll.u32 %s4325_s8, 4  ;;  %s4244_s27 = int_to_ptr.vmem [resolvable:$false] %s4243_s27 }
 0x5f7   : > { %s4245_s22 = scalar_lea.vmem %s4244_s27, 8192  ;;  %p4246_p0 = scmp.lt.s32.totalorder %s6435_s28, %s4244_s27 }
 0x5f8   : > { %p4241_p11 = pnand %p4240_p5, %p3460_p6  ;;  %p4247_p12 = scmp.lt.s32.totalorder %s4245_s22, %s4239_s26 }
 0x5fa   : > { %p4242_p13 = pneg %p4241_p11  ;;  %p4248_p7 = por %p4247_p12, %p4246_p0 }
 0x5fc   : > { %p4249_p2 = pnand %p4248_p7, %p4242_p13 }
 0x5fe   : > { %4252 = shalt.err (!%p4249_p2)
}
 0x5ff   : > { %s4253_s11 = scalar_lea.hbm %s6432_s25, %s6422_s14  ;;  %s4257_s7 = scalar_lea.hbm %s6486_s5, 6400 }
 0x600   : > { %p4254_p8 = scmp.ne.s32.totalorder %s6432_s25, %s4253_s11  ;;  %p4258_p1 = scmp.lt.u32.totalorder %s6432_s25, %s6486_s5 }
 0x601   : > { %p4259_p3 = scmp.lt.u32.totalorder %s4257_s7, %s4253_s11  ;;  %p4261_p11 = scmp.lt.u32.totalorder %s4253_s11, %s6432_s25 }
 0x602   : > { %p4255_p9 = pnand %p4254_p8, %p3460_p6 }
 0x603   : > { %p4260_p5 = por %p4259_p3, %p4258_p1 }
 0x604   : > { %p4256_p10 = pneg %p4255_p9 }
 0x605   : > { %p4262_p13 = por %p4261_p11, %p4260_p5 }
 0x607   : > { %p4263_p0 = pnand %p4262_p13, %p4256_p10 }
 0x609   : > { %4266 = shalt.err (!%p4263_p0)
}
 0x60a   : > { %s4326_s9 = smov 256   ;;  %s4327_s15 = smov 16  }
 0x60b   : > { %3147 = dma.vmem_to_hbm [thread:$0]  (%p3460_p6), %s6435_s28, %s6422_s14, %s6432_s25, %s3120_s17, %s4326_s9, %s4326_s9, %s4327_s15  }
 0x60c PF: > { %s3156_s30 = sand.u32 1, %s4301_s18   ;;  %p6710_p12 = scmp.ne.s32.totalorder %s6572_s6, 0 }
 0x60d   : > { %s3157_s16 = scalar_lea.sflag [#allocation4], %s3156_s30 }
 0x60e   : > { %p3562_p7 = pnand %p3248_p4, %p6710_p12 }
 0x610   : > { %4296 = dma.done.wait (!%p3562_p7), %s3157_s16, 4096  }
 0x611   : > { %4298 = vsyncadd (!%p3562_p7), %s3157_s16, 4294963200  ;;  %s6711_s21 = sld [smem:[#allocation15_spill]]  ;;  %s6712_s13 = sld [smem:[#allocation16_spill]] }
 0x612   : > { %s6713_s18 = smov %s4305_s19  ;;  %s6714_s19 = smov %s4309_s20 }
 0x617   : > { %p20_p2 = scmp.ge.s32.totalorder %s6711_s21, 4   ;;  %s6715_s20 = smov %s6712_s13 }
 0x619   :  { %22 = sbr.rel (!%p20_p2) target bundleno = 7 (0x7), region = 97 }
 0x620   :  { %3162 = vsyncpa [#allocation3], 1 }
 0x621   :  { %3164 = vsyncpa [#allocation3 + $0x1], 1 }
 0x622   :  { %3165 = vsyncpa [#allocation6], 1 }
 0x623   :  { %3166 = vsyncpa [#allocation9], 1 }
 0x624   :  { %3167 = vsyncpa [#allocation4], 1 }
 0x625   :  { %3169 = vsyncpa [#allocation4 + $0x1], 1 }

</bundles_post_ra>
